<compile_context>
chip_gen: v5e
topology: v5e:2x2
jax: 0.10.0
libtpu: 0.0.40
codegen_flags: <defaults>
</compile_context>

<pallas_src>
import functools
import math

import jax
import jax.numpy as jnp
from jax.experimental import pallas as pl
from jax.experimental.pallas import tpu as pltpu  # noqa: F401  (TPU backend)


# ----------------------------- configuration --------------------------------
class Config:
    ROLL_STEPS = 2
    A2C_CONV_LAYERS = (
        {"in_c": 4, "out_c": 8, "k": 3, "s": 2},
        {"in_c": 8, "out_c": 16, "k": 3, "s": 2},
    )
    ROLLOUT_HIDDEN = 32
    FC_LAYER = 64
    POLICY_LAYER = 64   # policy head reads fc output -> equals FC_LAYER
    VALUE_LAYER = 64    # value head reads fc output -> equals FC_LAYER
    IMG_SHAPE = (4, 16, 16)


INPUT_SHAPE = (4, 16, 16)   # (C, H, W)
N_ACTIONS = 3
ACTION_PAD = 8              # one-hot padded to 8 lanes (zero cols/rows)
EM_HIDDEN = 128             # synthetic environment-model hidden width
POLICY_HIDDEN = 128         # synthetic distilled-policy hidden width


# ------------------------------ spec helpers ---------------------------------
def _spec(shape):
    """Full-array block for a grid=(1,) kernel."""
    zeros = (0,) * len(shape)
    return pl.BlockSpec(shape, lambda i, _z=zeros: _z)


# ------------------------------ Pallas kernels -------------------------------
def _policy_kernel(x_ref, w1_ref, b1_ref, wh_ref, bh_ref, o_ref):
    """Distilled policy: relu(x@w1+b1) @ [w_pi|w_v] + b  -> packed (M, A+1)."""
    h = jnp.dot(x_ref[...], w1_ref[...], preferred_element_type=jnp.float32)
    h = jnp.maximum(h + b1_ref[...], 0.0)
    y = jnp.dot(h.astype(wh_ref.dtype), wh_ref[...],
                preferred_element_type=jnp.float32)
    o_ref[...] = y + bh_ref[...]


def _em_kernel(obs_ref, aoh_ref, w1o_ref, w1a_ref, b1_ref, wo_ref, bo_ref,
               obs_out_ref, r_out_ref, *, obs_dim):
    """Env model for all rollout steps at once; packed [obs_next|reward] head."""
    h = jnp.dot(obs_ref[...], w1o_ref[...], preferred_element_type=jnp.float32)
    h = h + jnp.dot(aoh_ref[...], w1a_ref[...],
                    preferred_element_type=jnp.float32)
    h = jnp.maximum(h + b1_ref[...], 0.0)
    y = jnp.dot(h.astype(wo_ref.dtype), wo_ref[...],
                preferred_element_type=jnp.float32)
    y = y + bo_ref[...]
    obs_out_ref[...] = y[:, :obs_dim].astype(obs_out_ref.dtype)
    r_out_ref[...] = y[:, obs_dim:].astype(r_out_ref.dtype)


def _dual_conv_kernel(xa_ref, wa_ref, ba_ref, xb_ref, wb_ref, bb_ref,
                      oa_ref, ob_ref):
    """Two im2col matmul+bias+ReLU (main conv path + encoder conv path)."""
    ya = jnp.dot(xa_ref[...], wa_ref[...],
                 preferred_element_type=jnp.float32) + ba_ref[...]
    oa_ref[...] = jnp.maximum(ya, 0.0).astype(oa_ref.dtype)
    yb = jnp.dot(xb_ref[...], wb_ref[...],
                 preferred_element_type=jnp.float32) + bb_ref[...]
    ob_ref[...] = jnp.maximum(yb, 0.0).astype(ob_ref.dtype)


def _lstm_kernel(x_ref, wx_ref, wh_ref, b_ref, h_out_ref, *, steps, hidden):
    """T-step LSTM; h/c carried in-kernel, gate nonlinearity via lane mask."""
    n = x_ref.shape[1]
    h = jnp.zeros((n, hidden), jnp.float32)
    c = jnp.zeros((n, hidden), jnp.float32)
    lane = jax.lax.broadcasted_iota(jnp.int32, (n, 4 * hidden), 1)
    g_mask = (lane >= 2 * hidden) & (lane < 3 * hidden)
    for t in range(steps):                       # T=2: static unroll
        x_t = x_ref[t]
        gates = jnp.dot(x_t, wx_ref[...], preferred_element_type=jnp.float32)
        gates = gates + jnp.dot(h.astype(wh_ref.dtype), wh_ref[...],
                                preferred_element_type=jnp.float32)
        gates = gates + b_ref[...]
        act = jnp.where(g_mask, jnp.tanh(gates), jax.nn.sigmoid(gates))
        i_g = act[:, 0 * hidden:1 * hidden]
        f_g = act[:, 1 * hidden:2 * hidden]
        g_g = act[:, 2 * hidden:3 * hidden]
        o_g = act[:, 3 * hidden:4 * hidden]
        c = f_g * c + i_g * g_g
        h = o_g * jnp.tanh(c)
    h_out_ref[...] = h.astype(h_out_ref.dtype)


def _head_kernel(conv_ref, enc_ref, wfc_c_ref, wfc_e_ref, bfc_ref,
                 wh_ref, bh_ref, pi_ref, v_ref, *, n_actions):
    """fc(ReLU) + packed [policy|value] head in one kernel."""
    fc = jnp.dot(conv_ref[...], wfc_c_ref[...],
                 preferred_element_type=jnp.float32)
    fc = fc + jnp.dot(enc_ref[...], wfc_e_ref[...],
                      preferred_element_type=jnp.float32)
    fc = jnp.maximum(fc + bfc_ref[...], 0.0)
    y = jnp.dot(fc.astype(wh_ref.dtype), wh_ref[...],
                preferred_element_type=jnp.float32) + bh_ref[...]
    pi_ref[...] = y[:, :n_actions].astype(pi_ref.dtype)
    v_ref[...] = y[:, n_actions:].astype(v_ref.dtype)


# ------------------------------ kernel wrappers -------------------------------
def pallas_policy(obs_bf, p):
    m = obs_bf.shape[0]
    n_out = p["w_head"].shape[1]
    return pl.pallas_call(
        _policy_kernel,
        out_shape=jax.ShapeDtypeStruct((m, n_out), jnp.float32),
        grid=(1,),
        in_specs=[_spec(obs_bf.shape), _spec(p["w1"].shape), _spec(p["b1"].shape),
                  _spec(p["w_head"].shape), _spec(p["b_head"].shape)],
        out_specs=_spec((m, n_out)),
    )(obs_bf, p["w1"], p["b1"], p["w_head"], p["b_head"])


def pallas_env_model(obs_tiled_bf, aoh_bf, p, obs_dim):
    m = obs_tiled_bf.shape[0]
    kernel = functools.partial(_em_kernel, obs_dim=obs_dim)
    return pl.pallas_call(
        kernel,
        out_shape=(jax.ShapeDtypeStruct((m, obs_dim), jnp.bfloat16),
                   jax.ShapeDtypeStruct((m, 1), jnp.bfloat16)),
        grid=(1,),
        in_specs=[_spec(obs_tiled_bf.shape), _spec(aoh_bf.shape),
                  _spec(p["w1_obs"].shape), _spec(p["w1_act"].shape),
                  _spec(p["b1"].shape), _spec(p["w_out"].shape),
                  _spec(p["b_out"].shape)],
        out_specs=(_spec((m, obs_dim)), _spec((m, 1))),
    )(obs_tiled_bf, aoh_bf, p["w1_obs"], p["w1_act"], p["b1"],
      p["w_out"], p["b_out"])


def pallas_dual_conv(xa, wa, ba, xb, wb, bb):
    ma, na = xa.shape[0], wa.shape[1]
    mb, nb = xb.shape[0], wb.shape[1]
    return pl.pallas_call(
        _dual_conv_kernel,
        out_shape=(jax.ShapeDtypeStruct((ma, na), jnp.bfloat16),
                   jax.ShapeDtypeStruct((mb, nb), jnp.bfloat16)),
        grid=(1,),
        in_specs=[_spec(xa.shape), _spec(wa.shape), _spec(ba.shape),
                  _spec(xb.shape), _spec(wb.shape), _spec(bb.shape)],
        out_specs=(_spec((ma, na)), _spec((mb, nb))),
    )(xa, wa, ba, xb, wb, bb)


def pallas_lstm(rnn_in_bf, enc_p, hidden):
    t, n, d = rnn_in_bf.shape
    kernel = functools.partial(_lstm_kernel, steps=t, hidden=hidden)
    return pl.pallas_call(
        kernel,
        out_shape=jax.ShapeDtypeStruct((n, hidden), jnp.bfloat16),
        grid=(1,),
        in_specs=[_spec((t, n, d)), _spec(enc_p["w_x"].shape),
                  _spec(enc_p["w_h"].shape), _spec(enc_p["b_lstm"].shape)],
        out_specs=_spec((n, hidden)),
    )(rnn_in_bf, enc_p["w_x"], enc_p["w_h"], enc_p["b_lstm"])


def pallas_head(conv_main_bf, enc_bf, params):
    m = conv_main_bf.shape[0]
    kernel = functools.partial(_head_kernel, n_actions=N_ACTIONS)
    return pl.pallas_call(
        kernel,
        out_shape=(jax.ShapeDtypeStruct((m, N_ACTIONS), jnp.float32),
                   jax.ShapeDtypeStruct((m, 1), jnp.float32)),
        grid=(1,),
        in_specs=[_spec(conv_main_bf.shape), _spec(enc_bf.shape),
                  _spec(params["fc_w_conv"].shape), _spec(params["fc_w_enc"].shape),
                  _spec(params["fc_b"].shape), _spec(params["head_w"].shape),
                  _spec(params["head_b"].shape)],
        out_specs=(_spec((m, N_ACTIONS)), _spec((m, 1))),
    )(conv_main_bf, enc_bf, params["fc_w_conv"], params["fc_w_enc"],
      params["fc_b"], params["head_w"], params["head_b"])


# -------------------------- im2col (plain-JAX glue) ---------------------------
def _im2col_nhwc(x, k, s):
    """NHWC -> (N*Ho*Wo, C*k*k) columns, C-major within a patch (matches the
    torch weight reshape (cout, cin*k*k))."""
    n, h, w, c = x.shape
    ho = (h - k) // s + 1
    wo = (w - k) // s + 1
    patches = []
    for ki in range(k):
        for kj in range(k):
            patches.append(
                x[:, ki:ki + s * (ho - 1) + 1:s, kj:kj + s * (wo - 1) + 1:s, :])
    p = jnp.stack(patches, axis=0).reshape(k, k, n, ho, wo, c)
    p = jnp.transpose(p, (2, 3, 4, 5, 0, 1))        # (N, Ho, Wo, C, k, k)
    return p.reshape(n * ho * wo, c * k * k), ho, wo


# ------------------------------- I2A forward ---------------------------------
def i2a_forward(params, x, key, cfg):
    b = x.shape[0]
    c0, hh, ww = INPUT_SHAPE
    obs_dim = c0 * hh * ww
    a = N_ACTIONS
    t_steps = cfg.ROLL_STEPS
    hidden = cfg.ROLLOUT_HIDDEN

    fx = x.astype(jnp.float32)            # mirrors x.float()
    fx_bf = fx.astype(jnp.bfloat16)       # single cast; all MXU feeds are bf16

    # ---------------- rollouts_batch: policy + all EM steps (2 launches) -----
    obs_flat_bf = jnp.broadcast_to(
        fx_bf.reshape(b, 1, obs_dim), (b, a, obs_dim)).reshape(b * a, obs_dim)

    action_sets = [jnp.tile(jnp.arange(a, dtype=jnp.int32), b)]
    if t_steps > 1:
        # obs_batch_v is never advanced in the reference rollout loop, so the
        # distilled policy sees the same observations at every step.
        pol = pallas_policy(obs_flat_bf, params["net_policy"])   # (b*a, a+1)
        logits = pol[:, :a]
        # TODO(synk): ptan.actions.ProbabilityActionSelector samples on the host
        # with numpy; replaced by on-device categorical sampling from
        # softmax(logits) with a deterministic key.
        for _ in range(t_steps - 1):
            key, sub = jax.random.split(key)
            action_sets.append(
                jax.random.categorical(sub, logits, axis=-1).astype(jnp.int32))
    actions_all = jnp.concatenate(action_sets, axis=0)           # (T*b*a,)
    aoh = jax.nn.one_hot(actions_all, ACTION_PAD, dtype=jnp.bfloat16)

    obs_tiled_bf = jnp.concatenate([obs_flat_bf] * t_steps, axis=0)
    obs_next, rewards = pallas_env_model(obs_tiled_bf, aoh, params["em"],
                                         obs_dim)
    # obs_next: (T*b*a, obs_dim) bf16 ; rewards: (T*b*a, 1) bf16

    # --------------- conv stacks: main + encoder paths fused per layer -------
    main_nhwc = jnp.transpose(fx_bf, (0, 2, 3, 1))
    enc_nhwc = jnp.transpose(obs_next.reshape(t_steps * b * a, c0, hh, ww),
                             (0, 2, 3, 1))

    xa, xb = main_nhwc, enc_nhwc
    for (wa_p, wb_p), layer in zip(zip(params["conv"],
                                       params["encoder"]["conv"]),
                                   cfg.A2C_CONV_LAYERS):
        k_, s_ = layer["k"], layer["s"]
        cols_a, ho_a, wo_a = _im2col_nhwc(xa, k_, s_)
        cols_b, ho_b, wo_b = _im2col_nhwc(xb, k_, s_)
        ya, yb = pallas_dual_conv(cols_a, wa_p["w"], wa_p["b"],
                                  cols_b, wb_p["w"], wb_p["b"])
        cout = layer["out_c"]
        xa = ya.reshape(b, ho_a, wo_a, cout)
        xb = yb.reshape(t_steps * b * a, ho_b, wo_b, cout)

    # NCHW flatten order -> matches conv_out.view(batch, -1) in the reference.
    conv_main = jnp.transpose(xa, (0, 3, 1, 2)).reshape(b, -1)          # (b,144)
    conv_enc = jnp.transpose(xb, (0, 3, 1, 2)).reshape(t_steps, b * a, -1)

    # ----------------------- RolloutEncoder LSTM (1 launch) ------------------
    rnn_in = jnp.concatenate(
        [conv_enc, rewards.reshape(t_steps, b * a, 1)], axis=2)         # (T,ba,145)
    h_last = pallas_lstm(rnn_in, params["encoder"], hidden)             # (ba,32)
    enc_rollouts = h_last.reshape(b, a * hidden)                        # (b, 96)

    # ----------------------- fc + policy + value (1 launch) ------------------
    # grad_cam hook (register_hook) is autograd-only, no forward effect.
    policy, value = pallas_head(conv_main, enc_rollouts, params)
    return policy, value


# ------------------------------- parameters ----------------------------------
def _dense_init(key, fan_in, fan_out):
    kw, kb = jax.random.split(key)
    bound = 1.0 / math.sqrt(fan_in)
    w = jax.random.uniform(kw, (fan_in, fan_out), jnp.float32, -bound, bound)
    b = jax.random.uniform(kb, (fan_out,), jnp.float32, -bound, bound)
    return w, b


def _conv_init(key, cin, cout, k):
    kw, kb = jax.random.split(key)
    bound = 1.0 / math.sqrt(cin * k * k)
    w = jax.random.uniform(kw, (cout, cin, k, k), jnp.float32, -bound, bound)
    b = jax.random.uniform(kb, (cout,), jnp.float32, -bound, bound)
    # pre-transposed im2col-ready (Cin*k*k, Cout) matrix, bf16 MXU feed
    return {"w": w.reshape(cout, cin * k * k).T.astype(jnp.bfloat16),
            "b": b.reshape(1, cout)}


def init_params(key, cfg):
    keys = iter(jax.random.split(key, 40))
    c0 = INPUT_SHAPE[0]
    obs_dim = INPUT_SHAPE[0] * INPUT_SHAPE[1] * INPUT_SHAPE[2]
    bf = lambda arr: arr.astype(jnp.bfloat16)

    conv_main, conv_enc = [], []
    for i, layer in enumerate(cfg.A2C_CONV_LAYERS):
        cin = c0 if i == 0 else layer["in_c"]
        conv_main.append(_conv_init(next(keys), cin, layer["out_c"], layer["k"]))
        cin_e = cfg.IMG_SHAPE[0] if i == 0 else layer["in_c"]
        conv_enc.append(_conv_init(next(keys), cin_e, layer["out_c"], layer["k"]))

    # conv output size (mirrors _get_conv_out)
    h = w_sp = INPUT_SHAPE[1]
    c_out = c0
    for layer in cfg.A2C_CONV_LAYERS:
        h = (h - layer["k"]) // layer["s"] + 1
        w_sp = (w_sp - layer["k"]) // layer["s"] + 1
        c_out = layer["out_c"]
    conv_out_size = c_out * h * w_sp

    # fc + heads (fc split into conv-feature / rollout-feature slabs; heads packed)
    fc_input = conv_out_size + cfg.ROLLOUT_HIDDEN * N_ACTIONS
    fc_w, fc_b = _dense_init(next(keys), fc_input, cfg.FC_LAYER)
    pi_w, pi_b = _dense_init(next(keys), cfg.POLICY_LAYER, N_ACTIONS)
    v_w, v_b = _dense_init(next(keys), cfg.VALUE_LAYER, 1)

    # synthetic environment model (first layer split obs/action, packed head)
    em_w1, em_b1 = _dense_init(next(keys), obs_dim + N_ACTIONS, EM_HIDDEN)
    em_wo, em_bo = _dense_init(next(keys), EM_HIDDEN, obs_dim)
    em_wr, em_br = _dense_init(next(keys), EM_HIDDEN, 1)
    w1_act = jnp.zeros((ACTION_PAD, EM_HIDDEN), jnp.float32)
    w1_act = w1_act.at[:N_ACTIONS].set(em_w1[obs_dim:])

    # synthetic distilled policy (packed [logits|value] head)
    pn_w1, pn_b1 = _dense_init(next(keys), obs_dim, POLICY_HIDDEN)
    pn_wpi, pn_bpi = _dense_init(next(keys), POLICY_HIDDEN, N_ACTIONS)
    pn_wv, pn_bv = _dense_init(next(keys), POLICY_HIDDEN, 1)

    # rollout encoder LSTM (input = conv features + reward); split x/h weights
    lstm_in = conv_out_size + 1
    w_lstm, b_lstm = _dense_init(next(keys), lstm_in + cfg.ROLLOUT_HIDDEN,
                                 4 * cfg.ROLLOUT_HIDDEN)

    return {
        "conv": conv_main,
        "fc_w_conv": bf(fc_w[:conv_out_size]),
        "fc_w_enc": bf(fc_w[conv_out_size:]),
        "fc_b": fc_b.reshape(1, -1),
        "head_w": bf(jnp.concatenate([pi_w, v_w], axis=1)),
        "head_b": jnp.concatenate([pi_b, v_b]).reshape(1, -1),
        "em": {
            "w1_obs": bf(em_w1[:obs_dim]),
            "w1_act": bf(w1_act),
            "b1": em_b1.reshape(1, -1),
            "w_out": bf(jnp.concatenate([em_wo, em_wr], axis=1)),
            "b_out": jnp.concatenate([em_bo, em_br]).reshape(1, -1),
        },
        "net_policy": {
            "w1": bf(pn_w1),
            "b1": pn_b1.reshape(1, -1),
            "w_head": bf(jnp.concatenate([pn_wpi, pn_wv], axis=1)),
            "b_head": jnp.concatenate([pn_bpi, pn_bv]).reshape(1, -1),
        },
        "encoder": {
            "conv": conv_enc,
            "w_x": bf(w_lstm[:lstm_in]),
            "w_h": bf(w_lstm[lstm_in:]),
            "b_lstm": b_lstm.reshape(1, -1),
        },
    }


# ---------------------------------- main --------------------------------------
if __name__ == "__main__":
    cfg = Config()
    root = jax.random.PRNGKey(0)
    k_param, k_x, k_roll = jax.random.split(root, 3)

    params = init_params(k_param, cfg)
    batch = 2
    x = jax.random.normal(k_x, (batch,) + INPUT_SHAPE, jnp.float32)

    fwd = jax.jit(functools.partial(i2a_forward, cfg=cfg))
    policy_logits, value = fwd(params, x, k_roll)
    jax.block_until_ready((policy_logits, value))

    assert policy_logits.shape == (batch, N_ACTIONS)
    assert value.shape == (batch, 1)
    print("KERNEL_OK")
</pallas_src>

<mosaic_0001>
module attributes {stable_mosaic.version = 11 : i64} {
  func.func @_policy_kernel(%arg0: i32, %arg1: memref<6x1024xbf16, #tpu.memory_space<vmem>>, %arg2: memref<1024x128xbf16, #tpu.memory_space<vmem>>, %arg3: memref<1x128xf32, #tpu.memory_space<vmem>>, %arg4: memref<128x4xbf16, #tpu.memory_space<vmem>>, %arg5: memref<1x4xf32, #tpu.memory_space<vmem>>, %arg6: memref<6x4xf32, #tpu.memory_space<vmem>>) attributes {dimension_semantics = [#tpu.dimension_semantics<arbitrary>], iteration_bounds = array<i64: 1>, scalar_prefetch = 0 : i64, scratch_operands = 0 : i64, tpu.core_type = #tpu.core_type<tc>, window_params = [{pipeline_mode = #tpu.pipeline_mode<synchronous>, transform_indices = @transform_0, window_bounds = array<i64: 6, 1024>}, {pipeline_mode = #tpu.pipeline_mode<synchronous>, transform_indices = @transform_1, window_bounds = array<i64: 1024, 128>}, {pipeline_mode = #tpu.pipeline_mode<synchronous>, transform_indices = @transform_2, window_bounds = array<i64: 1, 128>}, {pipeline_mode = #tpu.pipeline_mode<synchronous>, transform_indices = @transform_3, window_bounds = array<i64: 128, 4>}, {pipeline_mode = #tpu.pipeline_mode<synchronous>, transform_indices = @transform_4, window_bounds = array<i64: 1, 4>}, {pipeline_mode = #tpu.pipeline_mode<synchronous>, transform_indices = @transform_5, window_bounds = array<i64: 6, 4>}]} {
    %c0 = arith.constant 0 : index
    %c0_0 = arith.constant 0 : index
    %0 = vector.load %arg1[%c0, %c0_0] : memref<6x1024xbf16, #tpu.memory_space<vmem>>, vector<6x1024xbf16>
    %c0_1 = arith.constant 0 : index
    %c0_2 = arith.constant 0 : index
    %1 = vector.load %arg2[%c0_1, %c0_2] : memref<1024x128xbf16, #tpu.memory_space<vmem>>, vector<1024x128xbf16>
    %cst = arith.constant dense<0.000000e+00> : vector<6x128xf32>
    %2 = tpu.matmul %0, %1, %cst {dimension_numbers = #tpu.dot_dimension_numbers<[1], [0], [0], [1], [0, 0, 1, 1], [], []>} : vector<6x1024xbf16>, vector<1024x128xbf16>, vector<6x128xf32> -> vector<6x128xf32>
    %c0_3 = arith.constant 0 : index
    %c0_4 = arith.constant 0 : index
    %3 = vector.load %arg3[%c0_3, %c0_4] : memref<1x128xf32, #tpu.memory_space<vmem>>, vector<1x128xf32>
    %4 = vector.broadcast %3 : vector<1x128xf32> to vector<6x128xf32>
    %5 = arith.addf %2, %4 : vector<6x128xf32>
    %cst_5 = arith.constant 0.000000e+00 : f32
    %6 = vector.broadcast %cst_5 : f32 to vector<6x128xf32>
    %7 = arith.maximumf %5, %6 : vector<6x128xf32>
    %8 = arith.truncf %7 : vector<6x128xf32> to vector<6x128xbf16>
    %c0_6 = arith.constant 0 : index
    %c0_7 = arith.constant 0 : index
    %9 = vector.load %arg4[%c0_6, %c0_7] : memref<128x4xbf16, #tpu.memory_space<vmem>>, vector<128x4xbf16>
    %cst_8 = arith.constant dense<0.000000e+00> : vector<6x4xf32>
    %10 = tpu.matmul %8, %9, %cst_8 {dimension_numbers = #tpu.dot_dimension_numbers<[1], [0], [0], [1], [0, 0, 1, 1], [], []>} : vector<6x128xbf16>, vector<128x4xbf16>, vector<6x4xf32> -> vector<6x4xf32>
    %c0_9 = arith.constant 0 : index
    %c0_10 = arith.constant 0 : index
    %11 = vector.load %arg5[%c0_9, %c0_10] : memref<1x4xf32, #tpu.memory_space<vmem>>, vector<1x4xf32>
    %12 = vector.broadcast %11 : vector<1x4xf32> to vector<6x4xf32>
    %13 = arith.addf %10, %12 : vector<6x4xf32>
    %c0_11 = arith.constant 0 : index
    %c0_12 = arith.constant 0 : index
    %14 = vector.load %arg6[%c0_11, %c0_12] : memref<6x4xf32, #tpu.memory_space<vmem>>, vector<6x4xf32>
    tpu.vector_store %arg6[%c0_11, %c0_12], %13 {strides = array<i32>} : memref<6x4xf32, #tpu.memory_space<vmem>>, vector<6x4xf32>,
    return
  }
  func.func @transform_0(%arg0: i32) -> (i32, i32) {
    %c0_i32 = arith.constant 0 : i32
    %c0_i32_0 = arith.constant 0 : i32
    %c0_i32_1 = arith.constant 0 : i32
    return %c0_i32, %c0_i32_0 : i32, i32
  }
  func.func @transform_1(%arg0: i32) -> (i32, i32) {
    %c0_i32 = arith.constant 0 : i32
    %c0_i32_0 = arith.constant 0 : i32
    %c0_i32_1 = arith.constant 0 : i32
    return %c0_i32, %c0_i32_0 : i32, i32
  }
  func.func @transform_2(%arg0: i32) -> (i32, i32) {
    %c0_i32 = arith.constant 0 : i32
    %c0_i32_0 = arith.constant 0 : i32
    %c0_i32_1 = arith.constant 0 : i32
    return %c0_i32, %c0_i32_0 : i32, i32
  }
  func.func @transform_3(%arg0: i32) -> (i32, i32) {
    %c0_i32 = arith.constant 0 : i32
    %c0_i32_0 = arith.constant 0 : i32
    %c0_i32_1 = arith.constant 0 : i32
    return %c0_i32, %c0_i32_0 : i32, i32
  }
  func.func @transform_4(%arg0: i32) -> (i32, i32) {
    %c0_i32 = arith.constant 0 : i32
    %c0_i32_0 = arith.constant 0 : i32
    %c0_i32_1 = arith.constant 0 : i32
    return %c0_i32, %c0_i32_0 : i32, i32
  }
  func.func @transform_5(%arg0: i32) -> (i32, i32) {
    %c0_i32 = arith.constant 0 : i32
    %c0_i32_0 = arith.constant 0 : i32
    %c0_i32_1 = arith.constant 0 : i32
    return %c0_i32, %c0_i32_0 : i32, i32
  }
}

module attributes {stable_mosaic.version = 11 : i64} {
  func.func @_em_kernel(%arg0: i32, %arg1: memref<12x1024xbf16, #tpu.memory_space<vmem>>, %arg2: memref<12x8xbf16, #tpu.memory_space<vmem>>, %arg3: memref<1024x128xbf16, #tpu.memory_space<vmem>>, %arg4: memref<8x128xbf16, #tpu.memory_space<vmem>>, %arg5: memref<1x128xf32, #tpu.memory_space<vmem>>, %arg6: memref<128x1025xbf16, #tpu.memory_space<vmem>>, %arg7: memref<1x1025xf32, #tpu.memory_space<vmem>>, %arg8: memref<12x1024xbf16, #tpu.memory_space<vmem>>, %arg9: memref<12x1xbf16, #tpu.memory_space<vmem>>) attributes {dimension_semantics = [#tpu.dimension_semantics<arbitrary>], iteration_bounds = array<i64: 1>, scalar_prefetch = 0 : i64, scratch_operands = 0 : i64, tpu.core_type = #tpu.core_type<tc>, window_params = [{pipeline_mode = #tpu.pipeline_mode<synchronous>, transform_indices = @transform_0, window_bounds = array<i64: 12, 1024>}, {pipeline_mode = #tpu.pipeline_mode<synchronous>, transform_indices = @transform_1, window_bounds = array<i64: 12, 8>}, {pipeline_mode = #tpu.pipeline_mode<synchronous>, transform_indices = @transform_2, window_bounds = array<i64: 1024, 128>}, {pipeline_mode = #tpu.pipeline_mode<synchronous>, transform_indices = @transform_3, window_bounds = array<i64: 8, 128>}, {pipeline_mode = #tpu.pipeline_mode<synchronous>, transform_indices = @transform_4, window_bounds = array<i64: 1, 128>}, {pipeline_mode = #tpu.pipeline_mode<synchronous>, transform_indices = @transform_5, window_bounds = array<i64: 128, 1025>}, {pipeline_mode = #tpu.pipeline_mode<synchronous>, transform_indices = @transform_6, window_bounds = array<i64: 1, 1025>}, {pipeline_mode = #tpu.pipeline_mode<synchronous>, transform_indices = @transform_7, window_bounds = array<i64: 12, 1024>}, {pipeline_mode = #tpu.pipeline_mode<synchronous>, transform_indices = @transform_8, window_bounds = array<i64: 12, 1>}]} {
    %c0 = arith.constant 0 : index
    %c0_0 = arith.constant 0 : index
    %0 = vector.load %arg1[%c0, %c0_0] : memref<12x1024xbf16, #tpu.memory_space<vmem>>, vector<12x1024xbf16>
    %c0_1 = arith.constant 0 : index
    %c0_2 = arith.constant 0 : index
    %1 = vector.load %arg3[%c0_1, %c0_2] : memref<1024x128xbf16, #tpu.memory_space<vmem>>, vector<1024x128xbf16>
    %cst = arith.constant dense<0.000000e+00> : vector<12x128xf32>
    %2 = tpu.matmul %0, %1, %cst {dimension_numbers = #tpu.dot_dimension_numbers<[1], [0], [0], [1], [0, 0, 1, 1], [], []>} : vector<12x1024xbf16>, vector<1024x128xbf16>, vector<12x128xf32> -> vector<12x128xf32>
    %c0_3 = arith.constant 0 : index
    %c0_4 = arith.constant 0 : index
    %3 = vector.load %arg2[%c0_3, %c0_4] : memref<12x8xbf16, #tpu.memory_space<vmem>>, vector<12x8xbf16>
    %c0_5 = arith.constant 0 : index
    %c0_6 = arith.constant 0 : index
    %4 = vector.load %arg4[%c0_5, %c0_6] : memref<8x128xbf16, #tpu.memory_space<vmem>>, vector<8x128xbf16>
    %cst_7 = arith.constant dense<0.000000e+00> : vector<12x128xf32>
    %5 = tpu.matmul %3, %4, %cst_7 {dimension_numbers = #tpu.dot_dimension_numbers<[1], [0], [0], [1], [0, 0, 1, 1], [], []>} : vector<12x8xbf16>, vector<8x128xbf16>, vector<12x128xf32> -> vector<12x128xf32>
    %6 = arith.addf %2, %5 : vector<12x128xf32>
    %c0_8 = arith.constant 0 : index
    %c0_9 = arith.constant 0 : index
    %7 = vector.load %arg5[%c0_8, %c0_9] : memref<1x128xf32, #tpu.memory_space<vmem>>, vector<1x128xf32>
    %8 = vector.broadcast %7 : vector<1x128xf32> to vector<12x128xf32>
    %9 = arith.addf %6, %8 : vector<12x128xf32>
    %cst_10 = arith.constant 0.000000e+00 : f32
    %10 = vector.broadcast %cst_10 : f32 to vector<12x128xf32>
    %11 = arith.maximumf %9, %10 : vector<12x128xf32>
    %12 = arith.truncf %11 : vector<12x128xf32> to vector<12x128xbf16>
    %c0_11 = arith.constant 0 : index
    %c0_12 = arith.constant 0 : index
    %13 = vector.load %arg6[%c0_11, %c0_12] : memref<128x1025xbf16, #tpu.memory_space<vmem>>, vector<128x1025xbf16>
    %cst_13 = arith.constant dense<0.000000e+00> : vector<12x1025xf32>
    %14 = tpu.matmul %12, %13, %cst_13 {dimension_numbers = #tpu.dot_dimension_numbers<[1], [0], [0], [1], [0, 0, 1, 1], [], []>} : vector<12x128xbf16>, vector<128x1025xbf16>, vector<12x1025xf32> -> vector<12x1025xf32>
    %c0_14 = arith.constant 0 : index
    %c0_15 = arith.constant 0 : index
    %15 = vector.load %arg7[%c0_14, %c0_15] : memref<1x1025xf32, #tpu.memory_space<vmem>>, vector<1x1025xf32>
    %16 = vector.broadcast %15 : vector<1x1025xf32> to vector<12x1025xf32>
    %17 = arith.addf %14, %16 : vector<12x1025xf32>
    %18 = vector.extract_strided_slice %17 {offsets = [0, 0], sizes = [12, 1024], strides = [1, 1]} : vector<12x1025xf32> to vector<12x1024xf32>
    %19 = arith.truncf %18 : vector<12x1024xf32> to vector<12x1024xbf16>
    %c0_16 = arith.constant 0 : index
    %c0_17 = arith.constant 0 : index
    %20 = vector.load %arg8[%c0_16, %c0_17] : memref<12x1024xbf16, #tpu.memory_space<vmem>>, vector<12x1024xbf16>
    tpu.vector_store %arg8[%c0_16, %c0_17], %19 {strides = array<i32>} : memref<12x1024xbf16, #tpu.memory_space<vmem>>, vector<12x1024xbf16>,
    %21 = vector.extract_strided_slice %17 {offsets = [0, 1024], sizes = [12, 1], strides = [1, 1]} : vector<12x1025xf32> to vector<12x1xf32>
    %22 = arith.truncf %21 : vector<12x1xf32> to vector<12x1xbf16>
    %c0_18 = arith.constant 0 : index
    %c0_19 = arith.constant 0 : index
    %23 = vector.load %arg9[%c0_18, %c0_19] : memref<12x1xbf16, #tpu.memory_space<vmem>>, vector<12x1xbf16>
    tpu.vector_store %arg9[%c0_18, %c0_19], %22 {strides = array<i32>} : memref<12x1xbf16, #tpu.memory_space<vmem>>, vector<12x1xbf16>,
    return
  }
  func.func @transform_0(%arg0: i32) -> (i32, i32) {
    %c0_i32 = arith.constant 0 : i32
    %c0_i32_0 = arith.constant 0 : i32
    %c0_i32_1 = arith.constant 0 : i32
    return %c0_i32, %c0_i32_0 : i32, i32
  }
  func.func @transform_1(%arg0: i32) -> (i32, i32) {
    %c0_i32 = arith.constant 0 : i32
    %c0_i32_0 = arith.constant 0 : i32
    %c0_i32_1 = arith.constant 0 : i32
    return %c0_i32, %c0_i32_0 : i32, i32
  }
  func.func @transform_2(%arg0: i32) -> (i32, i32) {
    %c0_i32 = arith.constant 0 : i32
    %c0_i32_0 = arith.constant 0 : i32
    %c0_i32_1 = arith.constant 0 : i32
    return %c0_i32, %c0_i32_0 : i32, i32
  }
  func.func @transform_3(%arg0: i32) -> (i32, i32) {
    %c0_i32 = arith.constant 0 : i32
    %c0_i32_0 = arith.constant 0 : i32
    %c0_i32_1 = arith.constant 0 : i32
    return %c0_i32, %c0_i32_0 : i32, i32
  }
  func.func @transform_4(%arg0: i32) -> (i32, i32) {
    %c0_i32 = arith.constant 0 : i32
    %c0_i32_0 = arith.constant 0 : i32
    %c0_i32_1 = arith.constant 0 : i32
    return %c0_i32, %c0_i32_0 : i32, i32
  }
  func.func @transform_5(%arg0: i32) -> (i32, i32) {
    %c0_i32 = arith.constant 0 : i32
    %c0_i32_0 = arith.constant 0 : i32
    %c0_i32_1 = arith.constant 0 : i32
    return %c0_i32, %c0_i32_0 : i32, i32
  }
  func.func @transform_6(%arg0: i32) -> (i32, i32) {
    %c0_i32 = arith.constant 0 : i32
    %c0_i32_0 = arith.constant 0 : i32
    %c0_i32_1 = arith.constant 0 : i32
    return %c0_i32, %c0_i32_0 : i32, i32
  }
  func.func @transform_7(%arg0: i32) -> (i32, i32) {
    %c0_i32 = arith.constant 0 : i32
    %c0_i32_0 = arith.constant 0 : i32
    %c0_i32_1 = arith.constant 0 : i32
    return %c0_i32, %c0_i32_0 : i32, i32
  }
  func.func @transform_8(%arg0: i32) -> (i32, i32) {
    %c0_i32 = arith.constant 0 : i32
    %c0_i32_0 = arith.constant 0 : i32
    %c0_i32_1 = arith.constant 0 : i32
    return %c0_i32, %c0_i32_0 : i32, i32
  }
}

module attributes {stable_mosaic.version = 11 : i64} {
  func.func @_dual_conv_kernel(%arg0: i32, %arg1: memref<98x36xbf16, #tpu.memory_space<vmem>>, %arg2: memref<36x8xbf16, #tpu.memory_space<vmem>>, %arg3: memref<1x8xf32, #tpu.memory_space<vmem>>, %arg4: memref<588x36xbf16, #tpu.memory_space<vmem>>, %arg5: memref<36x8xbf16, #tpu.memory_space<vmem>>, %arg6: memref<1x8xf32, #tpu.memory_space<vmem>>, %arg7: memref<98x8xbf16, #tpu.memory_space<vmem>>, %arg8: memref<588x8xbf16, #tpu.memory_space<vmem>>) attributes {dimension_semantics = [#tpu.dimension_semantics<arbitrary>], iteration_bounds = array<i64: 1>, scalar_prefetch = 0 : i64, scratch_operands = 0 : i64, tpu.core_type = #tpu.core_type<tc>, window_params = [{pipeline_mode = #tpu.pipeline_mode<synchronous>, transform_indices = @transform_0, window_bounds = array<i64: 98, 36>}, {pipeline_mode = #tpu.pipeline_mode<synchronous>, transform_indices = @transform_1, window_bounds = array<i64: 36, 8>}, {pipeline_mode = #tpu.pipeline_mode<synchronous>, transform_indices = @transform_2, window_bounds = array<i64: 1, 8>}, {pipeline_mode = #tpu.pipeline_mode<synchronous>, transform_indices = @transform_3, window_bounds = array<i64: 588, 36>}, {pipeline_mode = #tpu.pipeline_mode<synchronous>, transform_indices = @transform_4, window_bounds = array<i64: 36, 8>}, {pipeline_mode = #tpu.pipeline_mode<synchronous>, transform_indices = @transform_5, window_bounds = array<i64: 1, 8>}, {pipeline_mode = #tpu.pipeline_mode<synchronous>, transform_indices = @transform_6, window_bounds = array<i64: 98, 8>}, {pipeline_mode = #tpu.pipeline_mode<synchronous>, transform_indices = @transform_7, window_bounds = array<i64: 588, 8>}]} {
    %c0 = arith.constant 0 : index
    %c0_0 = arith.constant 0 : index
    %0 = vector.load %arg1[%c0, %c0_0] : memref<98x36xbf16, #tpu.memory_space<vmem>>, vector<98x36xbf16>
    %c0_1 = arith.constant 0 : index
    %c0_2 = arith.constant 0 : index
    %1 = vector.load %arg2[%c0_1, %c0_2] : memref<36x8xbf16, #tpu.memory_space<vmem>>, vector<36x8xbf16>
    %cst = arith.constant dense<0.000000e+00> : vector<98x8xf32>
    %2 = tpu.matmul %0, %1, %cst {dimension_numbers = #tpu.dot_dimension_numbers<[1], [0], [0], [1], [0, 0, 1, 1], [], []>} : vector<98x36xbf16>, vector<36x8xbf16>, vector<98x8xf32> -> vector<98x8xf32>
    %c0_3 = arith.constant 0 : index
    %c0_4 = arith.constant 0 : index
    %3 = vector.load %arg3[%c0_3, %c0_4] : memref<1x8xf32, #tpu.memory_space<vmem>>, vector<1x8xf32>
    %4 = vector.broadcast %3 : vector<1x8xf32> to vector<98x8xf32>
    %5 = arith.addf %2, %4 : vector<98x8xf32>
    %cst_5 = arith.constant 0.000000e+00 : f32
    %6 = vector.broadcast %cst_5 : f32 to vector<98x8xf32>
    %7 = arith.maximumf %5, %6 : vector<98x8xf32>
    %8 = arith.truncf %7 : vector<98x8xf32> to vector<98x8xbf16>
    %c0_6 = arith.constant 0 : index
    %c0_7 = arith.constant 0 : index
    %9 = vector.load %arg7[%c0_6, %c0_7] : memref<98x8xbf16, #tpu.memory_space<vmem>>, vector<98x8xbf16>
    tpu.vector_store %arg7[%c0_6, %c0_7], %8 {strides = array<i32>} : memref<98x8xbf16, #tpu.memory_space<vmem>>, vector<98x8xbf16>,
    %c0_8 = arith.constant 0 : index
    %c0_9 = arith.constant 0 : index
    %10 = vector.load %arg4[%c0_8, %c0_9] : memref<588x36xbf16, #tpu.memory_space<vmem>>, vector<588x36xbf16>
    %c0_10 = arith.constant 0 : index
    %c0_11 = arith.constant 0 : index
    %11 = vector.load %arg5[%c0_10, %c0_11] : memref<36x8xbf16, #tpu.memory_space<vmem>>, vector<36x8xbf16>
    %cst_12 = arith.constant dense<0.000000e+00> : vector<588x8xf32>
    %12 = tpu.matmul %10, %11, %cst_12 {dimension_numbers = #tpu.dot_dimension_numbers<[1], [0], [0], [1], [0, 0, 1, 1], [], []>} : vector<588x36xbf16>, vector<36x8xbf16>, vector<588x8xf32> -> vector<588x8xf32>
    %c0_13 = arith.constant 0 : index
    %c0_14 = arith.constant 0 : index
    %13 = vector.load %arg6[%c0_13, %c0_14] : memref<1x8xf32, #tpu.memory_space<vmem>>, vector<1x8xf32>
    %14 = vector.broadcast %13 : vector<1x8xf32> to vector<588x8xf32>
    %15 = arith.addf %12, %14 : vector<588x8xf32>
    %cst_15 = arith.constant 0.000000e+00 : f32
    %16 = vector.broadcast %cst_15 : f32 to vector<588x8xf32>
    %17 = arith.maximumf %15, %16 : vector<588x8xf32>
    %18 = arith.truncf %17 : vector<588x8xf32> to vector<588x8xbf16>
    %c0_16 = arith.constant 0 : index
    %c0_17 = arith.constant 0 : index
    %19 = vector.load %arg8[%c0_16, %c0_17] : memref<588x8xbf16, #tpu.memory_space<vmem>>, vector<588x8xbf16>
    tpu.vector_store %arg8[%c0_16, %c0_17], %18 {strides = array<i32>} : memref<588x8xbf16, #tpu.memory_space<vmem>>, vector<588x8xbf16>,
    return
  }
  func.func @transform_0(%arg0: i32) -> (i32, i32) {
    %c0_i32 = arith.constant 0 : i32
    %c0_i32_0 = arith.constant 0 : i32
    %c0_i32_1 = arith.constant 0 : i32
    return %c0_i32, %c0_i32_0 : i32, i32
  }
  func.func @transform_1(%arg0: i32) -> (i32, i32) {
    %c0_i32 = arith.constant 0 : i32
    %c0_i32_0 = arith.constant 0 : i32
    %c0_i32_1 = arith.constant 0 : i32
    return %c0_i32, %c0_i32_0 : i32, i32
  }
  func.func @transform_2(%arg0: i32) -> (i32, i32) {
    %c0_i32 = arith.constant 0 : i32
    %c0_i32_0 = arith.constant 0 : i32
    %c0_i32_1 = arith.constant 0 : i32
    return %c0_i32, %c0_i32_0 : i32, i32
  }
  func.func @transform_3(%arg0: i32) -> (i32, i32) {
    %c0_i32 = arith.constant 0 : i32
    %c0_i32_0 = arith.constant 0 : i32
    %c0_i32_1 = arith.constant 0 : i32
    return %c0_i32, %c0_i32_0 : i32, i32
  }
  func.func @transform_4(%arg0: i32) -> (i32, i32) {
    %c0_i32 = arith.constant 0 : i32
    %c0_i32_0 = arith.constant 0 : i32
    %c0_i32_1 = arith.constant 0 : i32
    return %c0_i32, %c0_i32_0 : i32, i32
  }
  func.func @transform_5(%arg0: i32) -> (i32, i32) {
    %c0_i32 = arith.constant 0 : i32
    %c0_i32_0 = arith.constant 0 : i32
    %c0_i32_1 = arith.constant 0 : i32
    return %c0_i32, %c0_i32_0 : i32, i32
  }
  func.func @transform_6(%arg0: i32) -> (i32, i32) {
    %c0_i32 = arith.constant 0 : i32
    %c0_i32_0 = arith.constant 0 : i32
    %c0_i32_1 = arith.constant 0 : i32
    return %c0_i32, %c0_i32_0 : i32, i32
  }
  func.func @transform_7(%arg0: i32) -> (i32, i32) {
    %c0_i32 = arith.constant 0 : i32
    %c0_i32_0 = arith.constant 0 : i32
    %c0_i32_1 = arith.constant 0 : i32
    return %c0_i32, %c0_i32_0 : i32, i32
  }
}

module attributes {stable_mosaic.version = 11 : i64} {
  func.func @_dual_conv_kernel(%arg0: i32, %arg1: memref<18x72xbf16, #tpu.memory_space<vmem>>, %arg2: memref<72x16xbf16, #tpu.memory_space<vmem>>, %arg3: memref<1x16xf32, #tpu.memory_space<vmem>>, %arg4: memref<108x72xbf16, #tpu.memory_space<vmem>>, %arg5: memref<72x16xbf16, #tpu.memory_space<vmem>>, %arg6: memref<1x16xf32, #tpu.memory_space<vmem>>, %arg7: memref<18x16xbf16, #tpu.memory_space<vmem>>, %arg8: memref<108x16xbf16, #tpu.memory_space<vmem>>) attributes {dimension_semantics = [#tpu.dimension_semantics<arbitrary>], iteration_bounds = array<i64: 1>, scalar_prefetch = 0 : i64, scratch_operands = 0 : i64, tpu.core_type = #tpu.core_type<tc>, window_params = [{pipeline_mode = #tpu.pipeline_mode<synchronous>, transform_indices = @transform_0, window_bounds = array<i64: 18, 72>}, {pipeline_mode = #tpu.pipeline_mode<synchronous>, transform_indices = @transform_1, window_bounds = array<i64: 72, 16>}, {pipeline_mode = #tpu.pipeline_mode<synchronous>, transform_indices = @transform_2, window_bounds = array<i64: 1, 16>}, {pipeline_mode = #tpu.pipeline_mode<synchronous>, transform_indices = @transform_3, window_bounds = array<i64: 108, 72>}, {pipeline_mode = #tpu.pipeline_mode<synchronous>, transform_indices = @transform_4, window_bounds = array<i64: 72, 16>}, {pipeline_mode = #tpu.pipeline_mode<synchronous>, transform_indices = @transform_5, window_bounds = array<i64: 1, 16>}, {pipeline_mode = #tpu.pipeline_mode<synchronous>, transform_indices = @transform_6, window_bounds = array<i64: 18, 16>}, {pipeline_mode = #tpu.pipeline_mode<synchronous>, transform_indices = @transform_7, window_bounds = array<i64: 108, 16>}]} {
    %c0 = arith.constant 0 : index
    %c0_0 = arith.constant 0 : index
    %0 = vector.load %arg1[%c0, %c0_0] : memref<18x72xbf16, #tpu.memory_space<vmem>>, vector<18x72xbf16>
    %c0_1 = arith.constant 0 : index
    %c0_2 = arith.constant 0 : index
    %1 = vector.load %arg2[%c0_1, %c0_2] : memref<72x16xbf16, #tpu.memory_space<vmem>>, vector<72x16xbf16>
    %cst = arith.constant dense<0.000000e+00> : vector<18x16xf32>
    %2 = tpu.matmul %0, %1, %cst {dimension_numbers = #tpu.dot_dimension_numbers<[1], [0], [0], [1], [0, 0, 1, 1], [], []>} : vector<18x72xbf16>, vector<72x16xbf16>, vector<18x16xf32> -> vector<18x16xf32>
    %c0_3 = arith.constant 0 : index
    %c0_4 = arith.constant 0 : index
    %3 = vector.load %arg3[%c0_3, %c0_4] : memref<1x16xf32, #tpu.memory_space<vmem>>, vector<1x16xf32>
    %4 = vector.broadcast %3 : vector<1x16xf32> to vector<18x16xf32>
    %5 = arith.addf %2, %4 : vector<18x16xf32>
    %cst_5 = arith.constant 0.000000e+00 : f32
    %6 = vector.broadcast %cst_5 : f32 to vector<18x16xf32>
    %7 = arith.maximumf %5, %6 : vector<18x16xf32>
    %8 = arith.truncf %7 : vector<18x16xf32> to vector<18x16xbf16>
    %c0_6 = arith.constant 0 : index
    %c0_7 = arith.constant 0 : index
    %9 = vector.load %arg7[%c0_6, %c0_7] : memref<18x16xbf16, #tpu.memory_space<vmem>>, vector<18x16xbf16>
    tpu.vector_store %arg7[%c0_6, %c0_7], %8 {strides = array<i32>} : memref<18x16xbf16, #tpu.memory_space<vmem>>, vector<18x16xbf16>,
    %c0_8 = arith.constant 0 : index
    %c0_9 = arith.constant 0 : index
    %10 = vector.load %arg4[%c0_8, %c0_9] : memref<108x72xbf16, #tpu.memory_space<vmem>>, vector<108x72xbf16>
    %c0_10 = arith.constant 0 : index
    %c0_11 = arith.constant 0 : index
    %11 = vector.load %arg5[%c0_10, %c0_11] : memref<72x16xbf16, #tpu.memory_space<vmem>>, vector<72x16xbf16>
    %cst_12 = arith.constant dense<0.000000e+00> : vector<108x16xf32>
    %12 = tpu.matmul %10, %11, %cst_12 {dimension_numbers = #tpu.dot_dimension_numbers<[1], [0], [0], [1], [0, 0, 1, 1], [], []>} : vector<108x72xbf16>, vector<72x16xbf16>, vector<108x16xf32> -> vector<108x16xf32>
    %c0_13 = arith.constant 0 : index
    %c0_14 = arith.constant 0 : index
    %13 = vector.load %arg6[%c0_13, %c0_14] : memref<1x16xf32, #tpu.memory_space<vmem>>, vector<1x16xf32>
    %14 = vector.broadcast %13 : vector<1x16xf32> to vector<108x16xf32>
    %15 = arith.addf %12, %14 : vector<108x16xf32>
    %cst_15 = arith.constant 0.000000e+00 : f32
    %16 = vector.broadcast %cst_15 : f32 to vector<108x16xf32>
    %17 = arith.maximumf %15, %16 : vector<108x16xf32>
    %18 = arith.truncf %17 : vector<108x16xf32> to vector<108x16xbf16>
    %c0_16 = arith.constant 0 : index
    %c0_17 = arith.constant 0 : index
    %19 = vector.load %arg8[%c0_16, %c0_17] : memref<108x16xbf16, #tpu.memory_space<vmem>>, vector<108x16xbf16>
    tpu.vector_store %arg8[%c0_16, %c0_17], %18 {strides = array<i32>} : memref<108x16xbf16, #tpu.memory_space<vmem>>, vector<108x16xbf16>,
    return
  }
  func.func @transform_0(%arg0: i32) -> (i32, i32) {
    %c0_i32 = arith.constant 0 : i32
    %c0_i32_0 = arith.constant 0 : i32
    %c0_i32_1 = arith.constant 0 : i32
    return %c0_i32, %c0_i32_0 : i32, i32
  }
  func.func @transform_1(%arg0: i32) -> (i32, i32) {
    %c0_i32 = arith.constant 0 : i32
    %c0_i32_0 = arith.constant 0 : i32
    %c0_i32_1 = arith.constant 0 : i32
    return %c0_i32, %c0_i32_0 : i32, i32
  }
  func.func @transform_2(%arg0: i32) -> (i32, i32) {
    %c0_i32 = arith.constant 0 : i32
    %c0_i32_0 = arith.constant 0 : i32
    %c0_i32_1 = arith.constant 0 : i32
    return %c0_i32, %c0_i32_0 : i32, i32
  }
  func.func @transform_3(%arg0: i32) -> (i32, i32) {
    %c0_i32 = arith.constant 0 : i32
    %c0_i32_0 = arith.constant 0 : i32
    %c0_i32_1 = arith.constant 0 : i32
    return %c0_i32, %c0_i32_0 : i32, i32
  }
  func.func @transform_4(%arg0: i32) -> (i32, i32) {
    %c0_i32 = arith.constant 0 : i32
    %c0_i32_0 = arith.constant 0 : i32
    %c0_i32_1 = arith.constant 0 : i32
    return %c0_i32, %c0_i32_0 : i32, i32
  }
  func.func @transform_5(%arg0: i32) -> (i32, i32) {
    %c0_i32 = arith.constant 0 : i32
    %c0_i32_0 = arith.constant 0 : i32
    %c0_i32_1 = arith.constant 0 : i32
    return %c0_i32, %c0_i32_0 : i32, i32
  }
  func.func @transform_6(%arg0: i32) -> (i32, i32) {
    %c0_i32 = arith.constant 0 : i32
    %c0_i32_0 = arith.constant 0 : i32
    %c0_i32_1 = arith.constant 0 : i32
    return %c0_i32, %c0_i32_0 : i32, i32
  }
  func.func @transform_7(%arg0: i32) -> (i32, i32) {
    %c0_i32 = arith.constant 0 : i32
    %c0_i32_0 = arith.constant 0 : i32
    %c0_i32_1 = arith.constant 0 : i32
    return %c0_i32, %c0_i32_0 : i32, i32
  }
}

module attributes {stable_mosaic.version = 11 : i64} {
  func.func @_lstm_kernel(%arg0: i32, %arg1: memref<2x6x145xbf16, #tpu.memory_space<vmem>>, %arg2: memref<145x128xbf16, #tpu.memory_space<vmem>>, %arg3: memref<32x128xbf16, #tpu.memory_space<vmem>>, %arg4: memref<1x128xf32, #tpu.memory_space<vmem>>, %arg5: memref<6x32xbf16, #tpu.memory_space<vmem>>) attributes {dimension_semantics = [#tpu.dimension_semantics<arbitrary>], iteration_bounds = array<i64: 1>, scalar_prefetch = 0 : i64, scratch_operands = 0 : i64, tpu.core_type = #tpu.core_type<tc>, window_params = [{pipeline_mode = #tpu.pipeline_mode<synchronous>, transform_indices = @transform_0, window_bounds = array<i64: 2, 6, 145>}, {pipeline_mode = #tpu.pipeline_mode<synchronous>, transform_indices = @transform_1, window_bounds = array<i64: 145, 128>}, {pipeline_mode = #tpu.pipeline_mode<synchronous>, transform_indices = @transform_2, window_bounds = array<i64: 32, 128>}, {pipeline_mode = #tpu.pipeline_mode<synchronous>, transform_indices = @transform_3, window_bounds = array<i64: 1, 128>}, {pipeline_mode = #tpu.pipeline_mode<synchronous>, transform_indices = @transform_4, window_bounds = array<i64: 6, 32>}]} {
    %cst = arith.constant 0.000000e+00 : f32
    %0 = vector.broadcast %cst : f32 to vector<6x32xf32>
    %cst_0 = arith.constant 0.000000e+00 : f32
    %1 = vector.broadcast %cst_0 : f32 to vector<6x32xf32>
    %2 = tpu.iota {dimensions = array<i32: 1>} : vector<6x128xi32>
    %c64_i32 = arith.constant 64 : i32
    %3 = vector.broadcast %c64_i32 : i32 to vector<6x128xi32>
    %4 = arith.cmpi sge, %2, %3 : vector<6x128xi32>
    %c96_i32 = arith.constant 96 : i32
    %5 = vector.broadcast %c96_i32 : i32 to vector<6x128xi32>
    %6 = arith.cmpi slt, %2, %5 : vector<6x128xi32>
    %7 = arith.andi %4, %6 : vector<6x128xi1>
    %c0 = arith.constant 0 : index
    %c0_1 = arith.constant 0 : index
    %c0_2 = arith.constant 0 : index
    %8 = vector.load %arg1[%c0, %c0_1, %c0_2] : memref<2x6x145xbf16, #tpu.memory_space<vmem>>, vector<1x6x145xbf16>
    %9 = vector.shape_cast %8 : vector<1x6x145xbf16> to vector<6x145xbf16>
    %c0_3 = arith.constant 0 : index
    %c0_4 = arith.constant 0 : index
    %10 = vector.load %arg2[%c0_3, %c0_4] : memref<145x128xbf16, #tpu.memory_space<vmem>>, vector<145x128xbf16>
    %cst_5 = arith.constant dense<0.000000e+00> : vector<6x128xf32>
    %11 = tpu.matmul %9, %10, %cst_5 {dimension_numbers = #tpu.dot_dimension_numbers<[1], [0], [0], [1], [0, 0, 1, 1], [], []>} : vector<6x145xbf16>, vector<145x128xbf16>, vector<6x128xf32> -> vector<6x128xf32>
    %12 = arith.truncf %0 : vector<6x32xf32> to vector<6x32xbf16>
    %c0_6 = arith.constant 0 : index
    %c0_7 = arith.constant 0 : index
    %13 = vector.load %arg3[%c0_6, %c0_7] : memref<32x128xbf16, #tpu.memory_space<vmem>>, vector<32x128xbf16>
    %cst_8 = arith.constant dense<0.000000e+00> : vector<6x128xf32>
    %14 = tpu.matmul %12, %13, %cst_8 {dimension_numbers = #tpu.dot_dimension_numbers<[1], [0], [0], [1], [0, 0, 1, 1], [], []>} : vector<6x32xbf16>, vector<32x128xbf16>, vector<6x128xf32> -> vector<6x128xf32>
    %15 = arith.addf %11, %14 : vector<6x128xf32>
    %c0_9 = arith.constant 0 : index
    %c0_10 = arith.constant 0 : index
    %16 = vector.load %arg4[%c0_9, %c0_10] : memref<1x128xf32, #tpu.memory_space<vmem>>, vector<1x128xf32>
    %17 = vector.broadcast %16 : vector<1x128xf32> to vector<6x128xf32>
    %18 = arith.addf %15, %17 : vector<6x128xf32>
    %19 = math.tanh %18 : vector<6x128xf32>
    %20 = arith.negf %18 : vector<6x128xf32>
    %21 = math.exp %20 : vector<6x128xf32>
    %cst_11 = arith.constant 1.000000e+00 : f32
    %22 = vector.broadcast %cst_11 : f32 to vector<6x128xf32>
    %23 = arith.addf %22, %21 : vector<6x128xf32>
    %24 = arith.divf %22, %23 : vector<6x128xf32>
    %25 = arith.select %7, %19, %24 : vector<6x128xi1>, vector<6x128xf32>
    %26 = vector.extract_strided_slice %25 {offsets = [0, 0], sizes = [6, 32], strides = [1, 1]} : vector<6x128xf32> to vector<6x32xf32>
    %27 = vector.extract_strided_slice %25 {offsets = [0, 32], sizes = [6, 32], strides = [1, 1]} : vector<6x128xf32> to vector<6x32xf32>
    %28 = vector.extract_strided_slice %25 {offsets = [0, 64], sizes = [6, 32], strides = [1, 1]} : vector<6x128xf32> to vector<6x32xf32>
    %29 = vector.extract_strided_slice %25 {offsets = [0, 96], sizes = [6, 32], strides = [1, 1]} : vector<6x128xf32> to vector<6x32xf32>
    %30 = arith.mulf %27, %1 : vector<6x32xf32>
    %31 = arith.mulf %26, %28 : vector<6x32xf32>
    %32 = arith.addf %30, %31 : vector<6x32xf32>
    %33 = math.tanh %32 : vector<6x32xf32>
    %34 = arith.mulf %29, %33 : vector<6x32xf32>
    %c1 = arith.constant 1 : index
    %c0_12 = arith.constant 0 : index
    %c0_13 = arith.constant 0 : index
    %35 = vector.load %arg1[%c1, %c0_12, %c0_13] : memref<2x6x145xbf16, #tpu.memory_space<vmem>>, vector<1x6x145xbf16>
    %36 = vector.shape_cast %35 : vector<1x6x145xbf16> to vector<6x145xbf16>
    %c0_14 = arith.constant 0 : index
    %c0_15 = arith.constant 0 : index
    %37 = vector.load %arg2[%c0_14, %c0_15] : memref<145x128xbf16, #tpu.memory_space<vmem>>, vector<145x128xbf16>
    %cst_16 = arith.constant dense<0.000000e+00> : vector<6x128xf32>
    %38 = tpu.matmul %36, %37, %cst_16 {dimension_numbers = #tpu.dot_dimension_numbers<[1], [0], [0], [1], [0, 0, 1, 1], [], []>} : vector<6x145xbf16>, vector<145x128xbf16>, vector<6x128xf32> -> vector<6x128xf32>
    %39 = arith.truncf %34 : vector<6x32xf32> to vector<6x32xbf16>
    %c0_17 = arith.constant 0 : index
    %c0_18 = arith.constant 0 : index
    %40 = vector.load %arg3[%c0_17, %c0_18] : memref<32x128xbf16, #tpu.memory_space<vmem>>, vector<32x128xbf16>
    %cst_19 = arith.constant dense<0.000000e+00> : vector<6x128xf32>
    %41 = tpu.matmul %39, %40, %cst_19 {dimension_numbers = #tpu.dot_dimension_numbers<[1], [0], [0], [1], [0, 0, 1, 1], [], []>} : vector<6x32xbf16>, vector<32x128xbf16>, vector<6x128xf32> -> vector<6x128xf32>
    %42 = arith.addf %38, %41 : vector<6x128xf32>
    %c0_20 = arith.constant 0 : index
    %c0_21 = arith.constant 0 : index
    %43 = vector.load %arg4[%c0_20, %c0_21] : memref<1x128xf32, #tpu.memory_space<vmem>>, vector<1x128xf32>
    %44 = vector.broadcast %43 : vector<1x128xf32> to vector<6x128xf32>
    %45 = arith.addf %42, %44 : vector<6x128xf32>
    %46 = math.tanh %45 : vector<6x128xf32>
    %47 = arith.negf %45 : vector<6x128xf32>
    %48 = math.exp %47 : vector<6x128xf32>
    %cst_22 = arith.constant 1.000000e+00 : f32
    %49 = vector.broadcast %cst_22 : f32 to vector<6x128xf32>
    %50 = arith.addf %49, %48 : vector<6x128xf32>
    %51 = arith.divf %49, %50 : vector<6x128xf32>
    %52 = arith.select %7, %46, %51 : vector<6x128xi1>, vector<6x128xf32>
    %53 = vector.extract_strided_slice %52 {offsets = [0, 0], sizes = [6, 32], strides = [1, 1]} : vector<6x128xf32> to vector<6x32xf32>
    %54 = vector.extract_strided_slice %52 {offsets = [0, 32], sizes = [6, 32], strides = [1, 1]} : vector<6x128xf32> to vector<6x32xf32>
    %55 = vector.extract_strided_slice %52 {offsets = [0, 64], sizes = [6, 32], strides = [1, 1]} : vector<6x128xf32> to vector<6x32xf32>
    %56 = vector.extract_strided_slice %52 {offsets = [0, 96], sizes = [6, 32], strides = [1, 1]} : vector<6x128xf32> to vector<6x32xf32>
    %57 = arith.mulf %54, %32 : vector<6x32xf32>
    %58 = arith.mulf %53, %55 : vector<6x32xf32>
    %59 = arith.addf %57, %58 : vector<6x32xf32>
    %60 = math.tanh %59 : vector<6x32xf32>
    %61 = arith.mulf %56, %60 : vector<6x32xf32>
    %62 = arith.truncf %61 : vector<6x32xf32> to vector<6x32xbf16>
    %c0_23 = arith.constant 0 : index
    %c0_24 = arith.constant 0 : index
    %63 = vector.load %arg5[%c0_23, %c0_24] : memref<6x32xbf16, #tpu.memory_space<vmem>>, vector<6x32xbf16>
    tpu.vector_store %arg5[%c0_23, %c0_24], %62 {strides = array<i32>} : memref<6x32xbf16, #tpu.memory_space<vmem>>, vector<6x32xbf16>,
    return
  }
  func.func @transform_0(%arg0: i32) -> (i32, i32, i32) {
    %c0_i32 = arith.constant 0 : i32
    %c0_i32_0 = arith.constant 0 : i32
    %c0_i32_1 = arith.constant 0 : i32
    %c0_i32_2 = arith.constant 0 : i32
    return %c0_i32, %c0_i32_0, %c0_i32_1 : i32, i32, i32
  }
  func.func @transform_1(%arg0: i32) -> (i32, i32) {
    %c0_i32 = arith.constant 0 : i32
    %c0_i32_0 = arith.constant 0 : i32
    %c0_i32_1 = arith.constant 0 : i32
    return %c0_i32, %c0_i32_0 : i32, i32
  }
  func.func @transform_2(%arg0: i32) -> (i32, i32) {
    %c0_i32 = arith.constant 0 : i32
    %c0_i32_0 = arith.constant 0 : i32
    %c0_i32_1 = arith.constant 0 : i32
    return %c0_i32, %c0_i32_0 : i32, i32
  }
  func.func @transform_3(%arg0: i32) -> (i32, i32) {
    %c0_i32 = arith.constant 0 : i32
    %c0_i32_0 = arith.constant 0 : i32
    %c0_i32_1 = arith.constant 0 : i32
    return %c0_i32, %c0_i32_0 : i32, i32
  }
  func.func @transform_4(%arg0: i32) -> (i32, i32) {
    %c0_i32 = arith.constant 0 : i32
    %c0_i32_0 = arith.constant 0 : i32
    %c0_i32_1 = arith.constant 0 : i32
    return %c0_i32, %c0_i32_0 : i32, i32
  }
}

module attributes {stable_mosaic.version = 11 : i64} {
  func.func @_head_kernel(%arg0: i32, %arg1: memref<2x144xbf16, #tpu.memory_space<vmem>>, %arg2: memref<2x96xbf16, #tpu.memory_space<vmem>>, %arg3: memref<144x64xbf16, #tpu.memory_space<vmem>>, %arg4: memref<96x64xbf16, #tpu.memory_space<vmem>>, %arg5: memref<1x64xf32, #tpu.memory_space<vmem>>, %arg6: memref<64x4xbf16, #tpu.memory_space<vmem>>, %arg7: memref<1x4xf32, #tpu.memory_space<vmem>>, %arg8: memref<2x3xf32, #tpu.memory_space<vmem>>, %arg9: memref<2x1xf32, #tpu.memory_space<vmem>>) attributes {dimension_semantics = [#tpu.dimension_semantics<arbitrary>], iteration_bounds = array<i64: 1>, scalar_prefetch = 0 : i64, scratch_operands = 0 : i64, tpu.core_type = #tpu.core_type<tc>, window_params = [{pipeline_mode = #tpu.pipeline_mode<synchronous>, transform_indices = @transform_0, window_bounds = array<i64: 2, 144>}, {pipeline_mode = #tpu.pipeline_mode<synchronous>, transform_indices = @transform_1, window_bounds = array<i64: 2, 96>}, {pipeline_mode = #tpu.pipeline_mode<synchronous>, transform_indices = @transform_2, window_bounds = array<i64: 144, 64>}, {pipeline_mode = #tpu.pipeline_mode<synchronous>, transform_indices = @transform_3, window_bounds = array<i64: 96, 64>}, {pipeline_mode = #tpu.pipeline_mode<synchronous>, transform_indices = @transform_4, window_bounds = array<i64: 1, 64>}, {pipeline_mode = #tpu.pipeline_mode<synchronous>, transform_indices = @transform_5, window_bounds = array<i64: 64, 4>}, {pipeline_mode = #tpu.pipeline_mode<synchronous>, transform_indices = @transform_6, window_bounds = array<i64: 1, 4>}, {pipeline_mode = #tpu.pipeline_mode<synchronous>, transform_indices = @transform_7, window_bounds = array<i64: 2, 3>}, {pipeline_mode = #tpu.pipeline_mode<synchronous>, transform_indices = @transform_8, window_bounds = array<i64: 2, 1>}]} {
    %c0 = arith.constant 0 : index
    %c0_0 = arith.constant 0 : index
    %0 = vector.load %arg1[%c0, %c0_0] : memref<2x144xbf16, #tpu.memory_space<vmem>>, vector<2x144xbf16>
    %c0_1 = arith.constant 0 : index
    %c0_2 = arith.constant 0 : index
    %1 = vector.load %arg3[%c0_1, %c0_2] : memref<144x64xbf16, #tpu.memory_space<vmem>>, vector<144x64xbf16>
    %cst = arith.constant dense<0.000000e+00> : vector<2x64xf32>
    %2 = tpu.matmul %0, %1, %cst {dimension_numbers = #tpu.dot_dimension_numbers<[1], [0], [0], [1], [0, 0, 1, 1], [], []>} : vector<2x144xbf16>, vector<144x64xbf16>, vector<2x64xf32> -> vector<2x64xf32>
    %c0_3 = arith.constant 0 : index
    %c0_4 = arith.constant 0 : index
    %3 = vector.load %arg2[%c0_3, %c0_4] : memref<2x96xbf16, #tpu.memory_space<vmem>>, vector<2x96xbf16>
    %c0_5 = arith.constant 0 : index
    %c0_6 = arith.constant 0 : index
    %4 = vector.load %arg4[%c0_5, %c0_6] : memref<96x64xbf16, #tpu.memory_space<vmem>>, vector<96x64xbf16>
    %cst_7 = arith.constant dense<0.000000e+00> : vector<2x64xf32>
    %5 = tpu.matmul %3, %4, %cst_7 {dimension_numbers = #tpu.dot_dimension_numbers<[1], [0], [0], [1], [0, 0, 1, 1], [], []>} : vector<2x96xbf16>, vector<96x64xbf16>, vector<2x64xf32> -> vector<2x64xf32>
    %6 = arith.addf %2, %5 : vector<2x64xf32>
    %c0_8 = arith.constant 0 : index
    %c0_9 = arith.constant 0 : index
    %7 = vector.load %arg5[%c0_8, %c0_9] : memref<1x64xf32, #tpu.memory_space<vmem>>, vector<1x64xf32>
    %8 = vector.broadcast %7 : vector<1x64xf32> to vector<2x64xf32>
    %9 = arith.addf %6, %8 : vector<2x64xf32>
    %cst_10 = arith.constant 0.000000e+00 : f32
    %10 = vector.broadcast %cst_10 : f32 to vector<2x64xf32>
    %11 = arith.maximumf %9, %10 : vector<2x64xf32>
    %12 = arith.truncf %11 : vector<2x64xf32> to vector<2x64xbf16>
    %c0_11 = arith.constant 0 : index
    %c0_12 = arith.constant 0 : index
    %13 = vector.load %arg6[%c0_11, %c0_12] : memref<64x4xbf16, #tpu.memory_space<vmem>>, vector<64x4xbf16>
    %cst_13 = arith.constant dense<0.000000e+00> : vector<2x4xf32>
    %14 = tpu.matmul %12, %13, %cst_13 {dimension_numbers = #tpu.dot_dimension_numbers<[1], [0], [0], [1], [0, 0, 1, 1], [], []>} : vector<2x64xbf16>, vector<64x4xbf16>, vector<2x4xf32> -> vector<2x4xf32>
    %c0_14 = arith.constant 0 : index
    %c0_15 = arith.constant 0 : index
    %15 = vector.load %arg7[%c0_14, %c0_15] : memref<1x4xf32, #tpu.memory_space<vmem>>, vector<1x4xf32>
    %16 = vector.broadcast %15 : vector<1x4xf32> to vector<2x4xf32>
    %17 = arith.addf %14, %16 : vector<2x4xf32>
    %18 = vector.extract_strided_slice %17 {offsets = [0, 0], sizes = [2, 3], strides = [1, 1]} : vector<2x4xf32> to vector<2x3xf32>
    %c0_16 = arith.constant 0 : index
    %c0_17 = arith.constant 0 : index
    %19 = vector.load %arg8[%c0_16, %c0_17] : memref<2x3xf32, #tpu.memory_space<vmem>>, vector<2x3xf32>
    tpu.vector_store %arg8[%c0_16, %c0_17], %18 {strides = array<i32>} : memref<2x3xf32, #tpu.memory_space<vmem>>, vector<2x3xf32>,
    %20 = vector.extract_strided_slice %17 {offsets = [0, 3], sizes = [2, 1], strides = [1, 1]} : vector<2x4xf32> to vector<2x1xf32>
    %c0_18 = arith.constant 0 : index
    %c0_19 = arith.constant 0 : index
    %21 = vector.load %arg9[%c0_18, %c0_19] : memref<2x1xf32, #tpu.memory_space<vmem>>, vector<2x1xf32>
    tpu.vector_store %arg9[%c0_18, %c0_19], %20 {strides = array<i32>} : memref<2x1xf32, #tpu.memory_space<vmem>>, vector<2x1xf32>,
    return
  }
  func.func @transform_0(%arg0: i32) -> (i32, i32) {
    %c0_i32 = arith.constant 0 : i32
    %c0_i32_0 = arith.constant 0 : i32
    %c0_i32_1 = arith.constant 0 : i32
    return %c0_i32, %c0_i32_0 : i32, i32
  }
  func.func @transform_1(%arg0: i32) -> (i32, i32) {
    %c0_i32 = arith.constant 0 : i32
    %c0_i32_0 = arith.constant 0 : i32
    %c0_i32_1 = arith.constant 0 : i32
    return %c0_i32, %c0_i32_0 : i32, i32
  }
  func.func @transform_2(%arg0: i32) -> (i32, i32) {
    %c0_i32 = arith.constant 0 : i32
    %c0_i32_0 = arith.constant 0 : i32
    %c0_i32_1 = arith.constant 0 : i32
    return %c0_i32, %c0_i32_0 : i32, i32
  }
  func.func @transform_3(%arg0: i32) -> (i32, i32) {
    %c0_i32 = arith.constant 0 : i32
    %c0_i32_0 = arith.constant 0 : i32
    %c0_i32_1 = arith.constant 0 : i32
    return %c0_i32, %c0_i32_0 : i32, i32
  }
  func.func @transform_4(%arg0: i32) -> (i32, i32) {
    %c0_i32 = arith.constant 0 : i32
    %c0_i32_0 = arith.constant 0 : i32
    %c0_i32_1 = arith.constant 0 : i32
    return %c0_i32, %c0_i32_0 : i32, i32
  }
  func.func @transform_5(%arg0: i32) -> (i32, i32) {
    %c0_i32 = arith.constant 0 : i32
    %c0_i32_0 = arith.constant 0 : i32
    %c0_i32_1 = arith.constant 0 : i32
    return %c0_i32, %c0_i32_0 : i32, i32
  }
  func.func @transform_6(%arg0: i32) -> (i32, i32) {
    %c0_i32 = arith.constant 0 : i32
    %c0_i32_0 = arith.constant 0 : i32
    %c0_i32_1 = arith.constant 0 : i32
    return %c0_i32, %c0_i32_0 : i32, i32
  }
  func.func @transform_7(%arg0: i32) -> (i32, i32) {
    %c0_i32 = arith.constant 0 : i32
    %c0_i32_0 = arith.constant 0 : i32
    %c0_i32_1 = arith.constant 0 : i32
    return %c0_i32, %c0_i32_0 : i32, i32
  }
  func.func @transform_8(%arg0: i32) -> (i32, i32) {
    %c0_i32 = arith.constant 0 : i32
    %c0_i32_0 = arith.constant 0 : i32
    %c0_i32_1 = arith.constant 0 : i32
    return %c0_i32, %c0_i32_0 : i32, i32
  }
}

</mosaic_0001>

<bundles_post_ra>
// kernel: tile.9
= control target key start
LH: loop header
LB: loop body
LE: loop exit
PB: predicated region body
PF: predicated region fallthrough
CT: control target
= control target key end

     0   :  { %vm7_vm0 = vcmask 23552   ;;  %vm13_vm1 = vcmask 48152   ;;  %s39_s0 = inlined_call_operand.vmem [shape: s32[2,3], index: 0, kind: input, shape index: {}]   ;;  %s40_s1 = inlined_call_operand.vmem [shape: s32[6], index: 1, kind: output, shape index: {}]  }
   0x1   :  { %v4_v0 = vld [vmem:[%s39_s0] sm:$0x3]  ;;  %s22_s0 = smov 3  }
   0x2   :  { %5 = vst [vmem:[#allocation1] sm:$0x3] %v4_v0 }
   0x9   :  { %v10_v1 = vld [vmem:[#allocation1 + $0x1] sm:$0x1]   ;;  %v6_v2 = vld [vmem:[#allocation1] sm:$0x1]  }
   0xa   :  { %11 = vrot.lane.b32.xlu0 %v10_v1, %s22_s0  ;;  %8 = vst.msk [vmem:[#allocation0] sm:$0x1] %vm7_vm0, %v6_v2  }
  0x7c   :  { %v12_v3 = vpop.permute.xlu0 %11  }
  0x7d   :  { %14 = vst.msk [vmem:[#allocation0] sm:$0x1] %vm13_vm1, %v12_v3  }
  0x84   :  { %v17_v4 = vld [vmem:[#allocation0] sm:$0x1] }
  0x85   :  { %20 = vst [vmem:[%s40_s1] sm:$0x1] %v17_v4 }

// kernel: i2a_forward.8
= control target key start
LH: loop header
LB: loop body
LE: loop exit
PB: predicated region body
PF: predicated region fallthrough
CT: control target
= control target key end

     0   :  { %10 = vsyncpa [#allocation3], 0  ;;  %s1332_s0 = inlined_call_operand.vmem [shape: bf16[6,1024], index: 0, kind: input, shape index: {}]   ;;  %s1333_s1 = inlined_call_operand.hbm [shape: bf16[1024,128], index: 1, kind: input, shape index: {}]   ;;  %s1334_s2 = inlined_call_operand.hbm [shape: f32[1,128], index: 2, kind: input, shape index: {}]   ;;  %s1335_s3 = inlined_call_operand.vmem [shape: bf16[128,4], index: 3, kind: input, shape index: {}]   ;;  %s1336_s4 = inlined_call_operand.hbm [shape: f32[1,4], index: 4, kind: input, shape index: {}]   ;;  %s1337_s5 = inlined_call_operand.vmem [shape: f32[6,4], index: 5, kind: output, shape index: {}]  }
   0x1   :  { %11 = vsyncpa [#allocation5], 0  ;;  %s32_s20 = sshll.u32 %s1334_s2, 4  ;;  %s1249_s21 = smov [#allocation4]   ;;  %s33_s20 = int_to_ptr.hbm [resolvable:$true] %s32_s20 }
   0x2   :  { %s34_s22 = sshll.u32 %s1249_s21, 4  ;;  %s18_s25 = sshll.u32 %s1333_s1, 4  ;;  %s35_s22 = int_to_ptr.vmem [resolvable:$true] %s34_s22  ;;  %s19_s25 = int_to_ptr.hbm [resolvable:$true] %s18_s25 }
   0x3   :  { %37 = dma.hbm_to_vmem [thread:$0]  %s33_s20, 16, %s35_s22, [#allocation5]  }
   0x4   :  { %s1250_s26 = smov [#allocation2]   ;;  %s1251_s28 = smov 64  }
   0x5   :  { %s20_s27 = sshll.u32 %s1250_s26, 4  ;;  %s1252_s29 = smov 4   ;;  %s21_s27 = int_to_ptr.vmem [resolvable:$true] %s20_s27 }
   0x6   :  { %26 = dma.hbm_to_vmem [thread:$0]  %s19_s25, 8192, %s21_s27, [#allocation3], %s1251_s28, %s1251_s28, %s1252_s29  }
   0x7   :  { %s45_s2 = sshll.u32 %s1336_s4, 4  ;;  %s1253_s7 = smov [#allocation6]   ;;  %s46_s2 = int_to_ptr.hbm [resolvable:$true] %s45_s2 }
   0x8   :  { %s47_s8 = sshll.u32 %s1253_s7, 4  ;;  %s48_s8 = int_to_ptr.vmem [resolvable:$true] %s47_s8 }
   0x9   :  { %50 = dma.hbm_to_vmem [thread:$0]  %s46_s2, 16, %s48_s8, [#allocation5]  }
   0xa   :  { %1245 = dma.done.wait [#allocation3], 8192  }
   0xb   :  { %1246 = vsyncadd [#allocation3], 4294959104 }
   0xc   :  { %1247 = dma.done.wait [#allocation5], 32  }
   0xd   :  { %1248 = vsyncadd [#allocation5], 4294967264  ;;  %v1101_v0 = vld [vmem:[#allocation2 + $0x38] sm:$0xff]  ;;  %v1100_v4 = vld [vmem:[#allocation2 + $0x30] sm:$0xff]  ;;  %vm798_vm0 = vcmask 29696  }
   0xe   :  { %v1109_v1 = vld [vmem:[#allocation2 + $0x78] sm:$0xff]  ;;  %611 = vmatpush.bf16.msra.mxu0 %v1101_v0  ;;  %v1108_v5 = vld [vmem:[#allocation2 + $0x70] sm:$0xff]  ;;  %v1099_v8 = vld [vmem:[#allocation2 + $0x28] sm:$0xff] }
   0xf   :  { %v1117_v2 = vld [vmem:[#allocation2 + $0xb8] sm:$0xff]  ;;  %624 = vmatpush.bf16.msra.mxu1 %v1109_v1  ;;  %v1116_v6 = vld [vmem:[#allocation2 + $0xb0] sm:$0xff]  ;;  %v1107_v9 = vld [vmem:[#allocation2 + $0x68] sm:$0xff] }
  0x10   :  { %v1125_v3 = vld [vmem:[#allocation2 + $0xf8] sm:$0xff]  ;;  %637 = vmatpush.bf16.msra.mxu2 %v1117_v2  ;;  %v1124_v7 = vld [vmem:[#allocation2 + $0xf0] sm:$0xff]  ;;  %v1115_v10 = vld [vmem:[#allocation2 + $0xa8] sm:$0xff] }
  0x11   :  { %650 = vmatpush.bf16.msra.mxu3 %v1125_v3  ;;  %v1123_v11 = vld [vmem:[#allocation2 + $0xe8] sm:$0xff]  ;;  %v1098_v12 = vld [vmem:[#allocation2 + $0x20] sm:$0xff]  ;;  %v1097_v16 = vld [vmem:[#allocation2 + $0x18] sm:$0xff] }
  0x12   :  { %612 = vmatpush.bf16.msra.mxu0 %v1100_v4  ;;  %v1106_v13 = vld [vmem:[#allocation2 + $0x60] sm:$0xff]  ;;  %v1105_v17 = vld [vmem:[#allocation2 + $0x58] sm:$0xff]  ;;  %v1096_v20 = vld [vmem:[#allocation2 + $0x10] sm:$0xff] }
  0x13   :  { %625 = vmatpush.bf16.msra.mxu1 %v1108_v5  ;;  %v1114_v14 = vld [vmem:[#allocation2 + $0xa0] sm:$0xff]  ;;  %v1113_v18 = vld [vmem:[#allocation2 + $0x98] sm:$0xff]  ;;  %v1104_v21 = vld [vmem:[#allocation2 + $0x50] sm:$0xff] }
  0x14   :  { %638 = vmatpush.bf16.msra.mxu2 %v1116_v6  ;;  %v1122_v15 = vld [vmem:[#allocation2 + $0xe0] sm:$0xff]  ;;  %v1121_v19 = vld [vmem:[#allocation2 + $0xd8] sm:$0xff]  ;;  %v1112_v22 = vld [vmem:[#allocation2 + $0x90] sm:$0xff] }
  0x15   :  { %651 = vmatpush.bf16.msra.mxu3 %v1124_v7  ;;  %v1120_v23 = vld [vmem:[#allocation2 + $0xd0] sm:$0xff]  ;;  %v1095_v24 = vld [vmem:[#allocation2 + $0x8] sm:$0xff]  ;;  %v63_v29 = vld [vmem:[%s1332_s0] sm:$0x77] }
  0x16   :  { %613 = vmatpush.bf16.msra.mxu0 %v1099_v8  ;;  %v1103_v25 = vld [vmem:[#allocation2 + $0x48] sm:$0xff]  ;;  %v1094_v30 = vld [vmem:[#allocation2] sm:$0xff]  ;;  %v203_v33 = vunpack.c.l.b16 %v63_v29  ;;  %v204_v37 = vunpack.c.h.b16 %v63_v29  ;;  %v1133_v38 = vld [vmem:[#allocation2 + $0x138] sm:$0xff] }
  0x17   :  { %626 = vmatpush.bf16.msra.mxu1 %v1107_v9  ;;  %v1111_v26 = vld [vmem:[#allocation2 + $0x88] sm:$0xff]  ;;  %v1102_v31 = vld [vmem:[#allocation2 + $0x40] sm:$0xff]  ;;  %v1141_v39 = vld [vmem:[#allocation2 + $0x178] sm:$0xff] }
  0x18   :  { %639 = vmatpush.bf16.msra.mxu2 %v1115_v10  ;;  %v1119_v27 = vld [vmem:[#allocation2 + $0xc8] sm:$0xff]  ;;  %v1110_v34 = vld [vmem:[#allocation2 + $0x80] sm:$0xff]  ;;  %v1149_v40 = vld [vmem:[#allocation2 + $0x1b8] sm:$0xff]  ;;  %v211_v43 = vpack.c.b16 %v203_v33, %v203_v33  ;;  %v212_v45 = vpack.c.b16 %v204_v37, %v204_v37 }
  0x19   :  { %652 = vmatpush.bf16.msra.mxu3 %v1123_v11  ;;  %v64_v28 = vld [vmem:[%s1332_s0 + $0x8] sm:$0x77]  ;;  %v1118_v35 = vld [vmem:[#allocation2 + $0xc0] sm:$0xff]  ;;  %v1157_v41 = vld [vmem:[#allocation2 + $0x1f8] sm:$0xff] }
  0x1a   :  { %614 = vmatpush.bf16.msra.mxu0 %v1098_v12  ;;  %v205_v32 = vunpack.c.l.b16 %v64_v28  ;;  %v206_v36 = vunpack.c.h.b16 %v64_v28  ;;  %v1132_v46 = vld [vmem:[#allocation2 + $0x130] sm:$0xff]  ;;  %v1131_v50 = vld [vmem:[#allocation2 + $0x128] sm:$0xff]  ;;  %v1130_v54 = vld [vmem:[#allocation2 + $0x120] sm:$0xff] }
  0x1b   :  { %627 = vmatpush.bf16.msra.mxu1 %v1106_v13  ;;  %v1140_v47 = vld [vmem:[#allocation2 + $0x170] sm:$0xff]  ;;  %v1139_v51 = vld [vmem:[#allocation2 + $0x168] sm:$0xff]  ;;  %v1138_v55 = vld [vmem:[#allocation2 + $0x160] sm:$0xff] }
  0x1c   :  { %640 = vmatpush.bf16.msra.mxu2 %v1114_v14  ;;  %v213_v42 = vpack.c.b16 %v205_v32, %v205_v32  ;;  %v214_v44 = vpack.c.b16 %v206_v36, %v206_v36  ;;  %v1148_v48 = vld [vmem:[#allocation2 + $0x1b0] sm:$0xff]  ;;  %v1147_v52 = vld [vmem:[#allocation2 + $0x1a8] sm:$0xff]  ;;  %v1146_v56 = vld [vmem:[#allocation2 + $0x1a0] sm:$0xff] }
  0x1d   :  { %653 = vmatpush.bf16.msra.mxu3 %v1122_v15  ;;  %v1156_v49 = vld [vmem:[#allocation2 + $0x1f0] sm:$0xff]  ;;  %v1155_v53 = vld [vmem:[#allocation2 + $0x1e8] sm:$0xff]  ;;  %v1154_v57 = vld [vmem:[#allocation2 + $0x1e0] sm:$0xff] }
  0x1e   :  { %615 = vmatpush.bf16.msra.mxu0 %v1097_v16  ;;  %v1129_v58 = vld [vmem:[#allocation2 + $0x118] sm:$0xff]  ;;  %v1128_v62 = vld [vmem:[#allocation2 + $0x110] sm:$0xff]  ;;  %v1127_v2 = vld [vmem:[#allocation2 + $0x108] sm:$0xff] }
  0x1f   :  { %628 = vmatpush.bf16.msra.mxu1 %v1105_v17  ;;  %v1137_v59 = vld [vmem:[#allocation2 + $0x158] sm:$0xff]  ;;  %v1136_v63 = vld [vmem:[#allocation2 + $0x150] sm:$0xff]  ;;  %v1135_v3 = vld [vmem:[#allocation2 + $0x148] sm:$0xff] }
  0x20   :  { %641 = vmatpush.bf16.msra.mxu2 %v1113_v18  ;;  %v1145_v60 = vld [vmem:[#allocation2 + $0x198] sm:$0xff]  ;;  %v1144_v0 = vld [vmem:[#allocation2 + $0x190] sm:$0xff]  ;;  %v1143_v5 = vld [vmem:[#allocation2 + $0x188] sm:$0xff] }
  0x21   :  { %654 = vmatpush.bf16.msra.mxu3 %v1121_v19  ;;  %v1153_v61 = vld [vmem:[#allocation2 + $0x1d8] sm:$0xff]  ;;  %v1152_v1 = vld [vmem:[#allocation2 + $0x1d0] sm:$0xff]  ;;  %v1151_v6 = vld [vmem:[#allocation2 + $0x1c8] sm:$0xff] }
  0x22   :  { %616 = vmatpush.bf16.msra.mxu0 %v1096_v20  ;;  %v65_v4 = vld [vmem:[%s1332_s0 + $0x10] sm:$0x77]  ;;  %v66_v7 = vld [vmem:[%s1332_s0 + $0x18] sm:$0x77]  ;;  %v1126_v10 = vld [vmem:[#allocation2 + $0x100] sm:$0xff] }
  0x23   :  { %629 = vmatpush.bf16.msra.mxu1 %v1104_v21  ;;  %v207_v8 = vunpack.c.l.b16 %v65_v4  ;;  %v208_v9 = vunpack.c.h.b16 %v65_v4  ;;  %v1134_v11 = vld [vmem:[#allocation2 + $0x140] sm:$0xff]  ;;  %v209_v12 = vunpack.c.l.b16 %v66_v7  ;;  %v210_v13 = vunpack.c.h.b16 %v66_v7  ;;  %v1165_v20 = vld [vmem:[%s1335_s3 + $0x38] sm:$0xff]  ;;  %v1164_v21 = vld [vmem:[%s1335_s3 + $0x30] sm:$0xff] }
  0x24   :  { %642 = vmatpush.bf16.msra.mxu2 %v1112_v22  ;;  %v1142_v14 = vld [vmem:[#allocation2 + $0x180] sm:$0xff]  ;;  %v1163_v22 = vld [vmem:[%s1335_s3 + $0x28] sm:$0xff] }
  0x25   :  { %655 = vmatpush.bf16.msra.mxu3 %v1120_v23  ;;  %v1150_v15 = vld [vmem:[#allocation2 + $0x1c0] sm:$0xff]  ;;  %v215_v16 = vpack.c.b16 %v207_v8, %v207_v8  ;;  %v216_v17 = vpack.c.b16 %v208_v9, %v208_v9  ;;  %v217_v18 = vpack.c.b16 %v209_v12, %v209_v12  ;;  %v218_v19 = vpack.c.b16 %v210_v13, %v210_v13  ;;  %v1159_v28 = vld [vmem:[%s1335_s3 + $0x8] sm:$0xff] }
  0x26   :  { %617 = vmatpush.bf16.msra.mxu0 %v1095_v24  ;;  %v1162_v23 = vld [vmem:[%s1335_s3 + $0x20] sm:$0xff]  ;;  %v1161_v24 = vld [vmem:[%s1335_s3 + $0x18] sm:$0xff] }
  0x27   :  { %630 = vmatpush.bf16.msra.mxu1 %v1103_v25  ;;  %v1158_v32 = vld [vmem:[%s1335_s3] sm:$0xff] }
  0x28   :  { %643 = vmatpush.bf16.msra.mxu2 %v1111_v26  ;;  %v1160_v26 = vld [vmem:[%s1335_s3 + $0x10] sm:$0xff] }
  0x29   :  { %656 = vmatpush.bf16.msra.mxu3 %v1119_v27 }
  0x2a   :  { %618 = vmatpush.bf16.msra.mxu0 %v1094_v30 }
  0x2b   :  { %631 = vmatpush.bf16.msra.mxu1 %v1102_v31 }
  0x2c   :  { %644 = vmatpush.bf16.msra.mxu2 %v1110_v34  ;;  %v1171_v34 = vld [vmem:[#allocation4] ss:$0 sm:$0xff] }
  0x2d   :  { %657 = vmatpush.bf16.msra.mxu3 %v1118_v35  ;;  %619 = vmatmul.bf16.vlgmr.msra.gmra.mxu0 %v211_v43 }
  0x2e   :  { %663 = vmatpush.bf16.msrb.mxu0 %v1133_v38  ;;  %632 = vmatmul.bf16.vlgmr.msra.gmra.mxu1 %v212_v45 }
  0x2f   :  { %676 = vmatpush.bf16.msrb.mxu1 %v1141_v39  ;;  %645 = vmatmul.bf16.vlgmr.msra.gmra.mxu2 %v213_v42 }
  0x30   :  { %689 = vmatpush.bf16.msrb.mxu2 %v1149_v40  ;;  %658 = vmatmul.bf16.vlgmr.msra.gmra.mxu3 %v214_v44 }
  0x31   :  { %702 = vmatpush.bf16.msrb.mxu3 %v1157_v41 }
  0x32   :  { %664 = vmatpush.bf16.msrb.mxu0 %v1132_v46 }
  0x33   :  { %677 = vmatpush.bf16.msrb.mxu1 %v1140_v47 }
  0x34   :  { %690 = vmatpush.bf16.msrb.mxu2 %v1148_v48 }
  0x35   :  { %703 = vmatpush.bf16.msrb.mxu3 %v1156_v49 }
  0x36   :  { %665 = vmatpush.bf16.msrb.mxu0 %v1131_v50 }
  0x37   :  { %678 = vmatpush.bf16.msrb.mxu1 %v1139_v51 }
  0x38   :  { %691 = vmatpush.bf16.msrb.mxu2 %v1147_v52 }
  0x39   :  { %704 = vmatpush.bf16.msrb.mxu3 %v1155_v53 }
  0x3a   :  { %666 = vmatpush.bf16.msrb.mxu0 %v1130_v54 }
  0x3b   :  { %679 = vmatpush.bf16.msrb.mxu1 %v1138_v55  ;;  %v1172_v55 = vld [vmem:[#allocation6] ss:$0 sm:$0xff] }
  0x3c   :  { %692 = vmatpush.bf16.msrb.mxu2 %v1146_v56 }
  0x3d   :  { %705 = vmatpush.bf16.msrb.mxu3 %v1154_v57 }
  0x3e   :  { %667 = vmatpush.bf16.msrb.mxu0 %v1129_v58 }
  0x3f   :  { %680 = vmatpush.bf16.msrb.mxu1 %v1137_v59 }
  0x40   :  { %693 = vmatpush.bf16.msrb.mxu2 %v1145_v60 }
  0x41   :  { %706 = vmatpush.bf16.msrb.mxu3 %v1153_v61 }
  0x42   :  { %668 = vmatpush.bf16.msrb.mxu0 %v1128_v62 }
  0x43   :  { %681 = vmatpush.bf16.msrb.mxu1 %v1136_v63 }
  0x44   :  { %694 = vmatpush.bf16.msrb.mxu2 %v1144_v0 }
  0x45   :  { %707 = vmatpush.bf16.msrb.mxu3 %v1152_v1 }
  0x46   :  { %669 = vmatpush.bf16.msrb.mxu0 %v1127_v2 }
  0x47   :  { %682 = vmatpush.bf16.msrb.mxu1 %v1135_v3 }
  0x48   :  { %695 = vmatpush.bf16.msrb.mxu2 %v1143_v5 }
  0x49   :  { %708 = vmatpush.bf16.msrb.mxu3 %v1151_v6 }
  0x4a   :  { %670 = vmatpush.bf16.msrb.mxu0 %v1126_v10 }
  0x4b   :  { %683 = vmatpush.bf16.msrb.mxu1 %v1134_v11 }
  0x4c   :  { %696 = vmatpush.bf16.msrb.mxu2 %v1142_v14 }
  0x4d   :  { %709 = vmatpush.bf16.msrb.mxu3 %v1150_v15  ;;  %671 = vmatmul.bf16.vlgmr.msrb.gmra.mxu0 %v215_v16 }
  0x4e   :  { %684 = vmatmul.bf16.vlgmr.msrb.gmra.mxu1 %v216_v17  ;;  %785 = vmatpush.bf16.msra.mxu0 %v1165_v20 }
  0x4f   :  { %697 = vmatmul.bf16.vlgmr.msrb.gmra.mxu2 %v217_v18 }
  0x50   :  { %710 = vmatmul.bf16.vlgmr.msrb.gmra.mxu3 %v218_v19 }
  0x52   :  { %786 = vmatpush.bf16.msra.mxu0 %v1164_v21 }
  0x56   :  { %787 = vmatpush.bf16.msra.mxu0 %v1163_v22 }
  0x5a   :  { %788 = vmatpush.bf16.msra.mxu0 %v1162_v23 }
  0x5e   :  { %789 = vmatpush.bf16.msra.mxu0 %v1161_v24 }
  0x62   :  { %790 = vmatpush.bf16.msra.mxu0 %v1160_v26 }
  0x66   :  { %791 = vmatpush.bf16.msra.mxu0 %v1159_v28 }
  0x6a   :  { %792 = vmatpush.bf16.msra.mxu0 %v1158_v32 }
  0xaa   :  { %v620_v25 = vpop.f32.mrf.mxu0 }
  0xab   :  { %v633_v27 = vpop.f32.mrf.mxu1  ;;  %v621_v37 = vadd.f32 %v1171_v34, %v620_v25 }
  0xad   :  { %v634_v38 = vadd.f32 %v633_v27, %v621_v37 }
  0xb2   :  { %v646_v29 = vpop.f32.mrf.mxu2  ;;  %v622_v31 = vpop.f32.mrf.mxu0 }
  0xb3   :  { %v659_v30 = vpop.f32.mrf.mxu3  ;;  %v635_v33 = vpop.f32.mrf.mxu1  ;;  %v647_v39 = vadd.f32 %v646_v29, %v634_v38 }
  0xb5   :  { %v660_v40 = vadd.f32 %v659_v30, %v647_v39 }
  0xba   :  { %v648_v35 = vpop.f32.mrf.mxu2 }
  0xbb   :  { %v661_v36 = vpop.f32.mrf.mxu3 }
  0xca   :  { %v672_v41 = vpop.f32.mrf.mxu0 }
  0xcb   :  { %v685_v42 = vpop.f32.mrf.mxu1  ;;  %v673_v43 = vadd.f32 %v672_v41, %v660_v40 }
  0xcd   :  { %v686_v44 = vadd.f32 %v685_v42, %v673_v43 }
  0xd2   :  { %v698_v45 = vpop.f32.mrf.mxu2  ;;  %v674_v48 = vpop.f32.mrf.mxu0 }
  0xd3   :  { %v711_v46 = vpop.f32.mrf.mxu3  ;;  %v699_v47 = vadd.f32 %v698_v45, %v686_v44  ;;  %v687_v49 = vpop.f32.mrf.mxu1 }
  0xd5   :  { %v712_v50 = vadd.f32 %v711_v46, %v699_v47 }
  0xd7   :  { %v715_v51 = vmax.f32 %v712_v50, 0.0 }
  0xd9   :  { %v716_v52 = vpack.c.bf16 %v715_v51, %v715_v51 }
  0xda   :  { %v700_v53 = vpop.f32.mrf.mxu2 }
  0xdb   :  { %v713_v54 = vpop.f32.mrf.mxu3  ;;  %793 = vmatmul.bf16.vlgmr.msra.gmra.mxu0 %v716_v52 }
 0x158   :  { %v794_v56 = vpop.f32.mrf.mxu0 }
 0x159   :  { %v795_v57 = vadd.f32 %v1172_v55, %v794_v56 }
 0x15b   :  { %799 = vst.msk [vmem:[%s1337_s5] sm:$0x3f] %vm798_vm0, %v795_v57 }
 0x160   :  { %v796_v58 = vpop.f32.mrf.mxu0 }
 0x161   :  { %804 = vsyncpa [#allocation3], 1 }
 0x162   :  { %805 = vsyncpa [#allocation5], 1 }

// kernel: i2a_forward.9
= control target key start
LH: loop header
LB: loop body
LE: loop exit
PB: predicated region body
PF: predicated region fallthrough
CT: control target
= control target key end

     0   :  { %vm177_vm0 = vcmask 1043456   ;;  %vm173_vm1 = vcmask 64512   ;;  %vm1354_vm2 = vcmask 3072   ;;  %vm1356_vm3 = vcmask 1024   ;;  %s2865_s2 = inlined_call_operand.vmem [shape: bf16[1024,128], index: 2, kind: input, shape index: {}]   ;;  %s2866_s3 = inlined_call_operand.vmem [shape: bf16[8,128], index: 3, kind: input, shape index: {}]   ;;  %s2867_s1 = inlined_call_operand.vmem [shape: bf16[12,8], index: 1, kind: input, shape index: {}]   ;;  %s2868_s0 = inlined_call_operand.vmem [shape: bf16[12,1024], index: 0, kind: input, shape index: {}]   ;;  %s2869_s4 = inlined_call_operand.vmem [shape: f32[1,128], index: 4, kind: input, shape index: {}]   ;;  %s2870_s5 = inlined_call_operand.vmem [shape: bf16[128,1025], index: 5, kind: input, shape index: {}]   ;;  %s2871_s6 = inlined_call_operand.vmem [shape: f32[1,1025], index: 6, kind: input, shape index: {}]   ;;  %s2872_s7 = inlined_call_operand.vmem [shape: bf16[12,1024], index: 7, kind: output, shape index: {0}]   ;;  %s2873_s8 = inlined_call_operand.vmem [shape: bf16[12,1], index: 8, kind: output, shape index: {1}]  }
   0x1   :  { %v1962_v0 = vld [vmem:[%s2865_s2 + $0x38] sm:$0xff]  ;;  %v167_v3 = vld [vmem:[%s2866_s3] sm:$0xf]  ;;  %v1961_v6 = vld [vmem:[%s2865_s2 + $0x30] sm:$0xff] }
   0x2   :  { %v1970_v1 = vld [vmem:[%s2865_s2 + $0x78] sm:$0xff]  ;;  %619 = vmatpush.bf16.msra.mxu1 %v1962_v0  ;;  %v179_v5 = vsel %vm177_vm0, %v167_v3, 0  ;;  %v1969_v7 = vld [vmem:[%s2865_s2 + $0x70] sm:$0xff]  ;;  %v1960_v10 = vld [vmem:[%s2865_s2 + $0x28] sm:$0xff] }
   0x3   :  { %v1978_v2 = vld [vmem:[%s2865_s2 + $0xb8] sm:$0xff]  ;;  %633 = vmatpush.bf16.msra.mxu2 %v1970_v1  ;;  %188 = vmatpush.bf16.msra.mxu0 %v179_v5  ;;  %v1977_v8 = vld [vmem:[%s2865_s2 + $0xb0] sm:$0xff]  ;;  %v1968_v11 = vld [vmem:[%s2865_s2 + $0x68] sm:$0xff] }
   0x4   :  { %v1986_v4 = vld [vmem:[%s2865_s2 + $0xf8] sm:$0xff]  ;;  %647 = vmatpush.bf16.msra.mxu3 %v1978_v2  ;;  %v1985_v9 = vld [vmem:[%s2865_s2 + $0xf0] sm:$0xff]  ;;  %v1976_v12 = vld [vmem:[%s2865_s2 + $0xa8] sm:$0xff] }
   0x5   :  { %v1984_v13 = vld [vmem:[%s2865_s2 + $0xe8] sm:$0xff]  ;;  %v1368_v14 = vld [vmem:[%s2867_s1] sm:$0xf]  ;;  %v2019_v15 = vld [vmem:[%s2867_s1] sm:$0x30] }
   0x6   :  { %620 = vmatpush.bf16.msra.mxu1 %v1961_v6  ;;  %v1959_v16 = vld [vmem:[%s2865_s2 + $0x20] sm:$0xff]  ;;  %v1369_v18 = vor.u32 %v2019_v15, %v1368_v14  ;;  %v1958_v21 = vld [vmem:[%s2865_s2 + $0x18] sm:$0xff]  ;;  %v1957_v25 = vld [vmem:[%s2865_s2 + $0x10] sm:$0xff] }
   0x7   :  { %661 = vmatpush.bf16.msrb.mxu0 %v1986_v4  ;;  %634 = vmatpush.bf16.msra.mxu2 %v1969_v7  ;;  %v1967_v17 = vld [vmem:[%s2865_s2 + $0x60] sm:$0xff]  ;;  %v1966_v22 = vld [vmem:[%s2865_s2 + $0x58] sm:$0xff]  ;;  %v1965_v26 = vld [vmem:[%s2865_s2 + $0x50] sm:$0xff] }
   0x8   :  { %648 = vmatpush.bf16.msra.mxu3 %v1977_v8  ;;  %v1975_v19 = vld [vmem:[%s2865_s2 + $0xa0] sm:$0xff]  ;;  %1370 = vmatmul.msk.bf16.vlgmr.msra.gmra.mxu0 %vm173_vm1, %v1369_v18  ;;  %v1974_v23 = vld [vmem:[%s2865_s2 + $0x98] sm:$0xff]  ;;  %v1973_v27 = vld [vmem:[%s2865_s2 + $0x90] sm:$0xff] }
   0x9   :  { %v1983_v20 = vld [vmem:[%s2865_s2 + $0xe0] sm:$0xff]  ;;  %v1982_v24 = vld [vmem:[%s2865_s2 + $0xd8] sm:$0xff]  ;;  %v1981_v28 = vld [vmem:[%s2865_s2 + $0xd0] sm:$0xff] }
   0xa   :  { %621 = vmatpush.bf16.msra.mxu1 %v1960_v10  ;;  %v1956_v29 = vld [vmem:[%s2865_s2 + $0x8] sm:$0xff]  ;;  %v1955_v33 = vld [vmem:[%s2865_s2] sm:$0xff]  ;;  %v1994_v36 = vld [vmem:[%s2865_s2 + $0x138] sm:$0xff] }
   0xb   :  { %662 = vmatpush.bf16.msrb.mxu0 %v1985_v9  ;;  %635 = vmatpush.bf16.msra.mxu2 %v1968_v11  ;;  %v1964_v30 = vld [vmem:[%s2865_s2 + $0x48] sm:$0xff]  ;;  %v1963_v34 = vld [vmem:[%s2865_s2 + $0x40] sm:$0xff]  ;;  %v2002_v39 = vld [vmem:[%s2865_s2 + $0x178] sm:$0xff] }
   0xc   :  { %649 = vmatpush.bf16.msra.mxu3 %v1976_v12  ;;  %v1972_v31 = vld [vmem:[%s2865_s2 + $0x88] sm:$0xff]  ;;  %v1971_v35 = vld [vmem:[%s2865_s2 + $0x80] sm:$0xff]  ;;  %v2010_v42 = vld [vmem:[%s2865_s2 + $0x1b8] sm:$0xff] }
   0xd   :  { %v1980_v32 = vld [vmem:[%s2865_s2 + $0xc8] sm:$0xff]  ;;  %v1373_v37 = vld [vmem:[%s2868_s0] sm:$0xf]  ;;  %v1947_v40 = vld [vmem:[%s2868_s0 + $0x4] sm:$0xf] }
   0xe   :  { %622 = vmatpush.bf16.msra.mxu1 %v1959_v16  ;;  %v1951_v38 = vld [vmem:[%s2868_s0 + $0x1c] sm:$0x30]  ;;  %v1375_v41 = vld [vmem:[%s2868_s0 + $0x20] sm:$0x30]  ;;  %v1381_v43 = vld [vmem:[%s2868_s0 + $0x8] sm:$0xf] }
   0xf   :  { %663 = vmatpush.bf16.msrb.mxu0 %v1984_v13  ;;  %636 = vmatpush.bf16.msra.mxu2 %v1967_v17  ;;  %v1952_v44 = vld [vmem:[%s2868_s0 + $0x24] sm:$0x30]  ;;  %v1979_v45 = vld [vmem:[%s2865_s2 + $0xc0] sm:$0xff]  ;;  %v1374_v46 = vor.u32 %v1951_v38, %v1373_v37  ;;  %v1378_v47 = vor.u32 %v1947_v40, %v1375_v41  ;;  %v2018_v48 = vld [vmem:[%s2865_s2 + $0x1f8] sm:$0xff] }
  0x10   :  { %650 = vmatpush.bf16.msra.mxu3 %v1975_v19  ;;  %v1948_v49 = vld [vmem:[%s2868_s0 + $0xc] sm:$0xf]  ;;  %v1382_v51 = vor.u32 %v1952_v44, %v1381_v43  ;;  %v1993_v52 = vld [vmem:[%s2865_s2 + $0x130] sm:$0xff]  ;;  %v1991_v61 = vld [vmem:[%s2865_s2 + $0x120] sm:$0xff] }
  0x11   :  { %v1383_v50 = vld [vmem:[%s2868_s0 + $0x28] sm:$0x30]  ;;  %v2001_v53 = vld [vmem:[%s2865_s2 + $0x170] sm:$0xff]  ;;  %v1999_v62 = vld [vmem:[%s2865_s2 + $0x160] sm:$0xff] }
  0x12   :  { %623 = vmatpush.bf16.msra.mxu1 %v1958_v21  ;;  %v2009_v54 = vld [vmem:[%s2865_s2 + $0x1b0] sm:$0xff]  ;;  %v1386_v55 = vor.u32 %v1948_v49, %v1383_v50  ;;  %v1992_v57 = vld [vmem:[%s2865_s2 + $0x128] sm:$0xff]  ;;  %v2007_v63 = vld [vmem:[%s2865_s2 + $0x1a0] sm:$0xff] }
  0x13   :  { %664 = vmatpush.bf16.msrb.mxu0 %v1983_v20  ;;  %637 = vmatpush.bf16.msra.mxu2 %v1966_v22  ;;  %v2017_v56 = vld [vmem:[%s2865_s2 + $0x1f0] sm:$0xff]  ;;  %v2000_v58 = vld [vmem:[%s2865_s2 + $0x168] sm:$0xff]  ;;  %v2015_v0 = vld [vmem:[%s2865_s2 + $0x1e0] sm:$0xff] }
  0x14   :  { %651 = vmatpush.bf16.msra.mxu3 %v1974_v23  ;;  %v2008_v59 = vld [vmem:[%s2865_s2 + $0x1a8] sm:$0xff]  ;;  %v1990_v1 = vld [vmem:[%s2865_s2 + $0x118] sm:$0xff]  ;;  %v1989_v5 = vld [vmem:[%s2865_s2 + $0x110] sm:$0xff] }
  0x15   :  { %v2016_v60 = vld [vmem:[%s2865_s2 + $0x1e8] sm:$0xff]  ;;  %v1998_v2 = vld [vmem:[%s2865_s2 + $0x158] sm:$0xff]  ;;  %v1997_v6 = vld [vmem:[%s2865_s2 + $0x150] sm:$0xff] }
  0x16   :  { %624 = vmatpush.bf16.msra.mxu1 %v1957_v25  ;;  %v2006_v3 = vld [vmem:[%s2865_s2 + $0x198] sm:$0xff]  ;;  %v2005_v7 = vld [vmem:[%s2865_s2 + $0x190] sm:$0xff]  ;;  %v1988_v9 = vld [vmem:[%s2865_s2 + $0x108] sm:$0xff] }
  0x17   :  { %665 = vmatpush.bf16.msrb.mxu0 %v1982_v24  ;;  %638 = vmatpush.bf16.msra.mxu2 %v1965_v26  ;;  %v2014_v4 = vld [vmem:[%s2865_s2 + $0x1d8] sm:$0xff]  ;;  %v2013_v8 = vld [vmem:[%s2865_s2 + $0x1d0] sm:$0xff]  ;;  %v1996_v10 = vld [vmem:[%s2865_s2 + $0x148] sm:$0xff] }
  0x18   :  { %652 = vmatpush.bf16.msra.mxu3 %v1973_v27  ;;  %v2004_v11 = vld [vmem:[%s2865_s2 + $0x188] sm:$0xff]  ;;  %v1987_v13 = vld [vmem:[%s2865_s2 + $0x100] sm:$0xff]  ;;  %v1389_v16 = vld [vmem:[%s2868_s0 + $0x10] sm:$0xf] }
  0x19   :  { %v2012_v12 = vld [vmem:[%s2865_s2 + $0x1c8] sm:$0xff]  ;;  %v1995_v14 = vld [vmem:[%s2865_s2 + $0x140] sm:$0xff]  ;;  %v1953_v17 = vld [vmem:[%s2868_s0 + $0x2c] sm:$0x30] }
  0x1a   :  { %625 = vmatpush.bf16.msra.mxu1 %v1956_v29  ;;  %v2003_v15 = vld [vmem:[%s2865_s2 + $0x180] sm:$0xff]  ;;  %v1949_v18 = vld [vmem:[%s2868_s0 + $0x14] sm:$0xf]  ;;  %v1397_v20 = vld [vmem:[%s2868_s0 + $0x18] sm:$0xf]  ;;  %v1390_v23 = vor.u32 %v1953_v17, %v1389_v16 }
  0x1b   :  { %666 = vmatpush.bf16.msrb.mxu0 %v1981_v28  ;;  %639 = vmatpush.bf16.msra.mxu2 %v1964_v30  ;;  %v1391_v19 = vld [vmem:[%s2868_s0 + $0x30] sm:$0x30]  ;;  %v1954_v21 = vld [vmem:[%s2868_s0 + $0x34] sm:$0x30]  ;;  %v2011_v22 = vld [vmem:[%s2865_s2 + $0x1c0] sm:$0xff] }
  0x1c   :  { %653 = vmatpush.bf16.msra.mxu3 %v1972_v31  ;;  %v1950_v24 = vld [vmem:[%s2868_s0 + $0x1c] sm:$0xf]  ;;  %v1394_v26 = vor.u32 %v1949_v18, %v1391_v19  ;;  %v1398_v27 = vor.u32 %v1954_v21, %v1397_v20  ;;  %v1913_v29 = vld [vmem:[%s2870_s5 + $0x1f8] sm:$0xf]  ;;  %v1805_v38 = vld [vmem:[%s2870_s5 + $0x120] sm:$0xf] }
  0x1d   :  { %v1399_v25 = vld [vmem:[%s2868_s0 + $0x38] sm:$0x30]  ;;  %v1921_v43 = vld [vmem:[%s2870_s5 + $0x200] sm:$0xf]  ;;  %v1769_v50 = vld [vmem:[%s2870_s5 + $0xd8] sm:$0xf] }
  0x1e   :  { %626 = vmatpush.bf16.msra.mxu1 %v1955_v33  ;;  %v1402_v28 = vor.u32 %v1950_v24, %v1399_v25  ;;  %v2087_v30 = vld [vmem:[%s2870_s5 + $0x218] sm:$0xf0]  ;;  %v2078_v33 = vld [vmem:[%s2870_s5 + $0x1d0] sm:$0xf0]  ;;  %v2061_v16 = vld [vmem:[%s2870_s5 + $0x148] sm:$0xf0] }
  0x1f   :  { %667 = vmatpush.bf16.msrb.mxu0 %v1980_v32  ;;  %640 = vmatpush.bf16.msra.mxu2 %v1963_v34  ;;  %v1914_v31 = vor.u32 %v2087_v30, %v1913_v29  ;;  %v1877_v32 = vld [vmem:[%s2870_s5 + $0x1b0] sm:$0xf]  ;;  %v2083_v41 = vld [vmem:[%s2870_s5 + $0x1fc] sm:$0xf]  ;;  %v2057_v19 = vld [vmem:[%s2870_s5 + $0x12c] sm:$0xf] }
  0x20   :  { %654 = vmatpush.bf16.msra.mxu3 %v1971_v35  ;;  %v1878_v34 = vor.u32 %v2078_v33, %v1877_v32  ;;  %v1841_v35 = vld [vmem:[%s2870_s5 + $0x168] sm:$0xf]  ;;  %v1815_v20 = vld [vmem:[%s2870_s5 + $0x14c] sm:$0xf0]  ;;  %v1661_v21 = vld [vmem:[%s2870_s5] sm:$0xf] }
  0x21   :  { %627 = vmatmul.bf16.vlgmr.msra.gmra.mxu1 %v1374_v46  ;;  %v2084_v46 = vld [vmem:[%s2870_s5 + $0x204] sm:$0xf]  ;;  %v2047_v24 = vld [vmem:[%s2870_s5 + $0xdc] sm:$0xf]  ;;  %v1771_v25 = vld [vmem:[%s2870_s5 + $0xfc] sm:$0xf0] }
  0x22   :  { %675 = vmatpush.bf16.msrb.mxu1 %v1994_v36  ;;  %641 = vmatmul.bf16.vlgmr.msra.gmra.mxu2 %v1378_v47  ;;  %v2069_v36 = vld [vmem:[%s2870_s5 + $0x188] sm:$0xf0]  ;;  %v1923_v47 = vld [vmem:[%s2870_s5 + $0x224] sm:$0xf0]  ;;  %v2048_v29 = vld [vmem:[%s2870_s5 + $0xe4] sm:$0xf]  ;;  %v1774_v30 = vor.u32 %v2047_v24, %v1771_v25 }
  0x23   :  { %689 = vmatpush.bf16.msrb.mxu2 %v2002_v39  ;;  %668 = vmatpush.bf16.msrb.mxu0 %v1979_v45  ;;  %v1842_v37 = vor.u32 %v2069_v36, %v1841_v35  ;;  %v2060_v39 = vld [vmem:[%s2870_s5 + $0x140] sm:$0xf0]  ;;  %v1926_v49 = vor.u32 %v2084_v46, %v1923_v47  ;;  %v1929_v32 = vld [vmem:[%s2870_s5 + $0x208] sm:$0xf]  ;;  %v2089_v33 = vld [vmem:[%s2870_s5 + $0x228] sm:$0xf0] }
  0x24   :  { %703 = vmatpush.bf16.msrb.mxu3 %v2010_v42  ;;  %v1806_v40 = vor.u32 %v2060_v39, %v1805_v38  ;;  %v1915_v42 = vld [vmem:[%s2870_s5 + $0x21c] sm:$0xf0]  ;;  %v2088_v45 = vld [vmem:[%s2870_s5 + $0x220] sm:$0xf0]  ;;  %v1930_v36 = vor.u32 %v2089_v33, %v1929_v32  ;;  %v1735_v38 = vld [vmem:[%s2870_s5 + $0xb4] sm:$0xf0] }
  0x25   :  { %655 = vmatmul.bf16.vlgmr.msra.gmra.mxu3 %v1382_v51  ;;  %v1918_v44 = vor.u32 %v2083_v41, %v1915_v42  ;;  %v2051_v51 = vld [vmem:[%s2870_s5 + $0xf8] sm:$0xf0]  ;;  %v1741_v39 = vld [vmem:[%s2870_s5 + $0x98] sm:$0xf]  ;;  %v1893_v47 = vld [vmem:[%s2870_s5 + $0x1c0] sm:$0xf] }
  0x26   :  { %676 = vmatpush.bf16.msrb.mxu1 %v1993_v52  ;;  %669 = vmatmul.bf16.vlgmr.msrb.gmra.mxu0 %v1386_v55  ;;  %v1770_v52 = vor.u32 %v2051_v51, %v1769_v50  ;;  %v1885_v55 = vld [vmem:[%s2870_s5 + $0x1b8] sm:$0xf]  ;;  %v2043_v41 = vld [vmem:[%s2870_s5 + $0xb8] sm:$0xf0]  ;;  %v2029_v50 = vld [vmem:[%s2870_s5 + $0x4c] sm:$0xf] }
  0x27   :  { %717 = vmatpush.bf16.msra.mxu0 %v2018_v48  ;;  %690 = vmatpush.bf16.msrb.mxu2 %v2001_v53  ;;  %v1922_v48 = vor.u32 %v2088_v45, %v1921_v43  ;;  %v2074_v53 = vld [vmem:[%s2870_s5 + $0x1b4] sm:$0xf]  ;;  %v2039_v42 = vld [vmem:[%s2870_s5 + $0x9c] sm:$0xf]  ;;  %v1743_v43 = vld [vmem:[%s2870_s5 + $0xbc] sm:$0xf0]  ;;  %v1742_v45 = vor.u32 %v2043_v41, %v1741_v39 }
  0x28   :  { %704 = vmatpush.bf16.msrb.mxu3 %v2009_v54  ;;  %v1879_v54 = vld [vmem:[%s2870_s5 + $0x1d4] sm:$0xf0]  ;;  %v1746_v46 = vor.u32 %v2039_v42, %v1743_v43  ;;  %v1699_v51 = vld [vmem:[%s2870_s5 + $0x6c] sm:$0xf0]  ;;  %v1895_v25 = vld [vmem:[%s2870_s5 + $0x1e4] sm:$0xf0] }
  0x29   :  { %v1749_v33 = vld [vmem:[%s2870_s5 + $0xa0] sm:$0xf]  ;;  %v2068_v41 = vld [vmem:[%s2870_s5 + $0x184] sm:$0xf]  ;;  %v1867_v42 = vld [vmem:[%s2870_s5 + $0x1a4] sm:$0xf0] }
  0x2a   :  { %677 = vmatpush.bf16.msrb.mxu1 %v1992_v57  ;;  %v2079_v57 = vld [vmem:[%s2870_s5 + $0x1d8] sm:$0xf0] }
  0x2b   :  { %718 = vmatpush.bf16.msra.mxu0 %v2017_v56  ;;  %691 = vmatpush.bf16.msrb.mxu2 %v2000_v58  ;;  %v1882_v56 = vor.u32 %v2074_v53, %v1879_v54  ;;  %v2075_v58 = vld [vmem:[%s2870_s5 + $0x1bc] sm:$0xf]  ;;  %v1702_v53 = vor.u32 %v2029_v50, %v1699_v51  ;;  %v2034_v54 = vld [vmem:[%s2870_s5 + $0x70] sm:$0xf0] }
  0x2c   :  { %705 = vmatpush.bf16.msrb.mxu3 %v2008_v59  ;;  %v1887_v59 = vld [vmem:[%s2870_s5 + $0x1dc] sm:$0xf0]  ;;  %v2058_v51 = vld [vmem:[%s2870_s5 + $0x134] sm:$0xf] }
  0x2e   :  { %678 = vmatpush.bf16.msrb.mxu1 %v1991_v61  ;;  %v1890_v61 = vor.u32 %v2075_v58, %v1887_v59  ;;  %v1857_v59 = vld [vmem:[%s2870_s5 + $0x178] sm:$0xf] }
  0x2f   :  { %719 = vmatpush.bf16.msra.mxu0 %v2016_v60  ;;  %692 = vmatpush.bf16.msrb.mxu2 %v1999_v62  ;;  %v1886_v60 = vor.u32 %v2079_v57, %v1885_v55  ;;  %v1733_v62 = vld [vmem:[%s2870_s5 + $0x90] sm:$0xf]  ;;  %v2030_v55 = vld [vmem:[%s2870_s5 + $0x54] sm:$0xf] }
  0x30   :  { %706 = vmatpush.bf16.msrb.mxu3 %v2007_v63  ;;  %v2042_v63 = vld [vmem:[%s2870_s5 + $0xb0] sm:$0xf0] }
  0x32   :  { %679 = vmatpush.bf16.msrb.mxu1 %v1990_v1  ;;  %v2065_v1 = vld [vmem:[%s2870_s5 + $0x16c] sm:$0xf] }
  0x33   :  { %720 = vmatpush.bf16.msra.mxu0 %v2015_v0  ;;  %693 = vmatpush.bf16.msrb.mxu2 %v1998_v2  ;;  %v1734_v0 = vor.u32 %v2042_v63, %v1733_v62  ;;  %v1843_v2 = vld [vmem:[%s2870_s5 + $0x18c] sm:$0xf0]  ;;  %v2020_v62 = vld [vmem:[%s2870_s5 + $0x4] sm:$0xf]  ;;  %v1663_v63 = vld [vmem:[%s2870_s5 + $0x24] sm:$0xf0] }
  0x34   :  { %707 = vmatpush.bf16.msrb.mxu3 %v2006_v3  ;;  %v1849_v3 = vld [vmem:[%s2870_s5 + $0x170] sm:$0xf] }
  0x36   :  { %680 = vmatpush.bf16.msrb.mxu1 %v1989_v5  ;;  %v2070_v5 = vld [vmem:[%s2870_s5 + $0x190] sm:$0xf0] }
  0x37   :  { %721 = vmatpush.bf16.msra.mxu0 %v2014_v4  ;;  %694 = vmatpush.bf16.msrb.mxu2 %v1997_v6  ;;  %v1846_v4 = vor.u32 %v2065_v1, %v1843_v2  ;;  %v2066_v6 = vld [vmem:[%s2870_s5 + $0x174] sm:$0xf]  ;;  %v1666_v1 = vor.u32 %v2020_v62, %v1663_v63  ;;  %v2025_v2 = vld [vmem:[%s2870_s5 + $0x28] sm:$0xf0]  ;;  %v1677_v63 = vld [vmem:[%s2870_s5 + $0x10] sm:$0xf] }
  0x38   :  { %708 = vmatpush.bf16.msrb.mxu3 %v2005_v7  ;;  %v1851_v7 = vld [vmem:[%s2870_s5 + $0x194] sm:$0xf0] }
  0x3a   :  { %681 = vmatpush.bf16.msrb.mxu1 %v1988_v9  ;;  %v1854_v9 = vor.u32 %v2066_v6, %v1851_v7  ;;  %v1821_v7 = vld [vmem:[%s2870_s5 + $0x130] sm:$0xf] }
  0x3b   :  { %722 = vmatpush.bf16.msra.mxu0 %v2013_v8  ;;  %695 = vmatpush.bf16.msrb.mxu2 %v1996_v10  ;;  %v1850_v8 = vor.u32 %v2070_v5, %v1849_v3  ;;  %v1697_v10 = vld [vmem:[%s2870_s5 + $0x48] sm:$0xf]  ;;  %v2021_v3 = vld [vmem:[%s2870_s5 + $0xc] sm:$0xf] }
  0x3c   :  { %709 = vmatpush.bf16.msrb.mxu3 %v2004_v11  ;;  %v2033_v11 = vld [vmem:[%s2870_s5 + $0x68] sm:$0xf0] }
  0x3e   :  { %682 = vmatpush.bf16.msrb.mxu1 %v1987_v13  ;;  %v1698_v13 = vor.u32 %v2033_v11, %v1697_v10  ;;  %v1931_v11 = vld [vmem:[%s2870_s5 + $0x22c] sm:$0xf0] }
  0x3f   :  { %723 = vmatpush.bf16.msra.mxu0 %v2012_v12  ;;  %696 = vmatpush.bf16.msrb.mxu2 %v1995_v14  ;;  %v2056_v12 = vld [vmem:[%s2870_s5 + $0x124] sm:$0xf]  ;;  %v1807_v14 = vld [vmem:[%s2870_s5 + $0x144] sm:$0xf0] }
  0x40   :  { %710 = vmatpush.bf16.msrb.mxu3 %v2003_v15  ;;  %v1813_v15 = vld [vmem:[%s2870_s5 + $0x128] sm:$0xf]  ;;  %v1810_v17 = vor.u32 %v2056_v12, %v1807_v14  ;;  %v1937_v12 = vld [vmem:[%s2870_s5 + $0x210] sm:$0xf] }
  0x41   :  { %683 = vmatmul.bf16.vlgmr.msrb.gmra.mxu1 %v1390_v23  ;;  %v1814_v18 = vor.u32 %v2061_v16, %v1813_v15  ;;  %v2024_v23 = vld [vmem:[%s2870_s5 + $0x20] sm:$0xf0]  ;;  %v2090_v15 = vld [vmem:[%s2870_s5 + $0x230] sm:$0xf0] }
  0x42   :  { %697 = vmatmul.bf16.vlgmr.msrb.gmra.mxu2 %v1394_v26  ;;  %1210 = vmatpush.bf16.msra.mxu1 %v1914_v31  ;;  %v1662_v26 = vor.u32 %v2024_v23, %v1661_v21  ;;  %v1779_v31 = vld [vmem:[%s2870_s5 + $0x104] sm:$0xf0]  ;;  %v2086_v16 = vld [vmem:[%s2870_s5 + $0x214] sm:$0xf]  ;;  %v2053_v21 = vld [vmem:[%s2870_s5 + $0x108] sm:$0xf0] }
  0x43   :  { %724 = vmatpush.bf16.msra.mxu0 %v2011_v22  ;;  %711 = vmatmul.bf16.vlgmr.msrb.gmra.mxu3 %v1398_v27  ;;  %v1818_v22 = vor.u32 %v2057_v19, %v1815_v20  ;;  %v1777_v27 = vld [vmem:[%s2870_s5 + $0xe0] sm:$0xf]  ;;  %v1782_v35 = vor.u32 %v2048_v29, %v1779_v31  ;;  %v1785_v20 = vld [vmem:[%s2870_s5 + $0xe8] sm:$0xf]  ;;  %v1903_v31 = vld [vmem:[%s2870_s5 + $0x1ec] sm:$0xf0] }
  0x44   :  { %1224 = vmatpush.bf16.msra.mxu2 %v1918_v44  ;;  %1238 = vmatpush.bf16.msra.mxu3 %v1922_v48  ;;  %v2080_v48 = vld [vmem:[%s2870_s5 + $0x1e0] sm:$0xf0]  ;;  %v1786_v24 = vor.u32 %v2053_v21, %v1785_v20  ;;  %v1759_v20 = vld [vmem:[%s2870_s5 + $0xcc] sm:$0xf0] }
  0x46   :  { %725 = vmatmul.bf16.vlgmr.msra.gmra.mxu0 %v1402_v28  ;;  %1211 = vmatpush.bf16.msra.mxu1 %v1878_v34  ;;  %v2052_v28 = vld [vmem:[%s2870_s5 + $0x100] sm:$0xf0] }
  0x47   :  { %1252 = vmatpush.bf16.msrb.mxu0 %v1926_v49  ;;  %v1778_v34 = vor.u32 %v2052_v28, %v1777_v27  ;;  %v1894_v49 = vor.u32 %v2080_v48, %v1893_v47  ;;  %v2081_v27 = vld [vmem:[%s2870_s5 + $0x1e8] sm:$0xf0]  ;;  %v1713_v48 = vld [vmem:[%s2870_s5 + $0x58] sm:$0xf] }
  0x48   :  { %1225 = vmatpush.bf16.msra.mxu2 %v1882_v56  ;;  %1239 = vmatpush.bf16.msra.mxu3 %v1886_v60  ;;  %v1707_v56 = vld [vmem:[%s2870_s5 + $0x74] sm:$0xf0]  ;;  %v2071_v60 = vld [vmem:[%s2870_s5 + $0x198] sm:$0xf0] }
  0x49   :  { %v1710_v58 = vor.u32 %v2030_v55, %v1707_v56  ;;  %v2063_v56 = vld [vmem:[%s2870_s5 + $0x158] sm:$0xf0] }
  0x4a   :  { %1212 = vmatpush.bf16.msra.mxu1 %v1842_v37  ;;  %v2038_v37 = vld [vmem:[%s2870_s5 + $0x94] sm:$0xf] }
  0x4b   :  { %1253 = vmatpush.bf16.msrb.mxu0 %v1890_v61  ;;  %v1858_v61 = vor.u32 %v2071_v60, %v1857_v59 }
  0x4c   :  { %1226 = vmatpush.bf16.msra.mxu2 %v1846_v4  ;;  %1240 = vmatpush.bf16.msra.mxu3 %v1850_v8  ;;  %v1671_v4 = vld [vmem:[%s2870_s5 + $0x2c] sm:$0xf0]  ;;  %v2062_v8 = vld [vmem:[%s2870_s5 + $0x150] sm:$0xf0] }
  0x4d   :  { %v1674_v6 = vor.u32 %v2021_v3, %v1671_v4  ;;  %v1822_v10 = vor.u32 %v2062_v8, %v1821_v7  ;;  %v1793_v3 = vld [vmem:[%s2870_s5 + $0xf0] sm:$0xf]  ;;  %v2050_v7 = vld [vmem:[%s2870_s5 + $0xf4] sm:$0xf]  ;;  %v1795_v8 = vld [vmem:[%s2870_s5 + $0x114] sm:$0xf0] }
  0x4e   :  { %1213 = vmatpush.bf16.msra.mxu1 %v1806_v40  ;;  %v1738_v40 = vor.u32 %v2038_v37, %v1735_v38  ;;  %v1859_v37 = vld [vmem:[%s2870_s5 + $0x19c] sm:$0xf0] }
  0x4f   :  { %1254 = vmatpush.bf16.msrb.mxu0 %v1854_v9  ;;  %v2085_v9 = vld [vmem:[%s2870_s5 + $0x20c] sm:$0xf]  ;;  %v1865_v38 = vld [vmem:[%s2870_s5 + $0x180] sm:$0xf] }
  0x50   :  { %1227 = vmatpush.bf16.msra.mxu2 %v1810_v17  ;;  %1241 = vmatpush.bf16.msra.mxu3 %v1814_v18  ;;  %v1934_v14 = vor.u32 %v2085_v9, %v1931_v11  ;;  %v1939_v17 = vld [vmem:[%s2870_s5 + $0x234] sm:$0xf0]  ;;  %v1938_v18 = vor.u32 %v2090_v15, %v1937_v12  ;;  %v2040_v11 = vld [vmem:[%s2870_s5 + $0xa4] sm:$0xf]  ;;  %v1751_v12 = vld [vmem:[%s2870_s5 + $0xc4] sm:$0xf0] }
  0x51   :  { %v1942_v19 = vor.u32 %v2086_v16, %v1939_v17  ;;  %v1754_v17 = vor.u32 %v2040_v11, %v1751_v12  ;;  %v1873_v11 = vld [vmem:[%s2870_s5 + $0x188] sm:$0xf]  ;;  %v2073_v12 = vld [vmem:[%s2870_s5 + $0x1a8] sm:$0xf0] }
  0x52   :  { %1214 = vmatpush.bf16.msra.mxu1 %v1770_v52  ;;  %v1705_v52 = vld [vmem:[%s2870_s5 + $0x50] sm:$0xf] }
  0x53   :  { %1255 = vmatpush.bf16.msrb.mxu0 %v1818_v22  ;;  %v1706_v57 = vor.u32 %v2034_v54, %v1705_v52  ;;  %v2076_v22 = vld [vmem:[%s2870_s5 + $0x1c4] sm:$0xf]  ;;  %v1823_v52 = vld [vmem:[%s2870_s5 + $0x154] sm:$0xf0] }
  0x54   :  { %1228 = vmatpush.bf16.msra.mxu2 %v1774_v30  ;;  %1242 = vmatpush.bf16.msra.mxu3 %v1778_v34  ;;  %v1898_v28 = vor.u32 %v2076_v22, %v1895_v25  ;;  %v2077_v30 = vld [vmem:[%s2870_s5 + $0x1cc] sm:$0xf]  ;;  %v2044_v34 = vld [vmem:[%s2870_s5 + $0xc0] sm:$0xf0]  ;;  %v1826_v55 = vor.u32 %v2058_v51, %v1823_v52 }
  0x55   :  { %v1906_v32 = vor.u32 %v2077_v30, %v1903_v31 }
  0x56   :  { %1215 = vmatpush.bf16.msra.mxu1 %v1734_v0  ;;  %v1669_v0 = vld [vmem:[%s2870_s5 + $0x8] sm:$0xf] }
  0x57   :  { %1256 = vmatpush.bf16.msrb.mxu0 %v1782_v35  ;;  %v1670_v5 = vor.u32 %v2025_v2, %v1669_v0  ;;  %v1750_v35 = vor.u32 %v2044_v34, %v1749_v33  ;;  %v2026_v0 = vld [vmem:[%s2870_s5 + $0x30] sm:$0xf0]  ;;  %v1787_v2 = vld [vmem:[%s2870_s5 + $0x10c] sm:$0xf0]  ;;  %v1723_v33 = vld [vmem:[%s2870_s5 + $0x84] sm:$0xf0] }
  0x58   :  { %1229 = vmatpush.bf16.msra.mxu2 %v1738_v40  ;;  %1243 = vmatpush.bf16.msra.mxu3 %v1742_v45  ;;  %v2072_v40 = vld [vmem:[%s2870_s5 + $0x1a0] sm:$0xf0]  ;;  %v1870_v45 = vor.u32 %v2068_v41, %v1867_v42 }
  0x59   :  { %v1866_v43 = vor.u32 %v2072_v40, %v1865_v38  ;;  %v2022_v38 = vld [vmem:[%s2870_s5 + $0x14] sm:$0xf]  ;;  %v1685_v40 = vld [vmem:[%s2870_s5 + $0x18] sm:$0xf] }
  0x5a   :  { %1216 = vmatpush.bf16.msra.mxu1 %v1698_v13 }
  0x5b   :  { %1257 = vmatpush.bf16.msrb.mxu0 %v1746_v46 }
  0x5c   :  { %1230 = vmatpush.bf16.msra.mxu2 %v1702_v53  ;;  %1244 = vmatpush.bf16.msra.mxu3 %v1706_v57  ;;  %v1829_v53 = vld [vmem:[%s2870_s5 + $0x138] sm:$0xf]  ;;  %v2059_v57 = vld [vmem:[%s2870_s5 + $0x13c] sm:$0xf] }
  0x5d   :  { %v1830_v60 = vor.u32 %v2063_v56, %v1829_v53 }
  0x5e   :  { %1217 = vmatpush.bf16.msra.mxu1 %v1662_v26  ;;  %v1901_v26 = vld [vmem:[%s2870_s5 + $0x1c8] sm:$0xf] }
  0x5f   :  { %1258 = vmatpush.bf16.msrb.mxu0 %v1710_v58  ;;  %v1902_v29 = vor.u32 %v2081_v27, %v1901_v26  ;;  %v1831_v58 = vld [vmem:[%s2870_s5 + $0x15c] sm:$0xf0]  ;;  %v2031_v27 = vld [vmem:[%s2870_s5 + $0x5c] sm:$0xf] }
  0x60   :  { %1231 = vmatpush.bf16.msra.mxu2 %v1666_v1  ;;  %1245 = vmatpush.bf16.msra.mxu3 %v1670_v5  ;;  %v1678_v1 = vor.u32 %v2026_v0, %v1677_v63 }
  0x62   :  { %1266 = vmatpush.bf16.msrb.mxu1 %v1930_v36  ;;  %v2067_v36 = vld [vmem:[%s2870_s5 + $0x17c] sm:$0xf] }
  0x63   :  { %1259 = vmatpush.bf16.msrb.mxu0 %v1674_v6  ;;  %v1862_v39 = vor.u32 %v2067_v36, %v1859_v37  ;;  %v2054_v6 = vld [vmem:[%s2870_s5 + $0x110] sm:$0xf0] }
  0x64   :  { %1280 = vmatpush.bf16.msrb.mxu2 %v1934_v14  ;;  %1294 = vmatpush.bf16.msrb.mxu3 %v1938_v18  ;;  %v1794_v9 = vor.u32 %v2054_v6, %v1793_v3  ;;  %v1757_v14 = vld [vmem:[%s2870_s5 + $0xa8] sm:$0xf]  ;;  %v2045_v18 = vld [vmem:[%s2870_s5 + $0xc8] sm:$0xf0]  ;;  %v2091_v3 = vld [vmem:[%s2870_s5 + $0x238] sm:$0xf0] }
  0x65   :  { %v1758_v22 = vor.u32 %v2045_v18, %v1757_v14  ;;  %v1874_v14 = vor.u32 %v2073_v12, %v1873_v11  ;;  %v1801_v18 = vld [vmem:[%s2870_s5 + $0xf8] sm:$0xf] }
  0x66   :  { %1267 = vmatpush.bf16.msrb.mxu1 %v1894_v49  ;;  %v2035_v49 = vld [vmem:[%s2870_s5 + $0x78] sm:$0xf0] }
  0x67   :  { %1308 = vmatpush.bf16.msra.mxu0 %v1942_v19  ;;  %v1714_v50 = vor.u32 %v2035_v49, %v1713_v48  ;;  %v2041_v19 = vld [vmem:[%s2870_s5 + $0xac] sm:$0xf]  ;;  %v1687_v48 = vld [vmem:[%s2870_s5 + $0x3c] sm:$0xf0] }
  0x68   :  { %1281 = vmatpush.bf16.msrb.mxu2 %v1898_v28  ;;  %1295 = vmatpush.bf16.msrb.mxu3 %v1902_v29  ;;  %v1715_v28 = vld [vmem:[%s2870_s5 + $0x7c] sm:$0xf0] }
  0x69   :  { %v1721_v29 = vld [vmem:[%s2870_s5 + $0x60] sm:$0xf]  ;;  %v1718_v31 = vor.u32 %v2031_v27, %v1715_v28  ;;  %v2028_v28 = vld [vmem:[%s2870_s5 + $0x40] sm:$0xf0] }
  0x6a   :  { %1268 = vmatpush.bf16.msrb.mxu1 %v1858_v61  ;;  %v1834_v61 = vor.u32 %v2059_v57, %v1831_v58  ;;  %v1693_v27 = vld [vmem:[%s2870_s5 + $0x20] sm:$0xf] }
  0x6b   :  { %1309 = vmatpush.bf16.msra.mxu0 %v1906_v32  ;;  %v2032_v32 = vld [vmem:[%s2870_s5 + $0x64] sm:$0xf] }
  0x6c   :  { %1282 = vmatpush.bf16.msrb.mxu2 %v1862_v39  ;;  %1296 = vmatpush.bf16.msrb.mxu3 %v1866_v43  ;;  %v1726_v36 = vor.u32 %v2032_v32, %v1723_v33  ;;  %v1679_v39 = vld [vmem:[%s2870_s5 + $0x34] sm:$0xf0] }
  0x6e   :  { %1269 = vmatpush.bf16.msrb.mxu1 %v1822_v10  ;;  %v1798_v10 = vor.u32 %v2050_v7, %v1795_v8  ;;  %v1909_v8 = vld [vmem:[%s2870_s5 + $0x1d0] sm:$0xf] }
  0x6f   :  { %1310 = vmatpush.bf16.msra.mxu0 %v1870_v45  ;;  %v1682_v45 = vor.u32 %v2022_v38, %v1679_v39 }
  0x70   :  { %1283 = vmatpush.bf16.msrb.mxu2 %v1826_v55  ;;  %1297 = vmatpush.bf16.msrb.mxu3 %v1830_v60 }
  0x72   :  { %1270 = vmatpush.bf16.msrb.mxu1 %v1786_v24 }
  0x73   :  { %1311 = vmatpush.bf16.msra.mxu0 %v1834_v61 }
  0x74   :  { %1298 = vmatpush.bf16.msrb.mxu3 %v1794_v9  ;;  %v2082_v9 = vld [vmem:[%s2870_s5 + $0x1f0] sm:$0xf0] }
  0x76   :  { %1271 = vmatpush.bf16.msrb.mxu1 %v1750_v35 }
  0x77   :  { %1312 = vmatpush.bf16.msra.mxu0 %v1798_v10  ;;  %v1910_v10 = vor.u32 %v2082_v9, %v1909_v8 }
  0x78   :  { %1299 = vmatpush.bf16.msrb.mxu3 %v1758_v22  ;;  %v2046_v22 = vld [vmem:[%s2870_s5 + $0xd0] sm:$0xf0] }
  0x7a   :  { %1272 = vmatpush.bf16.msrb.mxu1 %v1714_v50 }
  0x7e   :  { %1273 = vmatpush.bf16.msrb.mxu1 %v1678_v1 }
  0x85   :  { %v2550_v44 = vpop.f32.mrf.mxu0 }
  0x8d   :  { %v2615_v13 = vpop.f32.mrf.mxu0 }
  0x9e   :  { %v628_v23 = vpop.f32.mrf.mxu1 }
  0x9f   :  { %v629_v59 = vadd.f32 %v628_v23, %v2550_v44  ;;  %v2049_v44 = vld [vmem:[%s2870_s5 + $0xec] sm:$0xf]  ;;  %v1762_v23 = vor.u32 %v2041_v19, %v1759_v20  ;;  %v2055_v19 = vld [vmem:[%s2870_s5 + $0x118] sm:$0xf0] }
  0xa0   :  { %v1790_v5 = vor.u32 %v2049_v44, %v1787_v2  ;;  %v1945_v2 = vld [vmem:[%s2870_s5 + $0x218] sm:$0xf]  ;;  %v1802_v20 = vor.u32 %v2055_v19, %v1801_v18 }
  0xa1   :  { %1313 = vmatpush.bf16.msra.mxu0 %v1762_v23  ;;  %v1946_v7 = vor.u32 %v2091_v3, %v1945_v2 }
  0xa2   :  { %1284 = vmatpush.bf16.msrb.mxu2 %v1790_v5 }
  0xa3   :  { %v670_v54 = vpop.f32.mrf.mxu0 }
  0xa5   :  { %v642_v46 = vpop.f32.mrf.mxu2  ;;  %1314 = vmatpush.bf16.msra.mxu0 %v1726_v36 }
  0xa6   :  { %v630_v62 = vpop.f32.mrf.mxu1  ;;  %v643_v4 = vadd.f32 %v642_v46, %v629_v59  ;;  %1285 = vmatpush.bf16.msrb.mxu2 %v1754_v17  ;;  %v2027_v46 = vld [vmem:[%s2870_s5 + $0x38] sm:$0xf0]  ;;  %v2092_v59 = vld [vmem:[%s2869_s4] ss:$0 sm:$0xff] }
  0xa7   :  { %v631_v24 = vadd.f32 %v630_v62, %v2615_v13  ;;  %v2036_v13 = vld [vmem:[%s2870_s5 + $0x80] sm:$0xf0]  ;;  %v1686_v50 = vor.u32 %v2027_v46, %v1685_v40 }
  0xa8   :  { %v656_v47 = vpop.f32.mrf.mxu3  ;;  %v1722_v35 = vor.u32 %v2036_v13, %v1721_v29  ;;  %v1694_v29 = vor.u32 %v2028_v28, %v1693_v27 }
  0xa9   :  { %v657_v21 = vadd.f32 %v656_v47, %v643_v4  ;;  %v2023_v47 = vld [vmem:[%s2870_s5 + $0x1c] sm:$0xf] }
  0xaa   :  { %1286 = vmatpush.bf16.msrb.mxu2 %v1718_v31  ;;  %1300 = vmatpush.bf16.msrb.mxu3 %v1722_v35  ;;  %v1690_v51 = vor.u32 %v2023_v47, %v1687_v48 }
  0xab   :  { %v672_v25 = vpop.f32.mrf.mxu0  ;;  %v671_v34 = vadd.f32 %v670_v54, %v657_v21  ;;  %v1765_v21 = vld [vmem:[%s2870_s5 + $0xb0] sm:$0xf] }
  0xac   :  { %1315 = vmatpush.bf16.msra.mxu0 %v1690_v51  ;;  %v1766_v23 = vor.u32 %v2046_v22, %v1765_v21 }
  0xad   :  { %v644_v15 = vpop.f32.mrf.mxu2 }
  0xae   :  { %v645_v30 = vadd.f32 %v644_v15, %v631_v24  ;;  %1287 = vmatpush.bf16.msrb.mxu2 %v1682_v45  ;;  %1301 = vmatpush.bf16.msrb.mxu3 %v1686_v50  ;;  %v1837_v15 = vld [vmem:[%s2870_s5 + $0x140] sm:$0xf]  ;;  %v1729_v24 = vld [vmem:[%s2870_s5 + $0x68] sm:$0xf] }
  0xb0   :  { %v658_v16 = vpop.f32.mrf.mxu3 }
  0xb1   :  { %v659_v41 = vadd.f32 %v658_v16, %v645_v30  ;;  %v2064_v16 = vld [vmem:[%s2870_s5 + $0x160] sm:$0xf0] }
  0xb2   :  { %v1838_v17 = vor.u32 %v2064_v16, %v1837_v15  ;;  %v820_v30 = vld [vmem:[%s2871_s6] sm:$0xff] }
  0xb3   :  { %v673_v54 = vadd.f32 %v672_v25, %v659_v41  ;;  %v2037_v25 = vld [vmem:[%s2870_s5 + $0x88] sm:$0xf0]  ;;  %v824_v32 = vperm.slane %v820_v30, 0  ;;  %v825_v33 = vperm.slane %v820_v30, 1  ;;  %v826_v35 = vperm.slane %v820_v30, 2 }
  0xbe   :  { %v684_v26 = vpop.f32.mrf.mxu1 }
  0xbf   :  { %v685_v37 = vadd.f32 %v684_v26, %v671_v34  ;;  %v1730_v26 = vor.u32 %v2037_v25, %v1729_v24  ;;  %v827_v34 = vperm.slane %v820_v30, 3 }
  0xc3   :  { %v726_v52 = vpop.f32.mrf.mxu0 }
  0xc5   :  { %v698_v42 = vpop.f32.mrf.mxu2 }
  0xc6   :  { %v712_v43 = vpop.f32.mrf.mxu3  ;;  %v699_v49 = vadd.f32 %v698_v42, %v685_v37  ;;  %v686_v53 = vpop.f32.mrf.mxu1 }
  0xc7   :  { %v687_v56 = vadd.f32 %v686_v53, %v673_v54 }
  0xc8   :  { %v713_v55 = vadd.f32 %v712_v43, %v699_v49 }
  0xca   :  { %v727_v58 = vadd.f32 %v726_v52, %v713_v55 }
  0xcb   :  { %v728_v63 = vpop.f32.mrf.mxu0 }
  0xcc   :  { %v735_v0 = vadd.f32 %v2092_v59, %v727_v58  ;;  %v829_v58 = vperm.slane %v820_v30, 5 }
  0xcd   :  { %v700_v57 = vpop.f32.mrf.mxu2 }
  0xce   :  { %v701_v60 = vadd.f32 %v700_v57, %v687_v56  ;;  %v714_v61 = vpop.f32.mrf.mxu3  ;;  %v737_v4 = vmax.f32 %v735_v0, 0.0  ;;  %v828_v56 = vperm.slane %v820_v30, 4 }
  0xd0   :  { %v715_v62 = vadd.f32 %v714_v61, %v701_v60  ;;  %v830_v60 = vperm.slane %v820_v30, 6 }
  0xd2   :  { %v729_v1 = vadd.f32 %v728_v63, %v715_v62 }
  0xd4   :  { %v736_v44 = vadd.f32 %v2092_v59, %v729_v1  ;;  %v831_v59 = vperm.slane %v820_v30, 7 }
  0xd6   :  { %v738_v5 = vmax.f32 %v736_v44, 0.0 }
  0xd8   :  { %v739_v6 = vpack.c.bf16 %v738_v5, %v737_v4 }
  0xda   :  { %1218 = vmatmul.bf16.vlgmr.msra.gmra.mxu1 %v739_v6  ;;  %1232 = vmatmul.bf16.vlgmr.msra.gmra.mxu2 %v739_v6 }
  0xdb   :  { %1246 = vmatmul.bf16.vlgmr.msra.gmra.mxu3 %v739_v6  ;;  %1260 = vmatmul.bf16.vlgmr.msrb.gmra.mxu0 %v739_v6 }
  0xdc   :  { %1322 = vmatpush.bf16.msra.mxu1 %v1946_v7  ;;  %v2093_v7 = vld [vmem:[%s2871_s6 + $0x8] ss:$0 sm:$0xff] }
  0xe0   :  { %1323 = vmatpush.bf16.msra.mxu1 %v1910_v10 }
  0xe4   :  { %1324 = vmatpush.bf16.msra.mxu1 %v1874_v14 }
  0xe8   :  { %1325 = vmatpush.bf16.msra.mxu1 %v1838_v17 }
  0xea   :  { %1274 = vmatmul.bf16.vlgmr.msrb.gmra.mxu1 %v739_v6  ;;  %1288 = vmatmul.bf16.vlgmr.msrb.gmra.mxu2 %v739_v6 }
  0xeb   :  { %1302 = vmatmul.bf16.vlgmr.msrb.gmra.mxu3 %v739_v6  ;;  %1316 = vmatmul.bf16.vlgmr.msra.gmra.mxu0 %v739_v6 }
  0xec   :  { %1326 = vmatpush.bf16.msra.mxu1 %v1802_v20 }
  0xf0   :  { %1327 = vmatpush.bf16.msra.mxu1 %v1766_v23 }
  0xf4   :  { %1328 = vmatpush.bf16.msra.mxu1 %v1730_v26 }
  0xf8   :  { %1329 = vmatpush.bf16.msra.mxu1 %v1694_v29 }
  0xfb   :  { %1330 = vmatmul.bf16.vlgmr.msra.gmra.mxu1 %v739_v6 }
 0x157   :  { %v1219_v31 = vpop.f32.mrf.mxu1 }
 0x158   :  { %v1261_v13 = vpop.f32.mrf.mxu0  ;;  %v1220_v37 = vadd.f32 %v1219_v31, %v824_v32 }
 0x159   :  { %v1262_v40 = vadd.f32 %v1261_v13, %v827_v34 }
 0x15d   :  { %v1233_v36 = vpop.f32.mrf.mxu2 }
 0x15e   :  { %v1234_v38 = vadd.f32 %v1233_v36, %v825_v33  ;;  %v1247_v39 = vpop.f32.mrf.mxu3 }
 0x15f   :  { %v1248_v41 = vadd.f32 %v1247_v39, %v826_v35  ;;  %v1221_v42 = vpop.f32.mrf.mxu1 }
 0x160   :  { %v1336_v43 = vpack.c.bf16 %v1234_v38, %v1220_v37  ;;  %v1263_v45 = vpop.f32.mrf.mxu0  ;;  %v1222_v48 = vadd.f32 %v1221_v42, %v824_v32 }
 0x161   :  { %v1337_v46 = vpack.c.bf16 %v1262_v40, %v1248_v41  ;;  %v1264_v51 = vadd.f32 %v1263_v45, %v827_v34 }
 0x162   :  { %1344 = vst [vmem:[%s2872_s7] sm:$0xff] %v1336_v43 }
 0x163   :  { %1345 = vst [vmem:[%s2872_s7 + $0x8] sm:$0xff] %v1337_v46 }
 0x165   :  { %v1235_v47 = vpop.f32.mrf.mxu2 }
 0x166   :  { %v1236_v49 = vadd.f32 %v1235_v47, %v825_v33  ;;  %v1249_v50 = vpop.f32.mrf.mxu3 }
 0x167   :  { %v1250_v52 = vadd.f32 %v1249_v50, %v826_v35  ;;  %v1275_v53 = vpop.f32.mrf.mxu1 }
 0x168   :  { %v1340_v54 = vpack.c.bf16 %v1236_v49, %v1222_v48  ;;  %v1317_v57 = vpop.f32.mrf.mxu0  ;;  %v1276_v62 = vadd.f32 %v1275_v53, %v828_v56 }
 0x169   :  { %v1341_v55 = vpack.c.bf16 %v1264_v51, %v1250_v52  ;;  %v1318_v1 = vadd.f32 %v1317_v57, %v831_v59 }
 0x16a   :  { %1348 = vst [vmem:[%s2872_s7 + $0x20] sm:$0x33] %v1340_v54 }
 0x16b   :  { %1349 = vst [vmem:[%s2872_s7 + $0x28] sm:$0x33] %v1341_v55 }
 0x16d   :  { %v1289_v61 = vpop.f32.mrf.mxu2 }
 0x16e   :  { %v1290_v63 = vadd.f32 %v1289_v61, %v829_v58  ;;  %v1303_v0 = vpop.f32.mrf.mxu3 }
 0x16f   :  { %v1304_v44 = vadd.f32 %v1303_v0, %v830_v60  ;;  %v1277_v2 = vpop.f32.mrf.mxu1 }
 0x170   :  { %v1338_v3 = vpack.c.bf16 %v1290_v63, %v1276_v62  ;;  %v1319_v5 = vpop.f32.mrf.mxu0  ;;  %v1278_v8 = vadd.f32 %v1277_v2, %v828_v56 }
 0x171   :  { %v1339_v4 = vpack.c.bf16 %v1318_v1, %v1304_v44  ;;  %v1320_v11 = vadd.f32 %v1319_v5, %v831_v59 }
 0x172   :  { %1346 = vst [vmem:[%s2872_s7 + $0x10] sm:$0xff] %v1338_v3 }
 0x173   :  { %1347 = vst [vmem:[%s2872_s7 + $0x18] sm:$0xff] %v1339_v4 }
 0x175   :  { %v1291_v6 = vpop.f32.mrf.mxu2 }
 0x176   :  { %v1292_v9 = vadd.f32 %v1291_v6, %v829_v58  ;;  %v1305_v10 = vpop.f32.mrf.mxu3 }
 0x177   :  { %v1306_v12 = vadd.f32 %v1305_v10, %v830_v60 }
 0x178   :  { %v1342_v14 = vpack.c.bf16 %v1292_v9, %v1278_v8  ;;  %v1331_v15 = vpop.f32.mrf.mxu1 }
 0x179   :  { %v1343_v16 = vpack.c.bf16 %v1320_v11, %v1306_v12  ;;  %v1332_v17 = vadd.f32 %v2093_v7, %v1331_v15 }
 0x17a   :  { %1350 = vst [vmem:[%s2872_s7 + $0x30] sm:$0x33] %v1342_v14 }
 0x17b   :  { %1351 = vst [vmem:[%s2872_s7 + $0x38] sm:$0x33] %v1343_v16  ;;  %v1352_v18 = vpack.c.bf16 %v1332_v17, %v1332_v17 }
 0x17d   :  { %1355 = vst.msk [vmem:[%s2873_s8] sm:$0xf] %vm1354_vm2, %v1352_v18 }
 0x180   :  { %v1333_v19 = vpop.f32.mrf.mxu1 }
 0x181   :  { %v1334_v20 = vadd.f32 %v2093_v7, %v1333_v19 }
 0x183   :  { %v1353_v21 = vpack.c.bf16 %v1334_v20, %v1334_v20 }
 0x185   :  { %1357 = vst.msk [vmem:[%s2873_s8 + $0x4] sm:$0x3] %vm1356_vm3, %v1353_v21 }

// kernel: i2a_forward.10
= control target key start
LH: loop header
LB: loop body
LE: loop exit
PB: predicated region body
PF: predicated region fallthrough
CT: control target
= control target key end

     0   :  { %vm118_vm0 = vcmask 1041408   ;;  %vm96_vm1 = vcmask 293888   ;;  %vm191_vm2 = vcmask 60416   ;;  %vm204_vm3 = vcmask 57344   ;;  %s1998_s1 = inlined_call_operand.vmem [shape: bf16[36,8], index: 1, kind: input, shape index: {}]   ;;  %s1999_s4 = inlined_call_operand.vmem [shape: bf16[36,8], index: 4, kind: input, shape index: {}]   ;;  %s2000_s2 = inlined_call_operand.vmem [shape: f32[1,8], index: 2, kind: input, shape index: {}]   ;;  %s2001_s0 = inlined_call_operand.vmem [shape: bf16[98,36], index: 0, kind: input, shape index: {}]   ;;  %s2002_s3 = inlined_call_operand.vmem [shape: bf16[588,36], index: 3, kind: input, shape index: {}]   ;;  %s2003_s5 = inlined_call_operand.vmem [shape: f32[1,8], index: 5, kind: input, shape index: {}]   ;;  %s2004_s6 = inlined_call_operand.vmem [shape: bf16[98,8], index: 6, kind: output, shape index: {0}]   ;;  %s2005_s7 = inlined_call_operand.vmem [shape: bf16[588,8], index: 7, kind: output, shape index: {1}]  }
   0x1   :  { %v43_v0 = vld [vmem:[%s1998_s1 + $0x10] sm:$0x3]  ;;  %v1267_v8 = vld [vmem:[%s1998_s1 + $0x8] sm:$0xff]  ;;  %v1266_v10 = vld [vmem:[%s1998_s1] sm:$0xff]  ;;  %vm1018_vm4 = vcmask 58368  }
   0x2   :  { %v284_v1 = vld [vmem:[%s1999_s4 + $0x10] sm:$0x3]  ;;  %v90_v2 = vunpack.c.l.b16 %v43_v0  ;;  %v1306_v9 = vld [vmem:[%s1999_s4 + $0x8] sm:$0xff]  ;;  %v1305_v11 = vld [vmem:[%s1999_s4] sm:$0xff] }
   0x3   :  { %v483_v3 = vunpack.c.l.b16 %v284_v1  ;;  %v1260_v12 = vld [vmem:[%s2001_s0] sm:$0xff]  ;;  %v1283_v14 = vld [vmem:[%s2002_s3 + $0x78] sm:$0xff]  ;;  %v1294_v15 = vld [vmem:[%s2002_s3 + $0xd0] sm:$0xff] }
   0x4   :  { %v93_v4 = vpack.c.b16 %v90_v2, %v90_v2  ;;  %v1272_v13 = vld [vmem:[%s2002_s3 + $0x20] sm:$0xff]  ;;  %v1261_v16 = vld [vmem:[%s2001_s0 + $0x8] sm:$0xff]  ;;  %v1295_v19 = vld [vmem:[%s2002_s3 + $0xd8] sm:$0xff] }
   0x5   :  { %v486_v5 = vpack.c.b16 %v483_v3, %v483_v3  ;;  %v1273_v17 = vld [vmem:[%s2002_s3 + $0x28] sm:$0xff]  ;;  %v1284_v18 = vld [vmem:[%s2002_s3 + $0x80] sm:$0xff]  ;;  %v1262_v20 = vld [vmem:[%s2001_s0 + $0x10] sm:$0xff] }
   0x6   :  { %v120_v6 = vsel %vm118_vm0, %v93_v4, 0  ;;  %v1274_v21 = vld [vmem:[%s2002_s3 + $0x30] sm:$0xff]  ;;  %v1285_v22 = vld [vmem:[%s2002_s3 + $0x88] sm:$0xff]  ;;  %v1296_v23 = vld [vmem:[%s2002_s3 + $0xe0] sm:$0xff] }
   0x7   :  { %v601_v7 = vsel %vm118_vm0, %v486_v5, 0  ;;  %127 = vmatpush.bf16.msra.mxu0 %v120_v6  ;;  %v1263_v24 = vld [vmem:[%s2001_s0 + $0x18] sm:$0xff]  ;;  %v1286_v26 = vld [vmem:[%s2002_s3 + $0x90] sm:$0xff]  ;;  %v1297_v27 = vld [vmem:[%s2002_s3 + $0xe8] sm:$0xff] }
   0x8   :  { %1307 = vmatpush.bf16.msra.mxu1 %v601_v7  ;;  %1308 = vmatpush.bf16.msra.mxu2 %v601_v7  ;;  %v1275_v25 = vld [vmem:[%s2002_s3 + $0x38] sm:$0xff]  ;;  %v1264_v28 = vld [vmem:[%s2001_s0 + $0x20] sm:$0xff]  ;;  %v1298_v31 = vld [vmem:[%s2002_s3 + $0xf0] sm:$0xff] }
   0x9   :  { %1309 = vmatpush.bf16.msra.mxu3 %v601_v7  ;;  %v1276_v29 = vld [vmem:[%s2002_s3 + $0x40] sm:$0xff]  ;;  %v1287_v30 = vld [vmem:[%s2002_s3 + $0x98] sm:$0xff]  ;;  %v1265_v32 = vld [vmem:[%s2001_s0 + $0x28] sm:$0xff] }
   0xa   :  { %v1277_v33 = vld [vmem:[%s2002_s3 + $0x48] sm:$0xff]  ;;  %v1288_v34 = vld [vmem:[%s2002_s3 + $0xa0] sm:$0xff]  ;;  %v1299_v35 = vld [vmem:[%s2002_s3 + $0xf8] sm:$0xff] }
   0xb   :  { %128 = vmatpush.bf16.msra.mxu0 %v1267_v8  ;;  %v38_v36 = vld [vmem:[%s2001_s0 + $0x30] sm:$0x1]  ;;  %v1289_v40 = vld [vmem:[%s2002_s3 + $0xa8] sm:$0xff]  ;;  %v1300_v41 = vld [vmem:[%s2002_s3 + $0x100] sm:$0xff] }
   0xc   :  { %1310 = vmatpush.bf16.msra.mxu1 %v1306_v9  ;;  %1311 = vmatpush.bf16.msra.mxu2 %v1306_v9  ;;  %v73_v37 = vunpack.c.l.b16 %v38_v36  ;;  %v1278_v39 = vld [vmem:[%s2002_s3 + $0x50] sm:$0xff]  ;;  %v1268_v42 = vld [vmem:[%s2002_s3] sm:$0xff]  ;;  %v1279_v43 = vld [vmem:[%s2002_s3 + $0x58] sm:$0xff] }
   0xd   :  { %1312 = vmatpush.bf16.msra.mxu3 %v1306_v9  ;;  %v1290_v44 = vld [vmem:[%s2002_s3 + $0xb0] sm:$0xff]  ;;  %v1301_v45 = vld [vmem:[%s2002_s3 + $0x108] sm:$0xff]  ;;  %v1507_v46 = vld [vmem:[%s2000_s2] ss:$0 sm:$0xff] }
   0xe   :  { %v80_v38 = vpack.c.b16 %v73_v37, %v73_v37  ;;  %v1512_v47 = vld [vmem:[%s2003_s5] ss:$0 sm:$0xff]  ;;  %v1269_v48 = vld [vmem:[%s2002_s3 + $0x8] sm:$0xff]  ;;  %v1291_v52 = vld [vmem:[%s2002_s3 + $0xb8] sm:$0xff] }
   0xf   :  { %129 = vmatpush.bf16.msra.mxu0 %v1266_v10  ;;  %v1280_v49 = vld [vmem:[%s2002_s3 + $0x60] sm:$0xff]  ;;  %v1302_v53 = vld [vmem:[%s2002_s3 + $0x110] sm:$0xff] }
  0x10   :  { %1313 = vmatpush.bf16.msra.mxu1 %v1305_v11  ;;  %1314 = vmatpush.bf16.msra.mxu2 %v1305_v11 }
  0x11   :  { %1315 = vmatpush.bf16.msra.mxu3 %v1305_v11 }
  0x12   :  { %1060 = vmatmul.msk.bf16.vlgmr.msra.gmra.mxu0 %vm96_vm1, %v1260_v12 }
  0x13   :  { %608 = vmatpush.bf16.msrb.mxu0 %v601_v7  ;;  %1227 = vmatmul.msk.bf16.vlgmr.msra.gmra.mxu1 %vm96_vm1, %v1272_v13 }
  0x14   :  { %1238 = vmatmul.msk.bf16.vlgmr.msra.gmra.mxu2 %vm96_vm1, %v1283_v14  ;;  %1249 = vmatmul.msk.bf16.vlgmr.msra.gmra.mxu3 %vm96_vm1, %v1294_v15  ;;  %v1270_v14 = vld [vmem:[%s2002_s3 + $0x10] sm:$0xff]  ;;  %v1281_v15 = vld [vmem:[%s2002_s3 + $0x68] sm:$0xff] }
  0x17   :  { %609 = vmatpush.bf16.msrb.mxu0 %v1306_v9 }
  0x1b   :  { %610 = vmatpush.bf16.msrb.mxu0 %v1305_v11 }
  0x22   :  { %1061 = vmatmul.msk.bf16.gmra.mxu0 %vm96_vm1, %v1261_v16 }
  0x23   :  { %1228 = vmatmul.msk.bf16.gmra.mxu1 %vm96_vm1, %v1273_v17 }
  0x24   :  { %1239 = vmatmul.msk.bf16.gmra.mxu2 %vm96_vm1, %v1284_v18  ;;  %1250 = vmatmul.msk.bf16.gmra.mxu3 %vm96_vm1, %v1295_v19 }
  0x32   :  { %1062 = vmatmul.msk.bf16.gmra.mxu0 %vm96_vm1, %v1262_v20  ;;  %v1292_v20 = vld [vmem:[%s2002_s3 + $0xc0] sm:$0xff] }
  0x33   :  { %1229 = vmatmul.msk.bf16.gmra.mxu1 %vm96_vm1, %v1274_v21  ;;  %v1303_v21 = vld [vmem:[%s2002_s3 + $0x118] sm:$0xff] }
  0x34   :  { %1240 = vmatmul.msk.bf16.gmra.mxu2 %vm96_vm1, %v1285_v22  ;;  %1251 = vmatmul.msk.bf16.gmra.mxu3 %vm96_vm1, %v1296_v23 }
  0x42   :  { %1063 = vmatmul.msk.bf16.gmra.mxu0 %vm96_vm1, %v1263_v24 }
  0x43   :  { %1230 = vmatmul.msk.bf16.gmra.mxu1 %vm96_vm1, %v1275_v25 }
  0x44   :  { %1241 = vmatmul.msk.bf16.gmra.mxu2 %vm96_vm1, %v1286_v26  ;;  %1252 = vmatmul.msk.bf16.gmra.mxu3 %vm96_vm1, %v1297_v27 }
  0x52   :  { %1064 = vmatmul.msk.bf16.gmra.mxu0 %vm96_vm1, %v1264_v28 }
  0x53   :  { %1231 = vmatmul.msk.bf16.gmra.mxu1 %vm96_vm1, %v1276_v29 }
  0x54   :  { %1242 = vmatmul.msk.bf16.gmra.mxu2 %vm96_vm1, %v1287_v30  ;;  %1253 = vmatmul.msk.bf16.gmra.mxu3 %vm96_vm1, %v1298_v31 }
  0x62   :  { %1065 = vmatmul.msk.bf16.gmra.mxu0 %vm96_vm1, %v1265_v32 }
  0x63   :  { %1232 = vmatmul.msk.bf16.gmra.mxu1 %vm96_vm1, %v1277_v33 }
  0x64   :  { %1243 = vmatmul.msk.bf16.gmra.mxu2 %vm96_vm1, %v1288_v34  ;;  %1254 = vmatmul.msk.bf16.gmra.mxu3 %vm96_vm1, %v1299_v35 }
  0x72   :  { %1066 = vmatmul.msk.bf16.gmra.mxu0 %vm96_vm1, %v80_v38 }
  0x73   :  { %1233 = vmatmul.msk.bf16.gmra.mxu1 %vm96_vm1, %v1278_v39 }
  0x74   :  { %1244 = vmatmul.msk.bf16.gmra.mxu2 %vm96_vm1, %v1289_v40  ;;  %1255 = vmatmul.msk.bf16.gmra.mxu3 %vm96_vm1, %v1300_v41 }
  0x82   :  { %1223 = vmatmul.msk.bf16.vlgmr.msrb.gmra.mxu0 %vm96_vm1, %v1268_v42 }
  0x83   :  { %1234 = vmatmul.msk.bf16.gmra.mxu1 %vm96_vm1, %v1279_v43 }
  0x84   :  { %1245 = vmatmul.msk.bf16.gmra.mxu2 %vm96_vm1, %v1290_v44  ;;  %1256 = vmatmul.msk.bf16.gmra.mxu3 %vm96_vm1, %v1301_v45 }
  0x8f   :  { %v131_v50 = vpop.f32.mrf.mxu0 }
  0x90   :  { %v632_v51 = vpop.f32.mrf.mxu1  ;;  %v132_v54 = vadd.f32 %v1507_v46, %v131_v50  ;;  %v1213_v50 = vld [vmem:[%s2002_s3 + $0x120] sm:$0xf] }
  0x91   :  { %v633_v55 = vadd.f32 %v1512_v47, %v632_v51  ;;  %v1304_v51 = vld [vmem:[%s2002_s3 + $0x120] sm:$0x30] }
  0x92   :  { %v165_v56 = vmax.f32 %v132_v54, 0.0  ;;  %1224 = vmatmul.msk.bf16.gmra.mxu0 %vm96_vm1, %v1269_v48  ;;  %v1271_v54 = vld [vmem:[%s2002_s3 + $0x18] sm:$0xff] }
  0x93   :  { %v805_v57 = vmax.f32 %v633_v55, 0.0  ;;  %1235 = vmatmul.msk.bf16.gmra.mxu1 %vm96_vm1, %v1280_v49  ;;  %v1282_v55 = vld [vmem:[%s2002_s3 + $0x70] sm:$0xff] }
  0x94   :  { %1246 = vmatmul.msk.bf16.gmra.mxu2 %vm96_vm1, %v1291_v52  ;;  %1257 = vmatmul.msk.bf16.gmra.mxu3 %vm96_vm1, %v1302_v53  ;;  %v178_v58 = vpack.c.bf16 %v165_v56, %v165_v56 }
  0x95   :  { %v879_v59 = vpack.c.bf16 %v805_v57, %v805_v57 }
  0x96   :  { %192 = vst.msk [vmem:[%s2004_s6] sm:$0xf] %vm191_vm2, %v178_v58 }
  0x97   :  { %v687_v60 = vpop.f32.mrf.mxu2  ;;  %v742_v61 = vpop.f32.mrf.mxu3  ;;  %953 = vst.msk [vmem:[%s2005_s7 + $0x20] sm:$0xf] %vm191_vm2, %v879_v59 }
  0x98   :  { %v688_v62 = vadd.f32 %v1512_v47, %v687_v60  ;;  %v743_v63 = vadd.f32 %v1512_v47, %v742_v61  ;;  %v133_v0 = vpop.f32.mrf.mxu0  ;;  %v634_v1 = vpop.f32.mrf.mxu1  ;;  %v1293_v60 = vld [vmem:[%s2002_s3 + $0xc8] sm:$0xff]  ;;  %v1214_v61 = vor.u32 %v1304_v51, %v1213_v50 }
  0x99   :  { %v134_v2 = vadd.f32 %v1507_v46, %v133_v0  ;;  %v635_v3 = vadd.f32 %v1512_v47, %v634_v1 }
  0x9a   :  { %v827_v4 = vmax.f32 %v688_v62, 0.0  ;;  %v849_v5 = vmax.f32 %v743_v63, 0.0 }
  0x9b   :  { %v166_v6 = vmax.f32 %v134_v2, 0.0  ;;  %v806_v7 = vmax.f32 %v635_v3, 0.0 }
  0x9c   :  { %v901_v8 = vpack.c.bf16 %v827_v4, %v827_v4  ;;  %v923_v9 = vpack.c.bf16 %v849_v5, %v849_v5 }
  0x9d   :  { %v179_v10 = vpack.c.bf16 %v166_v6, %v166_v6  ;;  %v880_v11 = vpack.c.bf16 %v806_v7, %v806_v7 }
  0x9e   :  { %975 = vst.msk [vmem:[%s2005_s7 + $0x78] sm:$0xf] %vm191_vm2, %v901_v8 }
  0x9f   :  { %997 = vst.msk [vmem:[%s2005_s7 + $0xd0] sm:$0xf] %vm191_vm2, %v923_v9  ;;  %v689_v12 = vpop.f32.mrf.mxu2  ;;  %v744_v13 = vpop.f32.mrf.mxu3 }
  0xa0   :  { %193 = vst.msk [vmem:[%s2004_s6 + $0x4] sm:$0xf] %vm191_vm2, %v179_v10  ;;  %v690_v16 = vadd.f32 %v1512_v47, %v689_v12  ;;  %v745_v17 = vadd.f32 %v1512_v47, %v744_v13  ;;  %v136_v18 = vpop.f32.mrf.mxu0  ;;  %v637_v19 = vpop.f32.mrf.mxu1 }
  0xa1   :  { %954 = vst.msk [vmem:[%s2005_s7 + $0x24] sm:$0xf] %vm191_vm2, %v880_v11  ;;  %v137_v22 = vadd.f32 %v1507_v46, %v136_v18  ;;  %v638_v23 = vadd.f32 %v1512_v47, %v637_v19 }
  0xa2   :  { %v828_v24 = vmax.f32 %v690_v16, 0.0  ;;  %v850_v25 = vmax.f32 %v745_v17, 0.0  ;;  %1225 = vmatmul.msk.bf16.gmra.mxu0 %vm96_vm1, %v1270_v14 }
  0xa3   :  { %v167_v26 = vmax.f32 %v137_v22, 0.0  ;;  %v807_v27 = vmax.f32 %v638_v23, 0.0  ;;  %1236 = vmatmul.msk.bf16.gmra.mxu1 %vm96_vm1, %v1281_v15 }
  0xa4   :  { %v902_v28 = vpack.c.bf16 %v828_v24, %v828_v24  ;;  %v924_v29 = vpack.c.bf16 %v850_v25, %v850_v25  ;;  %1247 = vmatmul.msk.bf16.gmra.mxu2 %vm96_vm1, %v1292_v20  ;;  %1258 = vmatmul.msk.bf16.gmra.mxu3 %vm96_vm1, %v1303_v21 }
  0xa5   :  { %v180_v30 = vpack.c.bf16 %v167_v26, %v167_v26  ;;  %v881_v31 = vpack.c.bf16 %v807_v27, %v807_v27 }
  0xa6   :  { %976 = vst.msk [vmem:[%s2005_s7 + $0x7c] sm:$0xf] %vm191_vm2, %v902_v28 }
  0xa7   :  { %998 = vst.msk [vmem:[%s2005_s7 + $0xd4] sm:$0xf] %vm191_vm2, %v924_v29  ;;  %v692_v32 = vpop.f32.mrf.mxu2  ;;  %v747_v33 = vpop.f32.mrf.mxu3 }
  0xa8   :  { %194 = vst.msk [vmem:[%s2004_s6 + $0x8] sm:$0xf] %vm191_vm2, %v180_v30  ;;  %v693_v34 = vadd.f32 %v1512_v47, %v692_v32  ;;  %v748_v35 = vadd.f32 %v1512_v47, %v747_v33  ;;  %v138_v36 = vpop.f32.mrf.mxu0  ;;  %v639_v37 = vpop.f32.mrf.mxu1 }
  0xa9   :  { %955 = vst.msk [vmem:[%s2005_s7 + $0x28] sm:$0xf] %vm191_vm2, %v881_v31  ;;  %v139_v38 = vadd.f32 %v1507_v46, %v138_v36  ;;  %v640_v39 = vadd.f32 %v1512_v47, %v639_v37 }
  0xaa   :  { %v829_v40 = vmax.f32 %v693_v34, 0.0  ;;  %v851_v41 = vmax.f32 %v748_v35, 0.0 }
  0xab   :  { %v168_v42 = vmax.f32 %v139_v38, 0.0  ;;  %v808_v43 = vmax.f32 %v640_v39, 0.0 }
  0xac   :  { %v903_v44 = vpack.c.bf16 %v829_v40, %v829_v40  ;;  %v925_v45 = vpack.c.bf16 %v851_v41, %v851_v41 }
  0xad   :  { %v181_v48 = vpack.c.bf16 %v168_v42, %v168_v42  ;;  %v882_v49 = vpack.c.bf16 %v808_v43, %v808_v43 }
  0xae   :  { %977 = vst.msk [vmem:[%s2005_s7 + $0x80] sm:$0xf] %vm191_vm2, %v903_v44 }
  0xaf   :  { %999 = vst.msk [vmem:[%s2005_s7 + $0xd8] sm:$0xf] %vm191_vm2, %v925_v45  ;;  %v694_v52 = vpop.f32.mrf.mxu2  ;;  %v749_v53 = vpop.f32.mrf.mxu3 }
  0xb0   :  { %195 = vst.msk [vmem:[%s2004_s6 + $0xc] sm:$0xf] %vm191_vm2, %v181_v48  ;;  %v695_v56 = vadd.f32 %v1512_v47, %v694_v52  ;;  %v750_v57 = vadd.f32 %v1512_v47, %v749_v53  ;;  %v141_v58 = vpop.f32.mrf.mxu0  ;;  %v642_v59 = vpop.f32.mrf.mxu1 }
  0xb1   :  { %956 = vst.msk [vmem:[%s2005_s7 + $0x2c] sm:$0xf] %vm191_vm2, %v882_v49  ;;  %v142_v62 = vadd.f32 %v1507_v46, %v141_v58  ;;  %v643_v63 = vadd.f32 %v1512_v47, %v642_v59 }
  0xb2   :  { %v830_v0 = vmax.f32 %v695_v56, 0.0  ;;  %v852_v1 = vmax.f32 %v750_v57, 0.0  ;;  %1226 = vmatmul.msk.bf16.gmra.mxu0 %vm96_vm1, %v1271_v54 }
  0xb3   :  { %v169_v2 = vmax.f32 %v142_v62, 0.0  ;;  %v809_v3 = vmax.f32 %v643_v63, 0.0  ;;  %1237 = vmatmul.msk.bf16.gmra.mxu1 %vm96_vm1, %v1282_v55 }
  0xb4   :  { %v904_v4 = vpack.c.bf16 %v830_v0, %v830_v0  ;;  %v926_v5 = vpack.c.bf16 %v852_v1, %v852_v1  ;;  %1248 = vmatmul.msk.bf16.gmra.mxu2 %vm96_vm1, %v1293_v60  ;;  %1259 = vmatmul.msk.bf16.gmra.mxu3 %vm96_vm1, %v1214_v61 }
  0xb5   :  { %v182_v6 = vpack.c.bf16 %v169_v2, %v169_v2  ;;  %v883_v7 = vpack.c.bf16 %v809_v3, %v809_v3 }
  0xb6   :  { %978 = vst.msk [vmem:[%s2005_s7 + $0x84] sm:$0xf] %vm191_vm2, %v904_v4 }
  0xb7   :  { %1000 = vst.msk [vmem:[%s2005_s7 + $0xdc] sm:$0xf] %vm191_vm2, %v926_v5  ;;  %v697_v8 = vpop.f32.mrf.mxu2  ;;  %v752_v9 = vpop.f32.mrf.mxu3 }
  0xb8   :  { %196 = vst.msk [vmem:[%s2004_s6 + $0x10] sm:$0xf] %vm191_vm2, %v182_v6  ;;  %v698_v10 = vadd.f32 %v1512_v47, %v697_v8  ;;  %v753_v11 = vadd.f32 %v1512_v47, %v752_v9  ;;  %v143_v12 = vpop.f32.mrf.mxu0  ;;  %v644_v13 = vpop.f32.mrf.mxu1 }
  0xb9   :  { %957 = vst.msk [vmem:[%s2005_s7 + $0x30] sm:$0xf] %vm191_vm2, %v883_v7  ;;  %v144_v14 = vadd.f32 %v1507_v46, %v143_v12  ;;  %v645_v15 = vadd.f32 %v1512_v47, %v644_v13 }
  0xba   :  { %v831_v16 = vmax.f32 %v698_v10, 0.0  ;;  %v853_v17 = vmax.f32 %v753_v11, 0.0 }
  0xbb   :  { %v170_v18 = vmax.f32 %v144_v14, 0.0  ;;  %v810_v19 = vmax.f32 %v645_v15, 0.0 }
  0xbc   :  { %v905_v20 = vpack.c.bf16 %v831_v16, %v831_v16  ;;  %v927_v21 = vpack.c.bf16 %v853_v17, %v853_v17 }
  0xbd   :  { %v183_v22 = vpack.c.bf16 %v170_v18, %v170_v18  ;;  %v884_v23 = vpack.c.bf16 %v810_v19, %v810_v19 }
  0xbe   :  { %979 = vst.msk [vmem:[%s2005_s7 + $0x88] sm:$0xf] %vm191_vm2, %v905_v20 }
  0xbf   :  { %1001 = vst.msk [vmem:[%s2005_s7 + $0xe0] sm:$0xf] %vm191_vm2, %v927_v21  ;;  %v699_v24 = vpop.f32.mrf.mxu2  ;;  %v754_v25 = vpop.f32.mrf.mxu3 }
  0xc0   :  { %197 = vst.msk [vmem:[%s2004_s6 + $0x14] sm:$0xf] %vm191_vm2, %v183_v22  ;;  %v700_v26 = vadd.f32 %v1512_v47, %v699_v24  ;;  %v755_v27 = vadd.f32 %v1512_v47, %v754_v25  ;;  %v146_v28 = vpop.f32.mrf.mxu0  ;;  %v647_v29 = vpop.f32.mrf.mxu1 }
  0xc1   :  { %958 = vst.msk [vmem:[%s2005_s7 + $0x34] sm:$0xf] %vm191_vm2, %v884_v23  ;;  %v147_v30 = vadd.f32 %v1507_v46, %v146_v28  ;;  %v648_v31 = vadd.f32 %v1512_v47, %v647_v29 }
  0xc2   :  { %v832_v32 = vmax.f32 %v700_v26, 0.0  ;;  %v854_v33 = vmax.f32 %v755_v27, 0.0 }
  0xc3   :  { %v171_v34 = vmax.f32 %v147_v30, 0.0  ;;  %v811_v35 = vmax.f32 %v648_v31, 0.0 }
  0xc4   :  { %v906_v36 = vpack.c.bf16 %v832_v32, %v832_v32  ;;  %v928_v37 = vpack.c.bf16 %v854_v33, %v854_v33 }
  0xc5   :  { %v184_v38 = vpack.c.bf16 %v171_v34, %v171_v34  ;;  %v885_v39 = vpack.c.bf16 %v811_v35, %v811_v35 }
  0xc6   :  { %980 = vst.msk [vmem:[%s2005_s7 + $0x8c] sm:$0xf] %vm191_vm2, %v906_v36 }
  0xc7   :  { %1002 = vst.msk [vmem:[%s2005_s7 + $0xe4] sm:$0xf] %vm191_vm2, %v928_v37  ;;  %v702_v40 = vpop.f32.mrf.mxu2  ;;  %v757_v41 = vpop.f32.mrf.mxu3 }
  0xc8   :  { %198 = vst.msk [vmem:[%s2004_s6 + $0x18] sm:$0xf] %vm191_vm2, %v184_v38  ;;  %v703_v42 = vadd.f32 %v1512_v47, %v702_v40  ;;  %v758_v43 = vadd.f32 %v1512_v47, %v757_v41  ;;  %v148_v44 = vpop.f32.mrf.mxu0  ;;  %v649_v45 = vpop.f32.mrf.mxu1 }
  0xc9   :  { %959 = vst.msk [vmem:[%s2005_s7 + $0x38] sm:$0xf] %vm191_vm2, %v885_v39  ;;  %v149_v48 = vadd.f32 %v1507_v46, %v148_v44  ;;  %v650_v49 = vadd.f32 %v1512_v47, %v649_v45 }
  0xca   :  { %v833_v50 = vmax.f32 %v703_v42, 0.0  ;;  %v855_v51 = vmax.f32 %v758_v43, 0.0 }
  0xcb   :  { %v172_v52 = vmax.f32 %v149_v48, 0.0  ;;  %v812_v53 = vmax.f32 %v650_v49, 0.0 }
  0xcc   :  { %v907_v54 = vpack.c.bf16 %v833_v50, %v833_v50  ;;  %v929_v55 = vpack.c.bf16 %v855_v51, %v855_v51 }
  0xcd   :  { %v185_v56 = vpack.c.bf16 %v172_v52, %v172_v52  ;;  %v886_v57 = vpack.c.bf16 %v812_v53, %v812_v53 }
  0xce   :  { %981 = vst.msk [vmem:[%s2005_s7 + $0x90] sm:$0xf] %vm191_vm2, %v907_v54 }
  0xcf   :  { %1003 = vst.msk [vmem:[%s2005_s7 + $0xe8] sm:$0xf] %vm191_vm2, %v929_v55  ;;  %v704_v58 = vpop.f32.mrf.mxu2  ;;  %v759_v59 = vpop.f32.mrf.mxu3 }
  0xd0   :  { %199 = vst.msk [vmem:[%s2004_s6 + $0x1c] sm:$0xf] %vm191_vm2, %v185_v56  ;;  %v705_v60 = vadd.f32 %v1512_v47, %v704_v58  ;;  %v760_v61 = vadd.f32 %v1512_v47, %v759_v59  ;;  %v151_v62 = vpop.f32.mrf.mxu0  ;;  %v652_v63 = vpop.f32.mrf.mxu1 }
  0xd1   :  { %960 = vst.msk [vmem:[%s2005_s7 + $0x3c] sm:$0xf] %vm191_vm2, %v886_v57  ;;  %v152_v0 = vadd.f32 %v1507_v46, %v151_v62  ;;  %v653_v1 = vadd.f32 %v1512_v47, %v652_v63 }
  0xd2   :  { %v834_v2 = vmax.f32 %v705_v60, 0.0  ;;  %v856_v3 = vmax.f32 %v760_v61, 0.0 }
  0xd3   :  { %v173_v4 = vmax.f32 %v152_v0, 0.0  ;;  %v813_v5 = vmax.f32 %v653_v1, 0.0 }
  0xd4   :  { %v908_v6 = vpack.c.bf16 %v834_v2, %v834_v2  ;;  %v930_v7 = vpack.c.bf16 %v856_v3, %v856_v3 }
  0xd5   :  { %v186_v8 = vpack.c.bf16 %v173_v4, %v173_v4  ;;  %v887_v9 = vpack.c.bf16 %v813_v5, %v813_v5 }
  0xd6   :  { %982 = vst.msk [vmem:[%s2005_s7 + $0x94] sm:$0xf] %vm191_vm2, %v908_v6 }
  0xd7   :  { %1004 = vst.msk [vmem:[%s2005_s7 + $0xec] sm:$0xf] %vm191_vm2, %v930_v7  ;;  %v707_v10 = vpop.f32.mrf.mxu2  ;;  %v762_v11 = vpop.f32.mrf.mxu3 }
  0xd8   :  { %200 = vst.msk [vmem:[%s2004_s6 + $0x20] sm:$0xf] %vm191_vm2, %v186_v8  ;;  %v708_v12 = vadd.f32 %v1512_v47, %v707_v10  ;;  %v763_v13 = vadd.f32 %v1512_v47, %v762_v11  ;;  %v153_v14 = vpop.f32.mrf.mxu0  ;;  %v654_v15 = vpop.f32.mrf.mxu1 }
  0xd9   :  { %961 = vst.msk [vmem:[%s2005_s7 + $0x40] sm:$0xf] %vm191_vm2, %v887_v9  ;;  %v154_v16 = vadd.f32 %v1507_v46, %v153_v14  ;;  %v655_v17 = vadd.f32 %v1512_v47, %v654_v15 }
  0xda   :  { %v835_v18 = vmax.f32 %v708_v12, 0.0  ;;  %v857_v19 = vmax.f32 %v763_v13, 0.0 }
  0xdb   :  { %v174_v20 = vmax.f32 %v154_v16, 0.0  ;;  %v814_v21 = vmax.f32 %v655_v17, 0.0 }
  0xdc   :  { %v909_v22 = vpack.c.bf16 %v835_v18, %v835_v18  ;;  %v931_v23 = vpack.c.bf16 %v857_v19, %v857_v19 }
  0xdd   :  { %v187_v24 = vpack.c.bf16 %v174_v20, %v174_v20  ;;  %v888_v25 = vpack.c.bf16 %v814_v21, %v814_v21 }
  0xde   :  { %983 = vst.msk [vmem:[%s2005_s7 + $0x98] sm:$0xf] %vm191_vm2, %v909_v22 }
  0xdf   :  { %1005 = vst.msk [vmem:[%s2005_s7 + $0xf0] sm:$0xf] %vm191_vm2, %v931_v23  ;;  %v709_v26 = vpop.f32.mrf.mxu2  ;;  %v764_v27 = vpop.f32.mrf.mxu3 }
  0xe0   :  { %201 = vst.msk [vmem:[%s2004_s6 + $0x24] sm:$0xf] %vm191_vm2, %v187_v24  ;;  %v710_v28 = vadd.f32 %v1512_v47, %v709_v26  ;;  %v765_v29 = vadd.f32 %v1512_v47, %v764_v27  ;;  %v156_v30 = vpop.f32.mrf.mxu0  ;;  %v657_v31 = vpop.f32.mrf.mxu1 }
  0xe1   :  { %962 = vst.msk [vmem:[%s2005_s7 + $0x44] sm:$0xf] %vm191_vm2, %v888_v25  ;;  %v157_v32 = vadd.f32 %v1507_v46, %v156_v30  ;;  %v658_v33 = vadd.f32 %v1512_v47, %v657_v31 }
  0xe2   :  { %v836_v34 = vmax.f32 %v710_v28, 0.0  ;;  %v858_v35 = vmax.f32 %v765_v29, 0.0 }
  0xe3   :  { %v175_v36 = vmax.f32 %v157_v32, 0.0  ;;  %v815_v37 = vmax.f32 %v658_v33, 0.0 }
  0xe4   :  { %v910_v38 = vpack.c.bf16 %v836_v34, %v836_v34  ;;  %v932_v39 = vpack.c.bf16 %v858_v35, %v858_v35 }
  0xe5   :  { %v188_v40 = vpack.c.bf16 %v175_v36, %v175_v36  ;;  %v889_v41 = vpack.c.bf16 %v815_v37, %v815_v37 }
  0xe6   :  { %984 = vst.msk [vmem:[%s2005_s7 + $0x9c] sm:$0xf] %vm191_vm2, %v910_v38 }
  0xe7   :  { %1006 = vst.msk [vmem:[%s2005_s7 + $0xf4] sm:$0xf] %vm191_vm2, %v932_v39  ;;  %v712_v42 = vpop.f32.mrf.mxu2  ;;  %v767_v43 = vpop.f32.mrf.mxu3 }
  0xe8   :  { %202 = vst.msk [vmem:[%s2004_s6 + $0x28] sm:$0xf] %vm191_vm2, %v188_v40  ;;  %v713_v44 = vadd.f32 %v1512_v47, %v712_v42  ;;  %v768_v45 = vadd.f32 %v1512_v47, %v767_v43  ;;  %v158_v48 = vpop.f32.mrf.mxu0  ;;  %v659_v49 = vpop.f32.mrf.mxu1 }
  0xe9   :  { %963 = vst.msk [vmem:[%s2005_s7 + $0x48] sm:$0xf] %vm191_vm2, %v889_v41  ;;  %v159_v50 = vadd.f32 %v1507_v46, %v158_v48  ;;  %v660_v51 = vadd.f32 %v1512_v47, %v659_v49 }
  0xea   :  { %v837_v52 = vmax.f32 %v713_v44, 0.0  ;;  %v859_v53 = vmax.f32 %v768_v45, 0.0 }
  0xeb   :  { %v176_v54 = vmax.f32 %v159_v50, 0.0  ;;  %v816_v55 = vmax.f32 %v660_v51, 0.0 }
  0xec   :  { %v911_v56 = vpack.c.bf16 %v837_v52, %v837_v52  ;;  %v933_v57 = vpack.c.bf16 %v859_v53, %v859_v53 }
  0xed   :  { %v189_v58 = vpack.c.bf16 %v176_v54, %v176_v54  ;;  %v890_v59 = vpack.c.bf16 %v816_v55, %v816_v55 }
  0xee   :  { %985 = vst.msk [vmem:[%s2005_s7 + $0xa0] sm:$0xf] %vm191_vm2, %v911_v56 }
  0xef   :  { %1007 = vst.msk [vmem:[%s2005_s7 + $0xf8] sm:$0xf] %vm191_vm2, %v933_v57  ;;  %v714_v60 = vpop.f32.mrf.mxu2  ;;  %v769_v61 = vpop.f32.mrf.mxu3 }
  0xf0   :  { %203 = vst.msk [vmem:[%s2004_s6 + $0x2c] sm:$0xf] %vm191_vm2, %v189_v58  ;;  %v715_v62 = vadd.f32 %v1512_v47, %v714_v60  ;;  %v770_v63 = vadd.f32 %v1512_v47, %v769_v61  ;;  %v161_v0 = vpop.f32.mrf.mxu0  ;;  %v662_v1 = vpop.f32.mrf.mxu1 }
  0xf1   :  { %964 = vst.msk [vmem:[%s2005_s7 + $0x4c] sm:$0xf] %vm191_vm2, %v890_v59  ;;  %v162_v2 = vadd.f32 %v1507_v46, %v161_v0  ;;  %v663_v3 = vadd.f32 %v1512_v47, %v662_v1 }
  0xf2   :  { %v838_v4 = vmax.f32 %v715_v62, 0.0  ;;  %v860_v5 = vmax.f32 %v770_v63, 0.0 }
  0xf3   :  { %v177_v6 = vmax.f32 %v162_v2, 0.0  ;;  %v817_v7 = vmax.f32 %v663_v3, 0.0 }
  0xf4   :  { %v912_v8 = vpack.c.bf16 %v838_v4, %v838_v4  ;;  %v934_v9 = vpack.c.bf16 %v860_v5, %v860_v5 }
  0xf5   :  { %v190_v10 = vpack.c.bf16 %v177_v6, %v177_v6  ;;  %v891_v11 = vpack.c.bf16 %v817_v7, %v817_v7 }
  0xf6   :  { %986 = vst.msk [vmem:[%s2005_s7 + $0xa4] sm:$0xf] %vm191_vm2, %v912_v8 }
  0xf7   :  { %1008 = vst.msk [vmem:[%s2005_s7 + $0xfc] sm:$0xf] %vm191_vm2, %v934_v9  ;;  %v717_v46 = vpop.f32.mrf.mxu2  ;;  %v772_v12 = vpop.f32.mrf.mxu3 }
  0xf8   :  { %205 = vst.msk [vmem:[%s2004_s6 + $0x30] sm:$0x1] %vm204_vm3, %v190_v10  ;;  %v718_v13 = vadd.f32 %v1512_v47, %v717_v46  ;;  %v773_v14 = vadd.f32 %v1512_v47, %v772_v12  ;;  %v163_v15 = vpop.f32.mrf.mxu0  ;;  %v664_v16 = vpop.f32.mrf.mxu1 }
  0xf9   :  { %965 = vst.msk [vmem:[%s2005_s7 + $0x50] sm:$0xf] %vm191_vm2, %v891_v11  ;;  %v665_v17 = vadd.f32 %v1512_v47, %v664_v16 }
  0xfa   :  { %v839_v18 = vmax.f32 %v718_v13, 0.0  ;;  %v861_v19 = vmax.f32 %v773_v14, 0.0 }
  0xfb   :  { %v818_v20 = vmax.f32 %v665_v17, 0.0 }
  0xfc   :  { %v913_v21 = vpack.c.bf16 %v839_v18, %v839_v18  ;;  %v935_v22 = vpack.c.bf16 %v861_v19, %v861_v19 }
  0xfd   :  { %v892_v23 = vpack.c.bf16 %v818_v20, %v818_v20 }
  0xfe   :  { %987 = vst.msk [vmem:[%s2005_s7 + $0xa8] sm:$0xf] %vm191_vm2, %v913_v21 }
  0xff   :  { %1009 = vst.msk [vmem:[%s2005_s7 + $0x100] sm:$0xf] %vm191_vm2, %v935_v22  ;;  %v719_v24 = vpop.f32.mrf.mxu2  ;;  %v774_v25 = vpop.f32.mrf.mxu3 }
 0x100   :  { %966 = vst.msk [vmem:[%s2005_s7 + $0x54] sm:$0xf] %vm191_vm2, %v892_v23  ;;  %v720_v26 = vadd.f32 %v1512_v47, %v719_v24  ;;  %v775_v27 = vadd.f32 %v1512_v47, %v774_v25  ;;  %v612_v28 = vpop.f32.mrf.mxu0  ;;  %v667_v29 = vpop.f32.mrf.mxu1 }
 0x101   :  { %v613_v30 = vadd.f32 %v1512_v47, %v612_v28  ;;  %v668_v31 = vadd.f32 %v1512_v47, %v667_v29 }
 0x102   :  { %v840_v32 = vmax.f32 %v720_v26, 0.0  ;;  %v862_v33 = vmax.f32 %v775_v27, 0.0 }
 0x103   :  { %v797_v34 = vmax.f32 %v613_v30, 0.0  ;;  %v819_v35 = vmax.f32 %v668_v31, 0.0 }
 0x104   :  { %v914_v36 = vpack.c.bf16 %v840_v32, %v840_v32  ;;  %v936_v37 = vpack.c.bf16 %v862_v33, %v862_v33 }
 0x105   :  { %v871_v38 = vpack.c.bf16 %v797_v34, %v797_v34  ;;  %v893_v39 = vpack.c.bf16 %v819_v35, %v819_v35 }
 0x106   :  { %988 = vst.msk [vmem:[%s2005_s7 + $0xac] sm:$0xf] %vm191_vm2, %v914_v36 }
 0x107   :  { %1010 = vst.msk [vmem:[%s2005_s7 + $0x104] sm:$0xf] %vm191_vm2, %v936_v37  ;;  %v722_v40 = vpop.f32.mrf.mxu2  ;;  %v777_v41 = vpop.f32.mrf.mxu3 }
 0x108   :  { %945 = vst.msk [vmem:[%s2005_s7] sm:$0xf] %vm191_vm2, %v871_v38  ;;  %v723_v42 = vadd.f32 %v1512_v47, %v722_v40  ;;  %v778_v43 = vadd.f32 %v1512_v47, %v777_v41  ;;  %v614_v44 = vpop.f32.mrf.mxu0  ;;  %v669_v45 = vpop.f32.mrf.mxu1 }
 0x109   :  { %967 = vst.msk [vmem:[%s2005_s7 + $0x58] sm:$0xf] %vm191_vm2, %v893_v39  ;;  %v615_v48 = vadd.f32 %v1512_v47, %v614_v44  ;;  %v670_v49 = vadd.f32 %v1512_v47, %v669_v45 }
 0x10a   :  { %v841_v50 = vmax.f32 %v723_v42, 0.0  ;;  %v863_v51 = vmax.f32 %v778_v43, 0.0 }
 0x10b   :  { %v798_v52 = vmax.f32 %v615_v48, 0.0  ;;  %v820_v53 = vmax.f32 %v670_v49, 0.0 }
 0x10c   :  { %v915_v54 = vpack.c.bf16 %v841_v50, %v841_v50  ;;  %v937_v55 = vpack.c.bf16 %v863_v51, %v863_v51 }
 0x10d   :  { %v872_v56 = vpack.c.bf16 %v798_v52, %v798_v52  ;;  %v894_v57 = vpack.c.bf16 %v820_v53, %v820_v53 }
 0x10e   :  { %989 = vst.msk [vmem:[%s2005_s7 + $0xb0] sm:$0xf] %vm191_vm2, %v915_v54 }
 0x10f   :  { %1011 = vst.msk [vmem:[%s2005_s7 + $0x108] sm:$0xf] %vm191_vm2, %v937_v55  ;;  %v724_v58 = vpop.f32.mrf.mxu2  ;;  %v779_v59 = vpop.f32.mrf.mxu3 }
 0x110   :  { %946 = vst.msk [vmem:[%s2005_s7 + $0x4] sm:$0xf] %vm191_vm2, %v872_v56  ;;  %v725_v60 = vadd.f32 %v1512_v47, %v724_v58  ;;  %v780_v61 = vadd.f32 %v1512_v47, %v779_v59  ;;  %v617_v62 = vpop.f32.mrf.mxu0  ;;  %v672_v63 = vpop.f32.mrf.mxu1 }
 0x111   :  { %968 = vst.msk [vmem:[%s2005_s7 + $0x5c] sm:$0xf] %vm191_vm2, %v894_v57  ;;  %v618_v0 = vadd.f32 %v1512_v47, %v617_v62  ;;  %v673_v1 = vadd.f32 %v1512_v47, %v672_v63 }
 0x112   :  { %v842_v2 = vmax.f32 %v725_v60, 0.0  ;;  %v864_v3 = vmax.f32 %v780_v61, 0.0 }
 0x113   :  { %v799_v4 = vmax.f32 %v618_v0, 0.0  ;;  %v821_v5 = vmax.f32 %v673_v1, 0.0 }
 0x114   :  { %v916_v6 = vpack.c.bf16 %v842_v2, %v842_v2  ;;  %v938_v7 = vpack.c.bf16 %v864_v3, %v864_v3 }
 0x115   :  { %v873_v8 = vpack.c.bf16 %v799_v4, %v799_v4  ;;  %v895_v9 = vpack.c.bf16 %v821_v5, %v821_v5 }
 0x116   :  { %990 = vst.msk [vmem:[%s2005_s7 + $0xb4] sm:$0xf] %vm191_vm2, %v916_v6 }
 0x117   :  { %1012 = vst.msk [vmem:[%s2005_s7 + $0x10c] sm:$0xf] %vm191_vm2, %v938_v7  ;;  %v727_v10 = vpop.f32.mrf.mxu2  ;;  %v782_v11 = vpop.f32.mrf.mxu3 }
 0x118   :  { %947 = vst.msk [vmem:[%s2005_s7 + $0x8] sm:$0xf] %vm191_vm2, %v873_v8  ;;  %v728_v46 = vadd.f32 %v1512_v47, %v727_v10  ;;  %v783_v12 = vadd.f32 %v1512_v47, %v782_v11  ;;  %v619_v13 = vpop.f32.mrf.mxu0  ;;  %v674_v14 = vpop.f32.mrf.mxu1 }
 0x119   :  { %969 = vst.msk [vmem:[%s2005_s7 + $0x60] sm:$0xf] %vm191_vm2, %v895_v9  ;;  %v620_v15 = vadd.f32 %v1512_v47, %v619_v13  ;;  %v675_v16 = vadd.f32 %v1512_v47, %v674_v14 }
 0x11a   :  { %v843_v17 = vmax.f32 %v728_v46, 0.0  ;;  %v865_v18 = vmax.f32 %v783_v12, 0.0 }
 0x11b   :  { %v800_v19 = vmax.f32 %v620_v15, 0.0  ;;  %v822_v20 = vmax.f32 %v675_v16, 0.0 }
 0x11c   :  { %v917_v21 = vpack.c.bf16 %v843_v17, %v843_v17  ;;  %v939_v22 = vpack.c.bf16 %v865_v18, %v865_v18 }
 0x11d   :  { %v874_v23 = vpack.c.bf16 %v800_v19, %v800_v19  ;;  %v896_v24 = vpack.c.bf16 %v822_v20, %v822_v20 }
 0x11e   :  { %991 = vst.msk [vmem:[%s2005_s7 + $0xb8] sm:$0xf] %vm191_vm2, %v917_v21 }
 0x11f   :  { %1013 = vst.msk [vmem:[%s2005_s7 + $0x110] sm:$0xf] %vm191_vm2, %v939_v22  ;;  %v729_v25 = vpop.f32.mrf.mxu2  ;;  %v784_v26 = vpop.f32.mrf.mxu3 }
 0x120   :  { %948 = vst.msk [vmem:[%s2005_s7 + $0xc] sm:$0xf] %vm191_vm2, %v874_v23  ;;  %v730_v27 = vadd.f32 %v1512_v47, %v729_v25  ;;  %v785_v28 = vadd.f32 %v1512_v47, %v784_v26  ;;  %v622_v29 = vpop.f32.mrf.mxu0  ;;  %v677_v30 = vpop.f32.mrf.mxu1 }
 0x121   :  { %970 = vst.msk [vmem:[%s2005_s7 + $0x64] sm:$0xf] %vm191_vm2, %v896_v24  ;;  %v623_v31 = vadd.f32 %v1512_v47, %v622_v29  ;;  %v678_v32 = vadd.f32 %v1512_v47, %v677_v30 }
 0x122   :  { %v844_v33 = vmax.f32 %v730_v27, 0.0  ;;  %v866_v34 = vmax.f32 %v785_v28, 0.0 }
 0x123   :  { %v801_v35 = vmax.f32 %v623_v31, 0.0  ;;  %v823_v36 = vmax.f32 %v678_v32, 0.0 }
 0x124   :  { %v918_v37 = vpack.c.bf16 %v844_v33, %v844_v33  ;;  %v940_v38 = vpack.c.bf16 %v866_v34, %v866_v34 }
 0x125   :  { %v875_v39 = vpack.c.bf16 %v801_v35, %v801_v35  ;;  %v897_v40 = vpack.c.bf16 %v823_v36, %v823_v36 }
 0x126   :  { %992 = vst.msk [vmem:[%s2005_s7 + $0xbc] sm:$0xf] %vm191_vm2, %v918_v37 }
 0x127   :  { %1014 = vst.msk [vmem:[%s2005_s7 + $0x114] sm:$0xf] %vm191_vm2, %v940_v38  ;;  %v732_v41 = vpop.f32.mrf.mxu2  ;;  %v787_v42 = vpop.f32.mrf.mxu3 }
 0x128   :  { %949 = vst.msk [vmem:[%s2005_s7 + $0x10] sm:$0xf] %vm191_vm2, %v875_v39  ;;  %v733_v43 = vadd.f32 %v1512_v47, %v732_v41  ;;  %v788_v44 = vadd.f32 %v1512_v47, %v787_v42  ;;  %v624_v45 = vpop.f32.mrf.mxu0  ;;  %v679_v48 = vpop.f32.mrf.mxu1 }
 0x129   :  { %971 = vst.msk [vmem:[%s2005_s7 + $0x68] sm:$0xf] %vm191_vm2, %v897_v40  ;;  %v625_v49 = vadd.f32 %v1512_v47, %v624_v45  ;;  %v680_v50 = vadd.f32 %v1512_v47, %v679_v48 }
 0x12a   :  { %v845_v51 = vmax.f32 %v733_v43, 0.0  ;;  %v867_v52 = vmax.f32 %v788_v44, 0.0 }
 0x12b   :  { %v802_v53 = vmax.f32 %v625_v49, 0.0  ;;  %v824_v54 = vmax.f32 %v680_v50, 0.0 }
 0x12c   :  { %v919_v55 = vpack.c.bf16 %v845_v51, %v845_v51  ;;  %v941_v56 = vpack.c.bf16 %v867_v52, %v867_v52 }
 0x12d   :  { %v876_v57 = vpack.c.bf16 %v802_v53, %v802_v53  ;;  %v898_v58 = vpack.c.bf16 %v824_v54, %v824_v54 }
 0x12e   :  { %993 = vst.msk [vmem:[%s2005_s7 + $0xc0] sm:$0xf] %vm191_vm2, %v919_v55 }
 0x12f   :  { %1015 = vst.msk [vmem:[%s2005_s7 + $0x118] sm:$0xf] %vm191_vm2, %v941_v56  ;;  %v734_v59 = vpop.f32.mrf.mxu2  ;;  %v789_v60 = vpop.f32.mrf.mxu3 }
 0x130   :  { %950 = vst.msk [vmem:[%s2005_s7 + $0x14] sm:$0xf] %vm191_vm2, %v876_v57  ;;  %v735_v61 = vadd.f32 %v1512_v47, %v734_v59  ;;  %v790_v62 = vadd.f32 %v1512_v47, %v789_v60  ;;  %v627_v63 = vpop.f32.mrf.mxu0  ;;  %v682_v0 = vpop.f32.mrf.mxu1 }
 0x131   :  { %972 = vst.msk [vmem:[%s2005_s7 + $0x6c] sm:$0xf] %vm191_vm2, %v898_v58  ;;  %v628_v1 = vadd.f32 %v1512_v47, %v627_v63  ;;  %v683_v2 = vadd.f32 %v1512_v47, %v682_v0 }
 0x132   :  { %v846_v3 = vmax.f32 %v735_v61, 0.0  ;;  %v868_v4 = vmax.f32 %v790_v62, 0.0 }
 0x133   :  { %v803_v5 = vmax.f32 %v628_v1, 0.0  ;;  %v825_v6 = vmax.f32 %v683_v2, 0.0 }
 0x134   :  { %v920_v7 = vpack.c.bf16 %v846_v3, %v846_v3  ;;  %v942_v8 = vpack.c.bf16 %v868_v4, %v868_v4 }
 0x135   :  { %v877_v9 = vpack.c.bf16 %v803_v5, %v803_v5  ;;  %v899_v10 = vpack.c.bf16 %v825_v6, %v825_v6 }
 0x136   :  { %994 = vst.msk [vmem:[%s2005_s7 + $0xc4] sm:$0xf] %vm191_vm2, %v920_v7 }
 0x137   :  { %1016 = vst.msk [vmem:[%s2005_s7 + $0x11c] sm:$0xf] %vm191_vm2, %v942_v8  ;;  %v737_v11 = vpop.f32.mrf.mxu2  ;;  %v792_v46 = vpop.f32.mrf.mxu3 }
 0x138   :  { %951 = vst.msk [vmem:[%s2005_s7 + $0x18] sm:$0xf] %vm191_vm2, %v877_v9  ;;  %v738_v12 = vadd.f32 %v1512_v47, %v737_v11  ;;  %v793_v13 = vadd.f32 %v1512_v47, %v792_v46  ;;  %v629_v14 = vpop.f32.mrf.mxu0  ;;  %v684_v15 = vpop.f32.mrf.mxu1 }
 0x139   :  { %973 = vst.msk [vmem:[%s2005_s7 + $0x70] sm:$0xf] %vm191_vm2, %v899_v10  ;;  %v630_v16 = vadd.f32 %v1512_v47, %v629_v14  ;;  %v685_v17 = vadd.f32 %v1512_v47, %v684_v15 }
 0x13a   :  { %v847_v18 = vmax.f32 %v738_v12, 0.0  ;;  %v869_v19 = vmax.f32 %v793_v13, 0.0 }
 0x13b   :  { %v804_v20 = vmax.f32 %v630_v16, 0.0  ;;  %v826_v21 = vmax.f32 %v685_v17, 0.0 }
 0x13c   :  { %v921_v22 = vpack.c.bf16 %v847_v18, %v847_v18  ;;  %v943_v23 = vpack.c.bf16 %v869_v19, %v869_v19 }
 0x13d   :  { %v878_v24 = vpack.c.bf16 %v804_v20, %v804_v20  ;;  %v900_v25 = vpack.c.bf16 %v826_v21, %v826_v21 }
 0x13e   :  { %995 = vst.msk [vmem:[%s2005_s7 + $0xc8] sm:$0xf] %vm191_vm2, %v921_v22 }
 0x13f   :  { %1017 = vst.msk [vmem:[%s2005_s7 + $0x120] sm:$0xf] %vm191_vm2, %v943_v23  ;;  %v739_v26 = vpop.f32.mrf.mxu2  ;;  %v794_v27 = vpop.f32.mrf.mxu3 }
 0x140   :  { %952 = vst.msk [vmem:[%s2005_s7 + $0x1c] sm:$0xf] %vm191_vm2, %v878_v24  ;;  %v740_v28 = vadd.f32 %v1512_v47, %v739_v26  ;;  %v795_v29 = vadd.f32 %v1512_v47, %v794_v27 }
 0x141   :  { %974 = vst.msk [vmem:[%s2005_s7 + $0x74] sm:$0xf] %vm191_vm2, %v900_v25 }
 0x142   :  { %v848_v30 = vmax.f32 %v740_v28, 0.0  ;;  %v870_v31 = vmax.f32 %v795_v29, 0.0 }
 0x144   :  { %v922_v32 = vpack.c.bf16 %v848_v30, %v848_v30  ;;  %v944_v33 = vpack.c.bf16 %v870_v31, %v870_v31 }
 0x146   :  { %996 = vst.msk [vmem:[%s2005_s7 + $0xcc] sm:$0xf] %vm191_vm2, %v922_v32 }
 0x147   :  { %1019 = vst.msk [vmem:[%s2005_s7 + $0x124] sm:$0x3] %vm1018_vm4, %v944_v33 }

// kernel: i2a_forward.11
= control target key start
LH: loop header
LB: loop body
LE: loop exit
PB: predicated region body
PF: predicated region fallthrough
CT: control target
= control target key end

     0   :  { %vm84_vm0 = vcmask 1043456   ;;  %vm77_vm1 = vcmask 588800   ;;  %vm112_vm2 = vcmask 125952   ;;  %vm115_vm3 = vcmask 122880   ;;  %s623_s4 = inlined_call_operand.vmem [shape: bf16[72,16], index: 4, kind: input, shape index: {}]   ;;  %s624_s1 = inlined_call_operand.vmem [shape: bf16[72,16], index: 1, kind: input, shape index: {}]   ;;  %s625_s5 = inlined_call_operand.vmem [shape: f32[1,16], index: 5, kind: input, shape index: {}]   ;;  %s626_s3 = inlined_call_operand.vmem [shape: bf16[108,72], index: 3, kind: input, shape index: {}]   ;;  %s627_s0 = inlined_call_operand.vmem [shape: bf16[18,72], index: 0, kind: input, shape index: {}]   ;;  %s628_s2 = inlined_call_operand.vmem [shape: f32[1,16], index: 2, kind: input, shape index: {}]   ;;  %s629_s6 = inlined_call_operand.vmem [shape: bf16[18,16], index: 6, kind: output, shape index: {0}]   ;;  %s630_s7 = inlined_call_operand.vmem [shape: bf16[108,16], index: 7, kind: output, shape index: {1}]  }
   0x1   :  { %v139_v0 = vld [vmem:[%s623_s4 + $0x20] sm:$0xf]  ;;  %v413_v7 = vld [vmem:[%s623_s4 + $0x18] sm:$0xff]  ;;  %v412_v10 = vld [vmem:[%s623_s4 + $0x10] sm:$0xff]  ;;  %vm315_vm4 = vcmask 123904  }
   0x2   :  { %v196_v1 = vunpack.c.l.b16 %v139_v0  ;;  %v37_v2 = vld [vmem:[%s624_s1 + $0x20] sm:$0xf]  ;;  %v402_v9 = vld [vmem:[%s624_s1 + $0x18] sm:$0xff]  ;;  %v401_v11 = vld [vmem:[%s624_s1 + $0x10] sm:$0xff] }
   0x3   :  { %v67_v4 = vunpack.c.l.b16 %v37_v2  ;;  %v411_v12 = vld [vmem:[%s623_s4 + $0x8] sm:$0xff]  ;;  %v410_v14 = vld [vmem:[%s623_s4] sm:$0xff]  ;;  %v405_v16 = vld [vmem:[%s626_s3 + $0x10] sm:$0xff] }
   0x4   :  { %v201_v3 = vpack.c.b16 %v196_v1, %v196_v1  ;;  %v400_v13 = vld [vmem:[%s624_s1 + $0x8] sm:$0xff]  ;;  %v399_v15 = vld [vmem:[%s624_s1] sm:$0xff]  ;;  %v373_v21 = vld [vmem:[%s626_s3 + $0x30] sm:$0xf] }
   0x5   :  { %v72_v6 = vpack.c.b16 %v67_v4, %v67_v4  ;;  %v408_v17 = vld [vmem:[%s626_s3 + $0x28] sm:$0xff]  ;;  %v403_v18 = vld [vmem:[%s626_s3] sm:$0xff]  ;;  %v409_v22 = vld [vmem:[%s626_s3 + $0x30] sm:$0x30] }
   0x6   :  { %v228_v5 = vsel %vm84_vm0, %v201_v3, 0  ;;  %v398_v19 = vld [vmem:[%s627_s0] sm:$0xff]  ;;  %v28_v20 = vld [vmem:[%s627_s0 + $0x8] sm:$0x1]  ;;  %v406_v24 = vld [vmem:[%s626_s3 + $0x18] sm:$0xff]  ;;  %v374_v25 = vor.u32 %v409_v22, %v373_v21 }
   0x7   :  { %414 = vmatpush.bf16.msra.mxu2 %v228_v5  ;;  %415 = vmatpush.bf16.msra.mxu3 %v228_v5  ;;  %v86_v8 = vsel %vm84_vm0, %v72_v6, 0  ;;  %v47_v23 = vunpack.c.l.b16 %v28_v20  ;;  %v404_v26 = vld [vmem:[%s626_s3 + $0x8] sm:$0xff]  ;;  %v407_v28 = vld [vmem:[%s626_s3 + $0x20] sm:$0xff] }
   0x8   :  { %233 = vmatpush.bf16.msra.mxu1 %v228_v5  ;;  %91 = vmatpush.bf16.msra.mxu0 %v86_v8  ;;  %v425_v29 = vld [vmem:[%s628_s2] ss:$0 sm:$0xff] }
   0x9   :  { %v49_v27 = vpack.c.b16 %v47_v23, %v47_v23  ;;  %v541_v30 = vld [vmem:[%s625_s5] ss:$0 sm:$0xff] }
   0xb   :  { %416 = vmatpush.bf16.msra.mxu2 %v413_v7  ;;  %417 = vmatpush.bf16.msra.mxu3 %v413_v7 }
   0xc   :  { %234 = vmatpush.bf16.msra.mxu1 %v413_v7  ;;  %92 = vmatpush.bf16.msra.mxu0 %v402_v9 }
   0xf   :  { %418 = vmatpush.bf16.msra.mxu2 %v412_v10  ;;  %419 = vmatpush.bf16.msra.mxu3 %v412_v10 }
  0x10   :  { %235 = vmatpush.bf16.msra.mxu1 %v412_v10  ;;  %93 = vmatpush.bf16.msra.mxu0 %v401_v11 }
  0x13   :  { %420 = vmatpush.bf16.msra.mxu2 %v411_v12  ;;  %421 = vmatpush.bf16.msra.mxu3 %v411_v12 }
  0x14   :  { %236 = vmatpush.bf16.msra.mxu1 %v411_v12  ;;  %94 = vmatpush.bf16.msra.mxu0 %v400_v13 }
  0x17   :  { %422 = vmatpush.bf16.msra.mxu2 %v410_v14  ;;  %423 = vmatpush.bf16.msra.mxu3 %v410_v14 }
  0x18   :  { %237 = vmatpush.bf16.msra.mxu1 %v410_v14  ;;  %95 = vmatpush.bf16.msra.mxu0 %v399_v15 }
  0x1a   :  { %393 = vmatmul.msk.bf16.vlgmr.msra.gmra.mxu2 %vm77_vm1, %v405_v16  ;;  %396 = vmatmul.msk.bf16.vlgmr.msra.gmra.mxu3 %vm77_vm1, %v408_v17 }
  0x1b   :  { %391 = vmatmul.msk.bf16.vlgmr.msra.gmra.mxu1 %vm77_vm1, %v403_v18  ;;  %345 = vmatmul.msk.bf16.vlgmr.msra.gmra.mxu0 %vm77_vm1, %v398_v19 }
  0x2a   :  { %394 = vmatmul.msk.bf16.gmra.mxu2 %vm77_vm1, %v406_v24  ;;  %397 = vmatmul.msk.bf16.gmra.mxu3 %vm77_vm1, %v374_v25 }
  0x2b   :  { %392 = vmatmul.msk.bf16.gmra.mxu1 %vm77_vm1, %v404_v26  ;;  %346 = vmatmul.msk.bf16.gmra.mxu0 %vm77_vm1, %v49_v27 }
  0x3a   :  { %395 = vmatmul.msk.bf16.gmra.mxu2 %vm77_vm1, %v407_v28 }
  0x98   :  { %v239_v31 = vpop.f32.mrf.mxu1  ;;  %v97_v33 = vpop.f32.mrf.mxu0 }
  0x99   :  { %v240_v32 = vadd.f32 %v541_v30, %v239_v31  ;;  %v98_v34 = vadd.f32 %v425_v29, %v97_v33 }
  0x9b   :  { %v274_v35 = vmax.f32 %v240_v32, 0.0  ;;  %v106_v36 = vmax.f32 %v98_v34, 0.0 }
  0x9d   :  { %v249_v37 = vpop.f32.mrf.mxu2  ;;  %v288_v38 = vpack.c.bf16 %v274_v35, %v274_v35  ;;  %v264_v39 = vpop.f32.mrf.mxu3  ;;  %v109_v42 = vpack.c.bf16 %v106_v36, %v106_v36 }
  0x9e   :  { %v250_v40 = vadd.f32 %v541_v30, %v249_v37  ;;  %v265_v41 = vadd.f32 %v541_v30, %v264_v39 }
  0x9f   :  { %302 = vst.msk [vmem:[%s630_s7] sm:$0xf] %vm112_vm2, %v288_v38 }
  0xa0   :  { %v278_v43 = vmax.f32 %v250_v40, 0.0  ;;  %v284_v44 = vmax.f32 %v265_v41, 0.0  ;;  %113 = vst.msk [vmem:[%s629_s6] sm:$0xf] %vm112_vm2, %v109_v42  ;;  %v241_v45 = vpop.f32.mrf.mxu1  ;;  %v99_v47 = vpop.f32.mrf.mxu0 }
  0xa1   :  { %v242_v46 = vadd.f32 %v541_v30, %v241_v45  ;;  %v100_v50 = vadd.f32 %v425_v29, %v99_v47 }
  0xa2   :  { %v292_v48 = vpack.c.bf16 %v278_v43, %v278_v43  ;;  %v298_v49 = vpack.c.bf16 %v284_v44, %v284_v44 }
  0xa3   :  { %v275_v51 = vmax.f32 %v242_v46, 0.0  ;;  %v107_v52 = vmax.f32 %v100_v50, 0.0 }
  0xa4   :  { %306 = vst.msk [vmem:[%s630_s7 + $0x10] sm:$0xf] %vm112_vm2, %v292_v48 }
  0xa5   :  { %v251_v53 = vpop.f32.mrf.mxu2  ;;  %312 = vst.msk [vmem:[%s630_s7 + $0x28] sm:$0xf] %vm112_vm2, %v298_v49  ;;  %v289_v54 = vpack.c.bf16 %v275_v51, %v275_v51  ;;  %v266_v55 = vpop.f32.mrf.mxu3  ;;  %v110_v58 = vpack.c.bf16 %v107_v52, %v107_v52 }
  0xa6   :  { %v252_v56 = vadd.f32 %v541_v30, %v251_v53  ;;  %v267_v57 = vadd.f32 %v541_v30, %v266_v55 }
  0xa7   :  { %303 = vst.msk [vmem:[%s630_s7 + $0x4] sm:$0xf] %vm112_vm2, %v289_v54 }
  0xa8   :  { %v279_v59 = vmax.f32 %v252_v56, 0.0  ;;  %v285_v60 = vmax.f32 %v267_v57, 0.0  ;;  %114 = vst.msk [vmem:[%s629_s6 + $0x4] sm:$0xf] %vm112_vm2, %v110_v58  ;;  %v244_v61 = vpop.f32.mrf.mxu1  ;;  %v102_v63 = vpop.f32.mrf.mxu0 }
  0xa9   :  { %v245_v62 = vadd.f32 %v541_v30, %v244_v61  ;;  %v103_v2 = vadd.f32 %v425_v29, %v102_v63 }
  0xaa   :  { %v293_v0 = vpack.c.bf16 %v279_v59, %v279_v59  ;;  %v299_v1 = vpack.c.bf16 %v285_v60, %v285_v60 }
  0xab   :  { %v276_v3 = vmax.f32 %v245_v62, 0.0  ;;  %v108_v4 = vmax.f32 %v103_v2, 0.0 }
  0xac   :  { %307 = vst.msk [vmem:[%s630_s7 + $0x14] sm:$0xf] %vm112_vm2, %v293_v0 }
  0xad   :  { %v254_v5 = vpop.f32.mrf.mxu2  ;;  %313 = vst.msk [vmem:[%s630_s7 + $0x2c] sm:$0xf] %vm112_vm2, %v299_v1  ;;  %v290_v6 = vpack.c.bf16 %v276_v3, %v276_v3  ;;  %v269_v7 = vpop.f32.mrf.mxu3  ;;  %v111_v10 = vpack.c.bf16 %v108_v4, %v108_v4 }
  0xae   :  { %v255_v8 = vadd.f32 %v541_v30, %v254_v5  ;;  %v270_v9 = vadd.f32 %v541_v30, %v269_v7 }
  0xaf   :  { %304 = vst.msk [vmem:[%s630_s7 + $0x8] sm:$0xf] %vm112_vm2, %v290_v6 }
  0xb0   :  { %v280_v11 = vmax.f32 %v255_v8, 0.0  ;;  %v286_v12 = vmax.f32 %v270_v9, 0.0  ;;  %116 = vst.msk [vmem:[%s629_s6 + $0x8] sm:$0x1] %vm115_vm3, %v111_v10  ;;  %v246_v13 = vpop.f32.mrf.mxu1  ;;  %v104_v15 = vpop.f32.mrf.mxu0 }
  0xb1   :  { %v247_v14 = vadd.f32 %v541_v30, %v246_v13 }
  0xb2   :  { %v294_v16 = vpack.c.bf16 %v280_v11, %v280_v11  ;;  %v300_v17 = vpack.c.bf16 %v286_v12, %v286_v12 }
  0xb3   :  { %v277_v18 = vmax.f32 %v247_v14, 0.0 }
  0xb4   :  { %308 = vst.msk [vmem:[%s630_s7 + $0x18] sm:$0xf] %vm112_vm2, %v294_v16 }
  0xb5   :  { %v256_v19 = vpop.f32.mrf.mxu2  ;;  %314 = vst.msk [vmem:[%s630_s7 + $0x30] sm:$0xf] %vm112_vm2, %v300_v17  ;;  %v291_v20 = vpack.c.bf16 %v277_v18, %v277_v18  ;;  %v271_v21 = vpop.f32.mrf.mxu3 }
  0xb6   :  { %v257_v22 = vadd.f32 %v541_v30, %v256_v19  ;;  %v272_v23 = vadd.f32 %v541_v30, %v271_v21 }
  0xb7   :  { %305 = vst.msk [vmem:[%s630_s7 + $0xc] sm:$0xf] %vm112_vm2, %v291_v20 }
  0xb8   :  { %v281_v24 = vmax.f32 %v257_v22, 0.0  ;;  %v287_v25 = vmax.f32 %v272_v23, 0.0 }
  0xba   :  { %v295_v26 = vpack.c.bf16 %v281_v24, %v281_v24  ;;  %v301_v27 = vpack.c.bf16 %v287_v25, %v287_v25 }
  0xbc   :  { %309 = vst.msk [vmem:[%s630_s7 + $0x1c] sm:$0xf] %vm112_vm2, %v295_v26 }
  0xbd   :  { %v259_v28 = vpop.f32.mrf.mxu2  ;;  %316 = vst.msk [vmem:[%s630_s7 + $0x34] sm:$0x3] %vm315_vm4, %v301_v27 }
  0xbe   :  { %v260_v29 = vadd.f32 %v541_v30, %v259_v28 }
  0xc0   :  { %v282_v31 = vmax.f32 %v260_v29, 0.0 }
  0xc2   :  { %v296_v32 = vpack.c.bf16 %v282_v31, %v282_v31 }
  0xc4   :  { %310 = vst.msk [vmem:[%s630_s7 + $0x20] sm:$0xf] %vm112_vm2, %v296_v32 }
  0xc5   :  { %v261_v33 = vpop.f32.mrf.mxu2 }
  0xc6   :  { %v262_v34 = vadd.f32 %v541_v30, %v261_v33 }
  0xc8   :  { %v283_v35 = vmax.f32 %v262_v34, 0.0 }
  0xca   :  { %v297_v36 = vpack.c.bf16 %v283_v35, %v283_v35 }
  0xcc   :  { %311 = vst.msk [vmem:[%s630_s7 + $0x24] sm:$0xf] %vm112_vm2, %v297_v36 }

// kernel: i2a_forward.12
= control target key start
LH: loop header
LB: loop body
LE: loop exit
PB: predicated region body
PF: predicated region fallthrough
CT: control target
= control target key end

     0   :  { %vm143_vm0 = vcmask 1040384   ;;  %v406_v5 = vmov 0   ;;  %vm139_vm1 = vcmask 138240   ;;  %v18_v35 = vlaneseq  ;;  %s504_s1 = inlined_call_operand.vmem [shape: bf16[145,128], index: 1, kind: input, shape index: {}]   ;;  %s505_s2 = inlined_call_operand.vmem [shape: bf16[32,128], index: 2, kind: input, shape index: {}]   ;;  %s506_s0 = inlined_call_operand.vmem [shape: bf16[2,6,145], index: 0, kind: input, shape index: {}]   ;;  %s507_s3 = inlined_call_operand.vmem [shape: f32[1,128], index: 3, kind: input, shape index: {}]   ;;  %s508_s4 = inlined_call_operand.vmem [shape: bf16[6,32], index: 4, kind: output, shape index: {}]  }
   0x1   :  { %v382_v0 = vld [vmem:[%s504_s1 + $0x38] sm:$0xff]  ;;  %v385_v1 = vld [vmem:[%s505_s2 + $0x8] sm:$0xff]  ;;  %v381_v3 = vld [vmem:[%s504_s1 + $0x30] sm:$0xff]  ;;  %v145_v6 = vsel %vm143_vm0, 65535, %v406_v5  ;;  %vm59_vm9 = vcmask 261120   ;;  %vm319_vm14 = vcmask 256000  }
   0x2   :  { %v42_v2 = vld [vmem:[%s504_s1 + $0x48] sm:$0x1]  ;;  %149 = vmatpush.bf16.msra.mxu1 %v382_v0  ;;  %249 = vmatpush.bf16.msra.mxu0 %v382_v0  ;;  %v384_v7 = vld [vmem:[%s505_s2] sm:$0xff]  ;;  %v378_v16 = vld [vmem:[%s504_s1 + $0x18] sm:$0xff]  ;;  %v19_v37 = vand.u32 127, %v18_v35 }
   0x3   :  { %v119_v4 = vunpack.c.l.b16 %v42_v2  ;;  %69 = vmatpush.bf16.msra.mxu3 %v385_v1  ;;  %v23_v9 = vld [vmem:[%s506_s0] sm:$0x77]  ;;  %v380_v10 = vld [vmem:[%s504_s1 + $0x28] sm:$0xff]  ;;  %v377_v17 = vld [vmem:[%s504_s1 + $0x10] sm:$0xff] }
   0x4   :  { %v78_v12 = vunpack.c.h.b16 %v23_v9  ;;  %v383_v13 = vld [vmem:[%s504_s1 + $0x40] sm:$0xff]  ;;  %v376_v18 = vld [vmem:[%s504_s1 + $0x8] sm:$0xff]  ;;  %v77_v19 = vunpack.c.l.b16 %v23_v9  ;;  %vm20_vm2 = vcmp.ge.s32.totalorder %v19_v37, 64  ;;  %vm21_vm3 = vcmp.lt.s32.totalorder %v19_v37, 96 }
   0x5   :  { %v129_v8 = vpack.c.b16 %v119_v4, %v119_v4  ;;  %v379_v14 = vld [vmem:[%s504_s1 + $0x20] sm:$0xff]  ;;  %vm480_vm5 = vmand %vm20_vm2, %vm21_vm3  ;;  %v371_v56 = vld [vmem:[%s506_s0 + $0x8] sm:$0x77] }
   0x6   :  { %150 = vmatpush.bf16.msra.mxu1 %v381_v3  ;;  %250 = vmatpush.bf16.msra.mxu0 %v381_v3  ;;  %v80_v15 = vpack.c.b16 %v78_v12, %v78_v12  ;;  %v375_v20 = vld [vmem:[%s504_s1] sm:$0xff]  ;;  %v79_v21 = vpack.c.b16 %v77_v19, %v77_v19  ;;  %s407_s1 = smov 64   ;;  %v242_v57 = vunpack.c.h.b16 %v371_v56  ;;  %v241_v58 = vunpack.c.l.b16 %v371_v56 }
   0x7   :  { %v147_v11 = vand.u32 %v145_v6, %v129_v8  ;;  %70 = vmatpush.bf16.msra.mxu3 %v384_v7  ;;  %v477_v28 = vld [vmem:[%s507_s3] ss:$0 sm:$0xff]  ;;  %s408_s3 = smov 32  }
   0x8   :  { %v244_v59 = vpack.c.b16 %v242_v57, %v242_v57  ;;  %v243_v60 = vpack.c.b16 %v241_v58, %v241_v58 }
   0x9   :  { %168 = vmatpush.bf16.msra.mxu2 %v147_v11 }
   0xa   :  { %151 = vmatpush.bf16.msra.mxu1 %v380_v10  ;;  %71 = vmatmul.bf16.vlgmr.msra.gmra.mxu3 %v406_v5 }
   0xb   :  { %233 = vmatpush.bf16.msrb.mxu3 %v385_v1  ;;  %251 = vmatpush.bf16.msra.mxu0 %v380_v10 }
   0xd   :  { %169 = vmatpush.bf16.msra.mxu2 %v383_v13 }
   0xe   :  { %152 = vmatpush.bf16.msra.mxu1 %v379_v14 }
   0xf   :  { %234 = vmatpush.bf16.msrb.mxu3 %v384_v7  ;;  %252 = vmatpush.bf16.msra.mxu0 %v379_v14 }
  0x10   :  { %369 = vmatmul.msk.bf16.vlgmr.msra.gmra.mxu2 %vm139_vm1, %v80_v15 }
  0x11   :  { %268 = vmatpush.bf16.msrb.mxu2 %v147_v11 }
  0x12   :  { %153 = vmatpush.bf16.msra.mxu1 %v378_v16 }
  0x13   :  { %253 = vmatpush.bf16.msra.mxu0 %v378_v16 }
  0x15   :  { %269 = vmatpush.bf16.msrb.mxu2 %v383_v13 }
  0x16   :  { %154 = vmatpush.bf16.msra.mxu1 %v377_v17 }
  0x17   :  { %254 = vmatpush.bf16.msra.mxu0 %v377_v17 }
  0x1a   :  { %155 = vmatpush.bf16.msra.mxu1 %v376_v18 }
  0x1b   :  { %255 = vmatpush.bf16.msra.mxu0 %v376_v18 }
  0x1e   :  { %156 = vmatpush.bf16.msra.mxu1 %v375_v20 }
  0x1f   :  { %256 = vmatpush.bf16.msra.mxu0 %v375_v20 }
  0x20   :  { %373 = vmatmul.msk.bf16.vlgmr.msrb.gmra.mxu2 %vm139_vm1, %v244_v59 }
  0x21   :  { %157 = vmatmul.bf16.vlgmr.msra.gmra.mxu1 %v79_v21 }
  0x22   :  { %257 = vmatmul.bf16.vlgmr.msra.gmra.mxu0 %v243_v60 }
  0x8d   :  { %v72_v22 = vpop.f32.mrf.mxu3 }
  0x93   :  { %v171_v23 = vpop.f32.mrf.mxu2 }
  0x95   :  { %v74_v24 = vpop.f32.mrf.mxu3 }
  0x9b   :  { %v173_v25 = vpop.f32.mrf.mxu2 }
  0x9e   :  { %v158_v26 = vpop.f32.mrf.mxu1 }
  0x9f   :  { %v159_v27 = vadd.f32 %v158_v26, %v72_v22  ;;  %v258_v0 = vpop.f32.mrf.mxu0 }
  0xa1   :  { %v172_v29 = vadd.f32 %v171_v23, %v159_v27 }
  0xa3   :  { %v179_v30 = vadd.f32 %v477_v28, %v172_v29  ;;  %v271_v1 = vpop.f32.mrf.mxu2 }
  0xa5   :  { %v370_v31 = vmul.f32 -1.442695, %v179_v30 }
  0xa6   :  { %v160_v32 = vpop.f32.mrf.mxu1 }
  0xa7   :  { %390 = vpow2.f32 %v370_v31  ;;  %v260_v2 = vpop.f32.mrf.mxu0 }
  0xab   :  { %v273_v3 = vpop.f32.mrf.mxu2 }
  0xad   :  { %v391_v33 = vpop.eup %390 }
  0xae   :  { %v184_v34 = vadd.f32 1.0, %v391_v33 }
  0xb0   :  { %392 = vrcp.f32 %v184_v34  ;;  %v196_v40 = vand.u32 2147483648, %v184_v34  ;;  %v194_v42 = vand.u32 2147483647, %v184_v34  ;;  %vm190_vm6 = vweird.f32 %v184_v34 }
  0xb1   :  { %394 = vtanh.f32 %v179_v30 }
  0xb2   :  { %v197_v45 = vor.u32 1.1754944e-38, %v196_v40  ;;  %vm195_vm8 = vcmp.eq.f32.partialorder %v194_v42, 8.507059e+37 }
  0xb6   :  { %v393_v36 = vpop.eup %392 }
  0xb7   :  { %v186_v38 = vmul.f32 %v393_v36, %v184_v34  ;;  %vm191_vm4 = vweird.f32 %v393_v36  ;;  %v395_v47 = vpop.eup %394 }
  0xb8   :  { %vm192_vm7 = vmor %vm190_vm6, %vm191_vm4 }
  0xb9   :  { %v187_v39 = vsub.f32 1.0, %v186_v38 }
  0xbb   :  { %v188_v41 = vmul.f32 %v393_v36, %v187_v39 }
  0xbd   :  { %v189_v44 = vadd.f32 %v393_v36, %v188_v41 }
  0xbf   :  { %v193_v46 = vsel %vm192_vm7, %v393_v36, %v189_v44 }
  0xc0   :  { %v198_v48 = vsel %vm195_vm8, %v197_v45, %v193_v46 }
  0xc1   :  { %v200_v49 = vsel %vm480_vm5, %v395_v47, %v198_v48 }
  0xc2   :  { %203 = vrot.lane.b32.xlu0 %v200_v49, %s407_s1  ;;  %v201_v52 = vmul.f32 0.0, %v200_v49 }
 0x134   :  { %v204_v50 = vpop.permute.xlu0 %203 }
 0x135   :  { %v206_v51 = vmul.f32 %v204_v50, %v200_v49 }
 0x137   :  { %208 = vrot.lane.b32.xlu0 %v206_v51, %s408_s3 }
 0x1a9   :  { %v209_v53 = vpop.permute.xlu0 %208 }
 0x1aa   :  { %v211_v54 = vadd.f32 %v209_v53, %v201_v52 }
 0x1ac   :  { %396 = vtanh.f32 %v211_v54 }
 0x1b2   :  { %v397_v55 = vpop.eup %396 }
 0x1b3   :  { %214 = vrot.lane.b32.xlu1 %v397_v55, %s407_s1 }
 0x225   :  { %v215_v61 = vpop.permute.xlu1 %214 }
 0x226   :  { %v217_v62 = vmul.f32 %v215_v61, %v200_v49 }
 0x228   :  { %v220_v63 = vpack.c.bf16 %v217_v62, %v217_v62 }
 0x22a   :  { %222 = vrot.lane.b32.xlu1 %v220_v63, %s408_s3 }
 0x29c   :  { %v223_v4 = vpop.permute.xlu1 %222 }
 0x29d   :  { %372 = vmatmul.msk.bf16.vlgmr.msrb.gmra.mxu3 %vm59_vm9, %v223_v4 }
 0x320   :  { %v236_v5 = vpop.f32.mrf.mxu3 }
 0x321   :  { %v259_v6 = vadd.f32 %v258_v0, %v236_v5 }
 0x323   :  { %v272_v7 = vadd.f32 %v271_v1, %v259_v6 }
 0x325   :  { %v275_v8 = vadd.f32 %v477_v28, %v272_v7 }
 0x327   :  { %v374_v9 = vmul.f32 -1.442695, %v275_v8 }
 0x328   :  { %v238_v10 = vpop.f32.mrf.mxu3 }
 0x329   :  { %398 = vpow2.f32 %v374_v9 }
 0x32f   :  { %v399_v11 = vpop.eup %398 }
 0x330   :  { %v280_v12 = vadd.f32 1.0, %v399_v11 }
 0x332   :  { %400 = vrcp.f32 %v280_v12  ;;  %v292_v16 = vand.u32 2147483648, %v280_v12  ;;  %v290_v18 = vand.u32 2147483647, %v280_v12  ;;  %vm286_vm11 = vweird.f32 %v280_v12 }
 0x333   :  { %402 = vtanh.f32 %v275_v8 }
 0x334   :  { %v293_v20 = vor.u32 1.1754944e-38, %v292_v16  ;;  %vm291_vm13 = vcmp.eq.f32.partialorder %v290_v18, 8.507059e+37 }
 0x338   :  { %v401_v13 = vpop.eup %400 }
 0x339   :  { %v282_v14 = vmul.f32 %v401_v13, %v280_v12  ;;  %vm287_vm10 = vweird.f32 %v401_v13  ;;  %v403_v22 = vpop.eup %402 }
 0x33a   :  { %vm288_vm12 = vmor %vm286_vm11, %vm287_vm10 }
 0x33b   :  { %v283_v15 = vsub.f32 1.0, %v282_v14 }
 0x33d   :  { %v284_v17 = vmul.f32 %v401_v13, %v283_v15 }
 0x33f   :  { %v285_v19 = vadd.f32 %v401_v13, %v284_v17 }
 0x341   :  { %v289_v21 = vsel %vm288_vm12, %v401_v13, %v285_v19 }
 0x342   :  { %v294_v23 = vsel %vm291_vm13, %v293_v20, %v289_v21 }
 0x343   :  { %v296_v24 = vsel %vm480_vm5, %v403_v22, %v294_v23 }
 0x344   :  { %299 = vrot.lane.b32.xlu2 %v296_v24, %s407_s1  ;;  %v297_v27 = vmul.f32 %v296_v24, %v211_v54 }
 0x39e   :  { %v300_v25 = vpop.permute.xlu2 %299 }
 0x39f   :  { %v302_v26 = vmul.f32 %v300_v25, %v296_v24 }
 0x3a1   :  { %304 = vrot.lane.b32.xlu2 %v302_v26, %s408_s3 }
 0x3fb   :  { %v305_v28 = vpop.permute.xlu2 %304 }
 0x3fc   :  { %v307_v29 = vadd.f32 %v305_v28, %v297_v27 }
 0x3fe   :  { %404 = vtanh.f32 %v307_v29 }
 0x404   :  { %v405_v30 = vpop.eup %404 }
 0x405   :  { %310 = vrot.lane.b32.xlu0 %v405_v30, %s407_s1 }
 0x477   :  { %v311_v31 = vpop.permute.xlu0 %310 }
 0x478   :  { %v313_v32 = vmul.f32 %v311_v31, %v296_v24 }
 0x47a   :  { %v314_v33 = vpack.c.bf16 %v313_v32, %v313_v32 }
 0x47c   :  { %316 = vrot.lane.b32.xlu1 %v314_v33, %s408_s3 }
 0x4ee   :  { %v317_v34 = vpop.permute.xlu1 %316 }
 0x4ef   :  { %320 = vst.msk [vmem:[%s508_s4] sm:$0x7] %vm319_vm14, %v317_v34 }

// kernel: i2a_forward.13
= control target key start
LH: loop header
LB: loop body
LE: loop exit
PB: predicated region body
PF: predicated region fallthrough
CT: control target
= control target key end

     0   :  { %s541_s0 = inlined_call_operand.vmem [shape: bf16[2,144], index: 0, kind: input, shape index: {}]   ;;  %s542_s1 = inlined_call_operand.vmem [shape: bf16[2,96], index: 1, kind: input, shape index: {}]   ;;  %s543_s2 = inlined_call_operand.vmem [shape: bf16[144,64], index: 2, kind: input, shape index: {}]   ;;  %s544_s3 = inlined_call_operand.vmem [shape: bf16[96,64], index: 3, kind: input, shape index: {}]   ;;  %s545_s4 = inlined_call_operand.vmem [shape: f32[1,64], index: 4, kind: input, shape index: {}]   ;;  %s546_s5 = inlined_call_operand.vmem [shape: bf16[64,4], index: 5, kind: input, shape index: {}]   ;;  %s547_s6 = inlined_call_operand.vmem [shape: f32[1,4], index: 6, kind: input, shape index: {}]   ;;  %s548_s7 = inlined_call_operand.hbm [shape: f32[2,3], index: 7, kind: output, shape index: {0}]   ;;  %s549_s8 = inlined_call_operand.vmem [shape: f32[2,1], index: 8, kind: output, shape index: {1}]  }
   0x1   :  { %v384_v0 = vld [vmem:[%s544_s3 + $0x28] sm:$0xff]  ;;  %v377_v1 = vld [vmem:[%s543_s2 + $0x38] sm:$0xff]  ;;  %v383_v2 = vld [vmem:[%s544_s3 + $0x20] sm:$0xff] }
   0x2   :  { %104 = vmatpush.bf16.msra.mxu0 %v384_v0  ;;  %177 = vmatpush.bf16.msra.mxu1 %v377_v1  ;;  %v376_v3 = vld [vmem:[%s543_s2 + $0x30] sm:$0xff]  ;;  %v378_v4 = vld [vmem:[%s543_s2 + $0x40] sm:$0xff]  ;;  %v382_v6 = vld [vmem:[%s544_s3 + $0x18] sm:$0xff] }
   0x3   :  { %v30_v5 = vld [vmem:[%s541_s0] sm:$0x3]  ;;  %197 = vmatpush.bf16.msra.mxu2 %v378_v4  ;;  %v375_v7 = vld [vmem:[%s543_s2 + $0x28] sm:$0xff] }
   0x4   :  { %116 = vst [vmem:[#allocation1] ss:$9 sm:$0xff] %v30_v5 }
   0x6   :  { %105 = vmatpush.bf16.msra.mxu0 %v383_v2  ;;  %178 = vmatpush.bf16.msra.mxu1 %v376_v3 }
   0x7   :  { %14 = vsyncpa [#allocation3], 0  ;;  %vm174_vm0 = vcmask 130048   ;;  %v381_v8 = vld [vmem:[%s544_s3 + $0x10] sm:$0xff]  ;;  %v374_v9 = vld [vmem:[%s543_s2 + $0x20] sm:$0xff]  ;;  %vm98_vm1 = vcmask 785408  }
   0x8   :  { %v380_v11 = vld [vmem:[%s544_s3 + $0x8] sm:$0xff]  ;;  %v373_v12 = vld [vmem:[%s543_s2 + $0x18] sm:$0xff]  ;;  %v379_v13 = vld [vmem:[%s544_s3] sm:$0xff]  ;;  %vm246_vm2 = vcmask 523264   ;;  %s419_s23 = smov [#allocation2]   ;;  %s278_s27 = sshll.u32 %s548_s7, 4  ;;  %s279_s27 = int_to_ptr.hbm [resolvable:$true] %s278_s27 }
   0x9   :  { %v372_v14 = vld [vmem:[%s543_s2 + $0x10] sm:$0xff]  ;;  %v49_v15 = vld [vmem:[%s542_s1] sm:$0x1]  ;;  %v371_v16 = vld [vmem:[%s543_s2 + $0x8] sm:$0xff]  ;;  %s276_s24 = sshll.u32 %s419_s23, 4  ;;  %vm263_vm3 = vcmask 17408   ;;  %s277_s24 = int_to_ptr.vmem [resolvable:$true] %s276_s24 }
   0xa   :  { %106 = vmatpush.bf16.msra.mxu0 %v382_v6  ;;  %179 = vmatpush.bf16.msra.mxu1 %v375_v7  ;;  %v370_v17 = vld [vmem:[%s543_s2] sm:$0xff]  ;;  %v388_v19 = vld [vmem:[%s546_s5 + $0x18] sm:$0xff]  ;;  %v387_v20 = vld [vmem:[%s546_s5 + $0x10] sm:$0xff]  ;;  %vm269_vm4 = vcmask 1024  }
   0xb   :  { %v118_v10 = vld [vmem:[#allocation1 + $0x9] sm:$0xff]  ;;  %v117_v18 = vld [vmem:[#allocation1] sm:$0xff]  ;;  %254 = vmatpush.bf16.msra.mxu3 %v388_v19 }
   0xc   :  { %352 = vmatmul.msk.bf16.vlgmr.msra.gmra.mxu2 %vm174_vm0, %v118_v10  ;;  %v386_v21 = vld [vmem:[%s546_s5 + $0x8] sm:$0xff]  ;;  %v385_v22 = vld [vmem:[%s546_s5] sm:$0xff] }
   0xd   :  { %v391_v29 = vld [vmem:[%s545_s4] ss:$0 sm:$0xff]  ;;  %s420_s4 = smov 125  }
   0xe   :  { %107 = vmatpush.bf16.msra.mxu0 %v381_v8  ;;  %180 = vmatpush.bf16.msra.mxu1 %v374_v9  ;;  %v392_v35 = vld [vmem:[%s547_s6] ss:$0 sm:$0xff] }
   0xf   :  { %255 = vmatpush.bf16.msra.mxu3 %v387_v20 }
  0x12   :  { %108 = vmatpush.bf16.msra.mxu0 %v380_v11  ;;  %181 = vmatpush.bf16.msra.mxu1 %v373_v12 }
  0x13   :  { %256 = vmatpush.bf16.msra.mxu3 %v386_v21 }
  0x16   :  { %109 = vmatpush.bf16.msra.mxu0 %v379_v13  ;;  %182 = vmatpush.bf16.msra.mxu1 %v372_v14 }
  0x17   :  { %257 = vmatpush.bf16.msra.mxu3 %v385_v22 }
  0x19   :  { %315 = vmatmul.msk.bf16.vlgmr.msra.gmra.mxu0 %vm98_vm1, %v49_v15 }
  0x1a   :  { %183 = vmatpush.bf16.msra.mxu1 %v371_v16 }
  0x1e   :  { %184 = vmatpush.bf16.msra.mxu1 %v370_v17 }
  0x21   :  { %185 = vmatmul.bf16.vlgmr.msra.gmra.mxu1 %v117_v18 }
  0x8f   :  { %v199_v23 = vpop.f32.mrf.mxu2 }
  0x96   :  { %v111_v24 = vpop.f32.mrf.mxu0 }
  0x97   :  { %v201_v25 = vpop.f32.mrf.mxu2 }
  0x9e   :  { %v113_v26 = vpop.f32.mrf.mxu0  ;;  %v186_v27 = vpop.f32.mrf.mxu1 }
  0x9f   :  { %v187_v28 = vadd.f32 %v186_v27, %v111_v24 }
  0xa1   :  { %v200_v30 = vadd.f32 %v199_v23, %v187_v28 }
  0xa3   :  { %v207_v31 = vadd.f32 %v391_v29, %v200_v30 }
  0xa5   :  { %v208_v32 = vmax.f32 %v207_v31, 0.0 }
  0xa6   :  { %v188_v33 = vpop.f32.mrf.mxu1 }
  0xa7   :  { %v209_v34 = vpack.c.bf16 %v208_v32, %v208_v32 }
  0xa9   :  { %369 = vmatmul.msk.bf16.vlgmr.msra.gmra.mxu3 %vm246_vm2, %v209_v34 }
 0x12c   :  { %v259_v36 = vpop.f32.mrf.mxu3 }
 0x12d   :  { %v260_v37 = vadd.f32 %v392_v35, %v259_v36 }
 0x12f   :  { %264 = vst.msk [vmem:[#allocation2] sm:$0x3] %vm263_vm3, %v260_v37  ;;  %266 = vrot.lane.b32.xlu0 %v260_v37, %s420_s4 }
 0x130   :  { %281 = dma.vmem_to_hbm [thread:$0]  %s277_s24, 32, %s279_s27, [#allocation3]  }
 0x134   :  { %v261_v38 = vpop.f32.mrf.mxu3 }
 0x1a1   :  { %v267_v39 = vpop.permute.xlu0 %266 }
 0x1a2   :  { %270 = vst.msk [vmem:[%s549_s8] sm:$0x3] %vm269_vm4, %v267_v39 }
 0x1a3   :  { %417 = dma.done.wait [#allocation3], 32  }
 0x1a4   :  { %418 = vsyncadd [#allocation3], 4294967264 }
 0x1a5   :  { %290 = vsyncpa [#allocation3], 1 }

</bundles_post_ra>
